<compile_context>
chip_gen: v7x
topology: tpu7x:2x2x1
jax: 0.10.0
libtpu: 0.0.40
codegen_flags: <defaults>
</compile_context>

<pallas_src>
import functools
import jax
import jax.numpy as jnp
from jax.experimental import pallas as pl
from jax.experimental.pallas import tpu as pltpu


def _round_up(x, m):
    return (x + m - 1) // m * m


# ----------------------------- kernels --------------------------------------


def _ae_kernel_resident(x_ref, w1_ref, b1_ref, w2_ref, b2_ref, o_ref):
    # first_linear + ReLU (f32 accumulate, f32 elementwise)
    h = jnp.dot(x_ref[...], w1_ref[...], preferred_element_type=jnp.float32)
    h = jnp.maximum(h + b1_ref[...], 0.0)
    # second_linear + ReLU
    y = jnp.dot(h.astype(w2_ref.dtype), w2_ref[...],
                preferred_element_type=jnp.float32)
    o_ref[...] = jnp.maximum(y + b2_ref[...], 0.0).astype(o_ref.dtype)


def _ae_kernel_htiled(x_ref, w1_ref, b1_ref, w2_ref, b2_ref, o_ref, acc_ref):
    # grid = (batch tiles [parallel], hidden tiles [arbitrary/reduction])
    k = pl.program_id(1)

    @pl.when(k == 0)
    def _init():
        # fold the second-layer bias into the accumulator init
        acc_ref[...] = jnp.broadcast_to(b2_ref[...], acc_ref.shape)

    h = jnp.dot(x_ref[...], w1_ref[...], preferred_element_type=jnp.float32)
    h = jnp.maximum(h + b1_ref[...], 0.0)           # ReLU is per hidden unit -> slice-safe
    acc_ref[...] += jnp.dot(h.astype(w2_ref.dtype), w2_ref[...],
                            preferred_element_type=jnp.float32)

    @pl.when(k == pl.num_programs(1) - 1)
    def _finalize():
        o_ref[...] = jnp.maximum(acc_ref[...], 0.0).astype(o_ref.dtype)


# ----------------------------- wrapper ---------------------------------------


def _pick_tile_b(B, per_row_bytes, row_budget):
    """Largest aligned batch tile that fits the VMEM row budget while keeping
    >= 2 grid steps (so both v7x TensorCores get work)."""
    cands = (512, 256, 128, 64, 32, 16, 8)
    for t in cands:                                   # prefer exact divisors
        if t * per_row_bytes <= row_budget and B % t == 0 and B // t >= 2:
            return t
    for t in cands:                                   # allow padding B up
        if t * per_row_bytes <= row_budget and _round_up(B, t) // t >= 2:
            return t
    return 8


def autoencoder_forward(x, w1, b1, w2, b2, *, tile_b=None, tile_h=None,
                        weight_dtype=jnp.bfloat16,
                        vmem_budget=48 * 1024 * 1024):
    """x: (B, N); w1: (N, H); b1: (H,); w2: (H, N); b2: (N,).  Returns (B, N).

    Computes relu(relu(x @ w1 + b1) @ w2 + b2) with f32 accumulation.
    """
    B, N = x.shape
    H = w1.shape[1]
    out_dtype = x.dtype

    # Lane-dense padding: last dims must be multiples of 128.
    N_pad = _round_up(N, 128)
    H_pad = _round_up(H, 128)

    wb = jnp.dtype(weight_dtype).itemsize
    ob = jnp.dtype(out_dtype).itemsize
    weights_bytes = 2 * N_pad * H_pad * wb            # W1 + W2

    # Large weights (would not fit comfortably even double-buffered) -> tile H.
    use_h_tiling = (tile_h is not None) or (2 * weights_bytes > vmem_budget // 2)

    if use_h_tiling:
        if tile_h is None:
            tile_h = 128
            for t in (512, 256):
                if H_pad % t == 0 and 4 * N_pad * t * wb <= vmem_budget // 4:
                    tile_h = t
                    break
        else:
            tile_h = _round_up(int(tile_h), 128)
        H_pad = _round_up(H_pad, tile_h)
        # per-row VMEM: x(2 buf,bf16) + out(2 buf) + acc f32 + h f32 + h bf16
        per_row = N_pad * (2 * wb + 2 * ob + 4) + tile_h * (4 + wb)
        row_budget = vmem_budget - 4 * N_pad * tile_h * wb
    else:
        # per-row VMEM: x(2 buf) + out(2 buf) + y f32 + h f32 + h bf16
        per_row = N_pad * (2 * wb + 2 * ob + 4) + H_pad * (4 + wb)
        row_budget = vmem_budget - 2 * weights_bytes

    if tile_b is None:
        tile_b = _pick_tile_b(B, per_row, max(row_budget, 8 * per_row))
    tile_b = _round_up(max(int(tile_b), 8), 8)        # guard non-8-multiple tiles
    B_pad = _round_up(B, tile_b)
    grid_b = B_pad // tile_b

    # Pad to aligned shapes (zeros keep the math exact; extras are sliced off).
    if B_pad != B or N_pad != N:
        x = jnp.pad(x, ((0, B_pad - B), (0, N_pad - N)))
    if N_pad != N or H_pad != H:
        w1 = jnp.pad(w1, ((0, N_pad - N), (0, H_pad - H)))
        w2 = jnp.pad(w2, ((0, H_pad - H), (0, N_pad - N)))
    if H_pad != H:
        b1 = jnp.pad(b1, (0, H_pad - H))
    if N_pad != N:
        b2 = jnp.pad(b2, (0, N_pad - N))

    # bf16 storage for the MXU inputs; biases stay f32 (f32 elementwise on v5e).
    x_p = x.astype(weight_dtype)
    w1_p = w1.astype(weight_dtype)
    w2_p = w2.astype(weight_dtype)
    b1_2d = b1.astype(jnp.float32).reshape(1, H_pad)
    b2_2d = b2.astype(jnp.float32).reshape(1, N_pad)

    def _vmem_limit(est):
        return int(min(64 * 1024 * 1024,
                       max(32 * 1024 * 1024, 1.5 * est + (4 << 20))))

    if not use_h_tiling:
        est = (2 * tile_b * N_pad * (wb + ob)               # x / out double buffers
               + 2 * weights_bytes                           # worst case: 2x weights
               + tile_b * (H_pad * (4 + wb) + N_pad * 4)     # h f32 + h bf16 + y f32
               + 2 * 8 * (H_pad + N_pad) * 4)                # sublane-padded biases

        def _build(single_buffer_weights):
            if single_buffer_weights:
                res = functools.partial(pl.BlockSpec, pipeline_mode=pl.Buffered(1))
            else:
                res = pl.BlockSpec
            return pl.pallas_call(
                _ae_kernel_resident,
                out_shape=jax.ShapeDtypeStruct((B_pad, N_pad), out_dtype),
                grid_spec=pltpu.PrefetchScalarGridSpec(
                    num_scalar_prefetch=0,
                    grid=(grid_b,),
                    in_specs=[
                        pl.BlockSpec((tile_b, N_pad), lambda i: (i, 0)),  # x tile
                        res((N_pad, H_pad), lambda i: (0, 0)),            # W1 (resident)
                        res((1, H_pad), lambda i: (0, 0)),                # b1
                        res((H_pad, N_pad), lambda i: (0, 0)),            # W2 (resident)
                        res((1, N_pad), lambda i: (0, 0)),                # b2
                    ],
                    out_specs=pl.BlockSpec((tile_b, N_pad), lambda i: (i, 0)),
                ),
                compiler_params=pltpu.CompilerParams(
                    dimension_semantics=("parallel",),
                    vmem_limit_bytes=_vmem_limit(est),
                ),
            )

        try:
            out = _build(True)(x_p, w1_p, b1_2d, w2_p, b2_2d)
        except Exception:
            # pl.Buffered / pipeline_mode unsupported on this jax build:
            # fall back to default double-buffered resident weights (correct,
            # just uses 2x weight VMEM).
            out = _build(False)(x_p, w1_p, b1_2d, w2_p, b2_2d)
    else:
        grid_h = H_pad // tile_h
        est = (2 * tile_b * N_pad * (wb + ob)
               + 4 * N_pad * tile_h * wb                     # W1/W2 slices, 2 buffers
               + tile_b * (N_pad * 4 + tile_h * (4 + wb))    # acc + h f32 + h bf16
               + 2 * 8 * (tile_h + N_pad) * 4)
        out = pl.pallas_call(
            _ae_kernel_htiled,
            out_shape=jax.ShapeDtypeStruct((B_pad, N_pad), out_dtype),
            grid_spec=pltpu.PrefetchScalarGridSpec(
                num_scalar_prefetch=0,
                grid=(grid_b, grid_h),
                in_specs=[
                    pl.BlockSpec((tile_b, N_pad), lambda i, k: (i, 0)),   # x (resident over k)
                    pl.BlockSpec((N_pad, tile_h), lambda i, k: (0, k)),   # W1 slice
                    pl.BlockSpec((1, tile_h), lambda i, k: (0, k)),       # b1 slice
                    pl.BlockSpec((tile_h, N_pad), lambda i, k: (k, 0)),   # W2 slice
                    pl.BlockSpec((1, N_pad), lambda i, k: (0, 0)),        # b2
                ],
                out_specs=pl.BlockSpec((tile_b, N_pad), lambda i, k: (i, 0)),
                scratch_shapes=[pltpu.VMEM((tile_b, N_pad), jnp.float32)],
            ),
            compiler_params=pltpu.CompilerParams(
                dimension_semantics=("parallel", "arbitrary"),
                vmem_limit_bytes=_vmem_limit(est),
            ),
        )(x_p, w1_p, b1_2d, w2_p, b2_2d)

    return out[:B, :N]


def init_params(key, n, hidden_size, init_std=0.03, dtype=jnp.float32):
    """Matches the PyTorch module: trunc_normal(std, clipped at ±2·std) weights,
    zero biases.  Weights are stored pre-transposed as (in, out)."""
    k1, k2 = jax.random.split(key)
    w1_t = init_std * jax.random.truncated_normal(k1, -2.0, 2.0, (hidden_size, n), dtype)
    w2_t = init_std * jax.random.truncated_normal(k2, -2.0, 2.0, (n, hidden_size), dtype)
    return w1_t.T, jnp.zeros((hidden_size,), dtype), w2_t.T, jnp.zeros((n,), dtype)


if __name__ == "__main__":
    B, N, H = 512, 256, 512           # small but MXU / lane aligned
    key = jax.random.PRNGKey(0)
    kx, kp = jax.random.split(key)

    x = jax.random.normal(kx, (B, N), jnp.float32)
    w1, b1, w2, b2 = init_params(kp, n=N, hidden_size=H, init_std=0.03)

    # Path 1: weight-resident fused kernel (auto-picked: tile_b=256, grid=2).
    out_resident = jax.block_until_ready(autoencoder_forward(x, w1, b1, w2, b2))
    # Path 2: H-tiled streaming/accumulating kernel (the large-weight / v7x path).
    out_htiled = jax.block_until_ready(
        autoencoder_forward(x, w1, b1, w2, b2, tile_b=128, tile_h=128))

    # Pure-JAX reference with the same bf16 weight/activation storage, f32 math.
    xb = x.astype(jnp.bfloat16).astype(jnp.float32)
    w1b = w1.astype(jnp.bfloat16).astype(jnp.float32)
    w2b = w2.astype(jnp.bfloat16).astype(jnp.float32)
    h_ref = jnp.maximum(xb @ w1b + b1, 0.0)
    h_ref = h_ref.astype(jnp.bfloat16).astype(jnp.float32)
    ref = jnp.maximum(h_ref @ w2b + b2, 0.0)

    assert out_resident.shape == (B, N) and out_htiled.shape == (B, N)
    assert jnp.allclose(out_resident, ref, atol=1e-2, rtol=1e-2), \
        float(jnp.max(jnp.abs(out_resident - ref)))
    assert jnp.allclose(out_htiled, ref, atol=1e-2, rtol=1e-2), \
        float(jnp.max(jnp.abs(out_htiled - ref)))

    print("KERNEL_OK")
</pallas_src>

<mosaic_0001>
module attributes {stable_mosaic.version = 11 : i64} {
  func.func @_ae_kernel_resident(%arg0: i32, %arg1: memref<256x256xbf16, #tpu.memory_space<vmem>>, %arg2: memref<256x512xbf16, #tpu.memory_space<vmem>>, %arg3: memref<1x512xf32, #tpu.memory_space<vmem>>, %arg4: memref<512x256xbf16, #tpu.memory_space<vmem>>, %arg5: memref<1x256xf32, #tpu.memory_space<vmem>>, %arg6: memref<256x256xf32, #tpu.memory_space<vmem>>) attributes {dimension_semantics = [#tpu.dimension_semantics<parallel>], iteration_bounds = array<i64: 2>, scalar_prefetch = 0 : i64, scratch_operands = 0 : i64, tpu.core_type = #tpu.core_type<tc>, window_params = [{transform_indices = @transform_0, window_bounds = array<i64: 256, 256>}, {pipeline_mode = #tpu.pipeline_mode<synchronous>, transform_indices = @transform_1, window_bounds = array<i64: 256, 512>}, {pipeline_mode = #tpu.pipeline_mode<synchronous>, transform_indices = @transform_2, window_bounds = array<i64: 1, 512>}, {pipeline_mode = #tpu.pipeline_mode<synchronous>, transform_indices = @transform_3, window_bounds = array<i64: 512, 256>}, {pipeline_mode = #tpu.pipeline_mode<synchronous>, transform_indices = @transform_4, window_bounds = array<i64: 1, 256>}, {transform_indices = @transform_5, window_bounds = array<i64: 256, 256>}]} {
    %c0 = arith.constant 0 : index
    %c0_0 = arith.constant 0 : index
    %0 = vector.load %arg1[%c0, %c0_0] : memref<256x256xbf16, #tpu.memory_space<vmem>>, vector<256x256xbf16>
    %c0_1 = arith.constant 0 : index
    %c0_2 = arith.constant 0 : index
    %1 = vector.load %arg2[%c0_1, %c0_2] : memref<256x512xbf16, #tpu.memory_space<vmem>>, vector<256x512xbf16>
    %cst = arith.constant dense<0.000000e+00> : vector<256x512xf32>
    %2 = tpu.matmul %0, %1, %cst {dimension_numbers = #tpu.dot_dimension_numbers<[1], [0], [0], [1], [0, 0, 1, 1], [], []>} : vector<256x256xbf16>, vector<256x512xbf16>, vector<256x512xf32> -> vector<256x512xf32>
    %c0_3 = arith.constant 0 : index
    %c0_4 = arith.constant 0 : index
    %3 = vector.load %arg3[%c0_3, %c0_4] : memref<1x512xf32, #tpu.memory_space<vmem>>, vector<1x512xf32>
    %4 = vector.broadcast %3 : vector<1x512xf32> to vector<256x512xf32>
    %5 = arith.addf %2, %4 : vector<256x512xf32>
    %cst_5 = arith.constant 0.000000e+00 : f32
    %6 = vector.broadcast %cst_5 : f32 to vector<256x512xf32>
    %7 = arith.maximumf %5, %6 : vector<256x512xf32>
    %8 = arith.truncf %7 : vector<256x512xf32> to vector<256x512xbf16>
    %c0_6 = arith.constant 0 : index
    %c0_7 = arith.constant 0 : index
    %9 = vector.load %arg4[%c0_6, %c0_7] : memref<512x256xbf16, #tpu.memory_space<vmem>>, vector<512x256xbf16>
    %cst_8 = arith.constant dense<0.000000e+00> : vector<256x256xf32>
    %10 = tpu.matmul %8, %9, %cst_8 {dimension_numbers = #tpu.dot_dimension_numbers<[1], [0], [0], [1], [0, 0, 1, 1], [], []>} : vector<256x512xbf16>, vector<512x256xbf16>, vector<256x256xf32> -> vector<256x256xf32>
    %c0_9 = arith.constant 0 : index
    %c0_10 = arith.constant 0 : index
    %11 = vector.load %arg5[%c0_9, %c0_10] : memref<1x256xf32, #tpu.memory_space<vmem>>, vector<1x256xf32>
    %12 = vector.broadcast %11 : vector<1x256xf32> to vector<256x256xf32>
    %13 = arith.addf %10, %12 : vector<256x256xf32>
    %cst_11 = arith.constant 0.000000e+00 : f32
    %14 = vector.broadcast %cst_11 : f32 to vector<256x256xf32>
    %15 = arith.maximumf %13, %14 : vector<256x256xf32>
    %c0_12 = arith.constant 0 : index
    %c0_13 = arith.constant 0 : index
    %16 = vector.load %arg6[%c0_12, %c0_13] : memref<256x256xf32, #tpu.memory_space<vmem>>, vector<256x256xf32>
    tpu.vector_store %arg6[%c0_12, %c0_13], %15 {strides = array<i32>} : memref<256x256xf32, #tpu.memory_space<vmem>>, vector<256x256xf32>,
    return
  }
  func.func @transform_0(%arg0: i32) -> (i32, i32) {
    %c0_i32 = arith.constant 0 : i32
    %c0_i32_0 = arith.constant 0 : i32
    return %arg0, %c0_i32 : i32, i32
  }
  func.func @transform_1(%arg0: i32) -> (i32, i32) {
    %c0_i32 = arith.constant 0 : i32
    %c0_i32_0 = arith.constant 0 : i32
    %c0_i32_1 = arith.constant 0 : i32
    return %c0_i32, %c0_i32_0 : i32, i32
  }
  func.func @transform_2(%arg0: i32) -> (i32, i32) {
    %c0_i32 = arith.constant 0 : i32
    %c0_i32_0 = arith.constant 0 : i32
    %c0_i32_1 = arith.constant 0 : i32
    return %c0_i32, %c0_i32_0 : i32, i32
  }
  func.func @transform_3(%arg0: i32) -> (i32, i32) {
    %c0_i32 = arith.constant 0 : i32
    %c0_i32_0 = arith.constant 0 : i32
    %c0_i32_1 = arith.constant 0 : i32
    return %c0_i32, %c0_i32_0 : i32, i32
  }
  func.func @transform_4(%arg0: i32) -> (i32, i32) {
    %c0_i32 = arith.constant 0 : i32
    %c0_i32_0 = arith.constant 0 : i32
    %c0_i32_1 = arith.constant 0 : i32
    return %c0_i32, %c0_i32_0 : i32, i32
  }
  func.func @transform_5(%arg0: i32) -> (i32, i32) {
    %c0_i32 = arith.constant 0 : i32
    %c0_i32_0 = arith.constant 0 : i32
    return %arg0, %c0_i32 : i32, i32
  }
}

module attributes {stable_mosaic.version = 11 : i64} {
  func.func @_ae_kernel_resident(%arg0: i32, %arg1: memref<256x256xbf16, #tpu.memory_space<vmem>>, %arg2: memref<256x512xbf16, #tpu.memory_space<vmem>>, %arg3: memref<1x512xf32, #tpu.memory_space<vmem>>, %arg4: memref<512x256xbf16, #tpu.memory_space<vmem>>, %arg5: memref<1x256xf32, #tpu.memory_space<vmem>>, %arg6: memref<256x256xf32, #tpu.memory_space<vmem>>) attributes {dimension_semantics = [#tpu.dimension_semantics<parallel>], iteration_bounds = array<i64: 2>, scalar_prefetch = 0 : i64, scratch_operands = 0 : i64, tpu.core_type = #tpu.core_type<tc>, window_params = [{transform_indices = @transform_0, window_bounds = array<i64: 256, 256>}, {pipeline_mode = #tpu.pipeline_mode<synchronous>, transform_indices = @transform_1, window_bounds = array<i64: 256, 512>}, {pipeline_mode = #tpu.pipeline_mode<synchronous>, transform_indices = @transform_2, window_bounds = array<i64: 1, 512>}, {pipeline_mode = #tpu.pipeline_mode<synchronous>, transform_indices = @transform_3, window_bounds = array<i64: 512, 256>}, {pipeline_mode = #tpu.pipeline_mode<synchronous>, transform_indices = @transform_4, window_bounds = array<i64: 1, 256>}, {transform_indices = @transform_5, window_bounds = array<i64: 256, 256>}]} {
    %c0 = arith.constant 0 : index
    %c0_0 = arith.constant 0 : index
    %0 = vector.load %arg1[%c0, %c0_0] : memref<256x256xbf16, #tpu.memory_space<vmem>>, vector<256x256xbf16>
    %c0_1 = arith.constant 0 : index
    %c0_2 = arith.constant 0 : index
    %1 = vector.load %arg2[%c0_1, %c0_2] : memref<256x512xbf16, #tpu.memory_space<vmem>>, vector<256x512xbf16>
    %cst = arith.constant dense<0.000000e+00> : vector<256x512xf32>
    %2 = tpu.matmul %0, %1, %cst {dimension_numbers = #tpu.dot_dimension_numbers<[1], [0], [0], [1], [0, 0, 1, 1], [], []>} : vector<256x256xbf16>, vector<256x512xbf16>, vector<256x512xf32> -> vector<256x512xf32>
    %c0_3 = arith.constant 0 : index
    %c0_4 = arith.constant 0 : index
    %3 = vector.load %arg3[%c0_3, %c0_4] : memref<1x512xf32, #tpu.memory_space<vmem>>, vector<1x512xf32>
    %4 = vector.broadcast %3 : vector<1x512xf32> to vector<256x512xf32>
    %5 = arith.addf %2, %4 : vector<256x512xf32>
    %cst_5 = arith.constant 0.000000e+00 : f32
    %6 = vector.broadcast %cst_5 : f32 to vector<256x512xf32>
    %7 = arith.maximumf %5, %6 : vector<256x512xf32>
    %8 = arith.truncf %7 : vector<256x512xf32> to vector<256x512xbf16>
    %c0_6 = arith.constant 0 : index
    %c0_7 = arith.constant 0 : index
    %9 = vector.load %arg4[%c0_6, %c0_7] : memref<512x256xbf16, #tpu.memory_space<vmem>>, vector<512x256xbf16>
    %cst_8 = arith.constant dense<0.000000e+00> : vector<256x256xf32>
    %10 = tpu.matmul %8, %9, %cst_8 {dimension_numbers = #tpu.dot_dimension_numbers<[1], [0], [0], [1], [0, 0, 1, 1], [], []>} : vector<256x512xbf16>, vector<512x256xbf16>, vector<256x256xf32> -> vector<256x256xf32>
    %c0_9 = arith.constant 0 : index
    %c0_10 = arith.constant 0 : index
    %11 = vector.load %arg5[%c0_9, %c0_10] : memref<1x256xf32, #tpu.memory_space<vmem>>, vector<1x256xf32>
    %12 = vector.broadcast %11 : vector<1x256xf32> to vector<256x256xf32>
    %13 = arith.addf %10, %12 : vector<256x256xf32>
    %cst_11 = arith.constant 0.000000e+00 : f32
    %14 = vector.broadcast %cst_11 : f32 to vector<256x256xf32>
    %15 = arith.maximumf %13, %14 : vector<256x256xf32>
    %c0_12 = arith.constant 0 : index
    %c0_13 = arith.constant 0 : index
    %16 = vector.load %arg6[%c0_12, %c0_13] : memref<256x256xf32, #tpu.memory_space<vmem>>, vector<256x256xf32>
    tpu.vector_store %arg6[%c0_12, %c0_13], %15 {strides = array<i32>} : memref<256x256xf32, #tpu.memory_space<vmem>>, vector<256x256xf32>,
    return
  }
  func.func @transform_0(%arg0: i32) -> (i32, i32) {
    %c0_i32 = arith.constant 0 : i32
    %c0_i32_0 = arith.constant 0 : i32
    return %arg0, %c0_i32 : i32, i32
  }
  func.func @transform_1(%arg0: i32) -> (i32, i32) {
    %c0_i32 = arith.constant 0 : i32
    %c0_i32_0 = arith.constant 0 : i32
    %c0_i32_1 = arith.constant 0 : i32
    return %c0_i32, %c0_i32_0 : i32, i32
  }
  func.func @transform_2(%arg0: i32) -> (i32, i32) {
    %c0_i32 = arith.constant 0 : i32
    %c0_i32_0 = arith.constant 0 : i32
    %c0_i32_1 = arith.constant 0 : i32
    return %c0_i32, %c0_i32_0 : i32, i32
  }
  func.func @transform_3(%arg0: i32) -> (i32, i32) {
    %c0_i32 = arith.constant 0 : i32
    %c0_i32_0 = arith.constant 0 : i32
    %c0_i32_1 = arith.constant 0 : i32
    return %c0_i32, %c0_i32_0 : i32, i32
  }
  func.func @transform_4(%arg0: i32) -> (i32, i32) {
    %c0_i32 = arith.constant 0 : i32
    %c0_i32_0 = arith.constant 0 : i32
    %c0_i32_1 = arith.constant 0 : i32
    return %c0_i32, %c0_i32_0 : i32, i32
  }
  func.func @transform_5(%arg0: i32) -> (i32, i32) {
    %c0_i32 = arith.constant 0 : i32
    %c0_i32_0 = arith.constant 0 : i32
    return %arg0, %c0_i32 : i32, i32
  }
}

</mosaic_0001>

<bundles_post_ra>
// kernel: tpu_custom_call.1
= control target key start
LH: loop header
LB: loop body
LE: loop exit
PB: predicated region body
PF: predicated region fallthrough
CT: control target
= control target key end

     0   :  { %10 = vsyncpa [#allocation3], 0  ;;  %s3991_s0 = inlined_call_operand.hbm [shape: bf16[512,256], index: 0, kind: input, shape index: {}]   ;;  %s3992_s1 = inlined_call_operand.hbm [shape: bf16[256,512], index: 1, kind: input, shape index: {}]   ;;  %s3993_s2 = inlined_call_operand.vmem [shape: f32[1,512], index: 2, kind: input, shape index: {}]   ;;  %s3994_s3 = inlined_call_operand.hbm [shape: bf16[512,256], index: 3, kind: input, shape index: {}]   ;;  %s3995_s4 = inlined_call_operand.vmem [shape: f32[1,256], index: 4, kind: input, shape index: {}]   ;;  %s3996_s5 = inlined_call_operand.hbm [shape: f32[512,256], index: 5, kind: output, shape index: {}]  }
   0x1   :  { %12 = vsyncpa [#allocation3 + $0x1], 0 }
   0x2   :  { %13 = vsyncpa [#allocation6], 0 }
   0x3   :  { %14 = vsyncpa [#allocation4], 0 }
   0x4   :  { %16 = vsyncpa [#allocation4 + $0x1], 0  ;;  %s3291_s18 = smov 0   ;;  %s3293_s19 = smov 0  }
   0x5   :  { %s3295_s20 = smov 0   ;;  %s3297_s21 = smov 0  }
   0x6 LB: > { %s3312_s22 = sadd.s32 4294967295, %s3249_s21   ;;  %s2468_s23 = sadd.s32 4294967294, %s3249_s21   ;;  %s3249_s21 = sphi %s3297_s21, %s4016_s21   ;;  %s3245_s20 = sphi %s3295_s20, %s4015_s20   ;;  %s3241_s19 = sphi %s3293_s19, %s4014_s19   ;;  %s3237_s18 = sphi %s3291_s18, %s4013_s18  }
   0x7   : > { %p42_p0 = scmp.ne.s32.totalorder %s3241_s19, %s3237_s18  ;;  %p3997_p1 = scmp.eq.s32.totalorder %s3312_s22, 0 }
   0x8   : > { %p156_p3 = scmp.eq.s32.totalorder %s2468_s23, 1  ;;  %p2469_p5 = scmp.ge.s32.totalorder %s3249_s21, 1 }
   0x9   : > { %p3321_p4 = por %p3997_p1, %p42_p0  ;;  %p163_p7 = scmp.lt.s32.totalorder %s3249_s21, 3 }
   0xa   : > { %p3326_p6 = por %p156_p3, %p42_p0  ;;  %s3251_s27 = smov [#allocation5]  }
   0xb   : > { %s4000_s24 = scalar_select %p3321_p4, 1, 0 }
   0xc   : > { %s4001_s25 = scalar_select %p3326_p6, 1, 0 }
   0xd   : > { %p3331_p8 = pnand %p2469_p5, %p163_p7  ;;  %s175_s28 = sshll.u32 %s3251_s27, 4  ;;  %s3335_s28 = int_to_ptr.vmem [resolvable:$true] %s175_s28 }
   0xe   : > { %s3252_s30 = smov [#allocation7]   ;;  %s3093_s9 = scalar_lea.hbm %s3992_s1, 8192 }
   0xf   : > { %p2792_p9 = pneg %p3331_p8  ;;  %s191_s6 = sshll.u32 %s3252_s30, 4  ;;  %s3346_s6 = int_to_ptr.vmem [resolvable:$true] %s191_s6 }
  0x10   : > { %p3094_p12 = scmp.ne.s32.totalorder %s3992_s1, %s3093_s9  ;;  %p3100_p5 = scmp.lt.u32.totalorder %s3093_s9, %s3992_s1 }
  0x11   : > { %p3342_p11 = pnand %p2792_p9, %p3997_p1 }
  0x13   : > { %p3095_p13 = pneg %p3342_p11 }
  0x15   : > { %p3096_p0 = pnand %p3095_p13, %p3094_p12 }
  0x17   : > { %p3097_p3 = pneg %p3096_p0 }
  0x19   : > { %p3102_p7 = pnand %p3100_p5, %p3097_p3 }
  0x1b   : > { %3105 = shalt.err (!%p3102_p7)
}
  0x1c   : > { %s3106_s14 = scalar_lea.vmem %s3335_s28, 8192  ;;  %p3114_p2 = scmp.lt.s32.totalorder %s3335_s28, %s3335_s28 }
  0x1d   : > { %p3107_p9 = scmp.ne.s32.totalorder %s3335_s28, %s3106_s14  ;;  %p3115_p12 = scmp.lt.s32.totalorder %s3106_s14, %s3106_s14 }
  0x1f   : > { %p3109_p10 = pnand %p3107_p9, %p3095_p13  ;;  %p3116_p0 = por %p3115_p12, %p3114_p2 }
  0x21   : > { %p3110_p1 = pneg %p3109_p10 }
  0x23   : > { %p3117_p6 = pnand %p3116_p0, %p3110_p1 }
  0x25   : > { %3120 = shalt.err (!%p3117_p6)
}
  0x26   : > { %s3253_s15 = smov 256   ;;  %s3254_s16 = smov 16  }
  0x27   : > { %2795 = dma.hbm_to_vmem [thread:$0]  (!%p3342_p11), %s3992_s1, 8192, %s3335_s28, [#allocation6], %s3253_s15, %s3253_s15, %s3254_s16  }
  0x28   : > { %s3121_s7 = scalar_lea.hbm %s3994_s3, 8192 }
  0x29   : > { %p3122_p2 = scmp.ne.s32.totalorder %s3994_s3, %s3121_s7  ;;  %p3128_p10 = scmp.lt.u32.totalorder %s3121_s7, %s3994_s3 }
  0x2b   : > { %p3124_p1 = pnand %p3122_p2, %p3095_p13 }
  0x2d   : > { %p3125_p6 = pneg %p3124_p1 }
  0x2f   : > { %p3130_p3 = pnand %p3128_p10, %p3125_p6 }
  0x31   : > { %3133 = shalt.err (!%p3130_p3)
}
  0x32   : > { %s3134_s28 = scalar_lea.vmem %s3346_s6, 8192  ;;  %p3142_p12 = scmp.lt.s32.totalorder %s3346_s6, %s3346_s6 }
  0x33   : > { %p3135_p5 = scmp.ne.s32.totalorder %s3346_s6, %s3134_s28  ;;  %p3143_p0 = scmp.lt.s32.totalorder %s3134_s28, %s3134_s28 }
  0x35   : > { %p3137_p7 = pnand %p3135_p5, %p3095_p13  ;;  %p3144_p2 = por %p3143_p0, %p3142_p12 }
  0x37   : > { %p3138_p9 = pneg %p3137_p7 }
  0x39   : > { %p3145_p1 = pnand %p3144_p2, %p3138_p9 }
  0x3b   : > { %3148 = shalt.err (!%p3145_p1)
}
  0x3c   : > { %s3255_s12 = smov 128   ;;  %s3256_s13 = smov 8  }
  0x3d   : > { %2798 = dma.hbm_to_vmem [thread:$0]  (!%p3342_p11), %s3994_s3, 8192, %s3346_s6, [#allocation6], %s3255_s12, %s3255_s12, %s3256_s13  }
  0x3e   : > { %s3404_s16 = sadd.s32 1, %s3249_s21   ;;  %s29_s23 = sadd.s32 1, %s3245_s20 }
  0x3f   : > { %s26_s17 = ssub.s32 %s3249_s21, %s3404_s16  ;;  %p36_p6 = scmp.ne.s32.totalorder %s3245_s20, %s3241_s19 }
  0x40   : > { %p27_p13 = scmp.eq.s32.totalorder %s26_s17, 0  ;;  %p37_p10 = scmp.eq.s32.totalorder %s3249_s21, 0 }
  0x41   : > { %p4004_p5 = scmp.eq.s32.totalorder %s3312_s22, 1  ;;  %p2809_p9 = scmp.lt.s32.totalorder %s3249_s21, 2 }
  0x42   : > { %s3413_s27 = scalar_select %p27_p13, %s3245_s20, %s29_s23  }
  0x43   : > { %p38_p3 = por %p37_p10, %p36_p6  ;;  %p3417_p7 = por %p4004_p5, %p36_p6 }
  0x44   : > { %s208_s30 = sand.u32 1, %s3245_s20   ;;  %s2649_s6 = sshll.u32 %s3249_s21, 12 }
  0x45   : > { %s4005_s29 = scalar_select %p3417_p7, 1, 0 }
  0x46   : > { %s2473_s7 = sshll.u32 %s208_s30, 8  ;;  %s3427_s10 = scalar_lea.hbm %s3991_s0, %s2649_s6 }
  0x47   : > { %s212_s11 = scalar_lea.vmem [#allocation2], %s2473_s7  ;;  %p3431_p11 = pnand %p2809_p9, %p38_p3 }
  0x48   : > { %s220_s28 = sshll.u32 %s212_s11, 4  ;;  %s3435_s15 = scalar_lea.sflag [#allocation3], %s208_s30  ;;  %s3429_s28 = int_to_ptr.vmem [resolvable:$true] %s220_s28 }
  0x49   : > { %s3149_s17 = scalar_lea.hbm %s3427_s10, 4096  ;;  %p3151_p0 = pneg %p3431_p11 }
  0x4a   : > { %p3150_p12 = scmp.ne.s32.totalorder %s3427_s10, %s3149_s17  ;;  %s3154_s6 = scalar_lea.hbm %s3991_s0, 8192 }
  0x4b   : > { %p3155_p13 = scmp.lt.u32.totalorder %s3427_s10, %s3991_s0  ;;  %p3156_p6 = scmp.lt.u32.totalorder %s3154_s6, %s3149_s17 }
  0x4c   : > { %p3152_p2 = pnand %p3151_p0, %p3150_p12  ;;  %p3158_p3 = scmp.lt.u32.totalorder %s3149_s17, %s3427_s10 }
  0x4d   : > { %p3157_p10 = por %p3156_p6, %p3155_p13 }
  0x4e   : > { %p3153_p1 = pneg %p3152_p2 }
  0x4f   : > { %p3159_p5 = por %p3158_p3, %p3157_p10 }
  0x51   : > { %p3160_p9 = pnand %p3159_p5, %p3153_p1 }
  0x53   : > { %3163 = shalt.err (!%p3160_p9)
}
  0x54   : > { %s3164_s30 = scalar_lea.vmem %s3429_s28, 4096  ;;  %s3257_s11 = smov [#allocation2]  }
  0x55   : > { %p3165_p12 = scmp.ne.s32.totalorder %s3429_s28, %s3164_s30  ;;  %s3169_s23 = sshll.u32 %s3257_s11, 4  ;;  %s3170_s23 = int_to_ptr.vmem [resolvable:$false] %s3169_s23 }
  0x56   : > { %s3171_s7 = scalar_lea.vmem %s3170_s23, 8192  ;;  %p3172_p4 = scmp.lt.s32.totalorder %s3429_s28, %s3170_s23 }
  0x57   : > { %p3167_p2 = pnand %p3165_p12, %p3151_p0  ;;  %p3173_p13 = scmp.lt.s32.totalorder %s3171_s7, %s3164_s30 }
  0x59   : > { %p3168_p7 = pneg %p3167_p2  ;;  %p3174_p6 = por %p3173_p13, %p3172_p4 }
  0x5b   : > { %p3175_p10 = pnand %p3174_p6, %p3168_p7 }
  0x5d   : > { %3178 = shalt.err (!%p3175_p10)
}
  0x5e   : > { %2802 = dma.hbm_to_vmem [thread:$0]  (!%p3431_p11), %s3427_s10, 4096, %s3429_s28, %s3435_s15, %s3255_s12, %s3255_s12, %s3256_s13  }
  0x5f   : > { %232 = sbr.rel (%p3331_p8) target bundleno = 875 (0x36b), region = 40  ;;  %s3469_s17 = sand.u32 (!%p3331_p8), 1, %s3241_s19  }
  0x60   : > { %s2478_s6 = sshll.u32 (!%p3331_p8), %s3469_s17, 8  ;;  %s235_s8 = scalar_lea.sflag (!%p3331_p8), [#allocation3], %s3469_s17 }
  0x61   : > { %s3473_s9 = scalar_lea.vmem (!%p3331_p8), [#allocation2], %s2478_s6  ;;  %p4007_p4 = scmp.ne.s32.totalorder (!%p3331_p8), %s4000_s24, 0 }
  0x66   : > { %3224 = dma.done.wait (%p4007_p4), %s235_s8, 4096  }
  0x67   : > { %3226 = vsyncadd (%p4007_p4), %s235_s8, 4294963200  ;;  %p4008_p7 = scmp.eq.s32.totalorder %s3312_s22, 0 }
  0x69   : > { %3228 = dma.done.wait (%p4008_p7), [#allocation6], 16384   ;;  %p4009_p8 = pmov %p4008_p7 }
  0x6a   : > { %v2853_v0 = vld [vmem:[#allocation5 + $0x4] ss:$16 sps:$4 sm:$0xff]   ;;  %v2855_v1 = vld [vmem:[#allocation5] ss:$16 sps:$4 sm:$0xff]   ;;  %v2906_v33 = vld [vmem:[#allocation5 + $0xc] ss:$16 sps:$4 sm:$0xff]  }
  0x6b   : > { %3230 = vsyncadd (%p4009_p8), [#allocation6], 4294950912  ;;  %873 = vmatprep.subr.bf16.mxu1 %v2853_v0  ;;  %v2856_v2 = vld [vmem:[#allocation5 + $0x24] ss:$16 sps:$4 sm:$0xff]   ;;  %v2858_v3 = vld [vmem:[#allocation5 + $0x20] ss:$16 sps:$4 sm:$0xff]  }
  0x6c   : > { %874 = vmatpush1.bf16.msra.mxu1 %v2855_v1  ;;  %v2859_v4 = vld [vmem:[#allocation5 + $0x44] ss:$16 sps:$4 sm:$0xff]   ;;  %v2861_v5 = vld [vmem:[#allocation5 + $0x40] ss:$16 sps:$4 sm:$0xff]   ;;  %v2904_v35 = vld [vmem:[#allocation5 + $0x8] ss:$16 sps:$4 sm:$0xff]  }
  0x6d   : > { %875 = vmatprep.subr.bf16.mxu1 %v2856_v2  ;;  %v2862_v6 = vld [vmem:[#allocation5 + $0x64] ss:$16 sps:$4 sm:$0xff]   ;;  %v2864_v7 = vld [vmem:[#allocation5 + $0x60] ss:$16 sps:$4 sm:$0xff]   ;;  %v2912_v37 = vld [vmem:[#allocation5 + $0x2c] ss:$16 sps:$4 sm:$0xff]  }
  0x6e   : > { %v2865_v8 = vld [vmem:[#allocation5 + $0x84] ss:$16 sps:$4 sm:$0xff]   ;;  %v2867_v9 = vld [vmem:[#allocation5 + $0x80] ss:$16 sps:$4 sm:$0xff]   ;;  %v2910_v38 = vld [vmem:[#allocation5 + $0x28] ss:$16 sps:$4 sm:$0xff]  }
  0x6f   : > { %v2868_v10 = vld [vmem:[#allocation5 + $0xa4] ss:$16 sps:$4 sm:$0xff]   ;;  %v2870_v11 = vld [vmem:[#allocation5 + $0xa0] ss:$16 sps:$4 sm:$0xff]   ;;  %v2918_v39 = vld [vmem:[#allocation5 + $0x4c] ss:$16 sps:$4 sm:$0xff]  }
  0x70   : > { %876 = vmatpush1.bf16.msra.mxu1 %v2858_v3  ;;  %v2871_v12 = vld [vmem:[#allocation5 + $0xc4] ss:$16 sps:$4 sm:$0xff]   ;;  %v2873_v14 = vld [vmem:[#allocation5 + $0xc0] ss:$16 sps:$4 sm:$0xff]   ;;  %v2916_v42 = vld [vmem:[#allocation5 + $0x48] ss:$16 sps:$4 sm:$0xff]  }
  0x71   : > { %877 = vmatprep.subr.bf16.mxu1 %v2859_v4  ;;  %v3484_v13 = vld [vmem:[%s3473_s9 + $0x4] ss:$8 sps:$4 sm:$0xff]   ;;  %v2876_v16 = vld [vmem:[#allocation5 + $0xe0] ss:$16 sps:$4 sm:$0xff]   ;;  %v3491_v36 = vld [vmem:[%s3473_s9 + $0x14] ss:$8 sps:$4 sm:$0xff]  }
  0x72   : > { %v2874_v15 = vld [vmem:[#allocation5 + $0xe4] ss:$16 sps:$4 sm:$0xff]   ;;  %905 = vmatprep.mubr.bf16.mxu1 %v3484_v13  ;;  %v2879_v18 = vld [vmem:[#allocation5 + $0x100] ss:$16 sps:$4 sm:$0xff]   ;;  %v2924_v43 = vld [vmem:[#allocation5 + $0x6c] ss:$16 sps:$4 sm:$0xff]  }
  0x73   : > { %v2877_v17 = vld [vmem:[#allocation5 + $0x104] ss:$16 sps:$4 sm:$0xff]   ;;  %v2882_v20 = vld [vmem:[#allocation5 + $0x120] ss:$16 sps:$4 sm:$0xff]   ;;  %v2922_v44 = vld [vmem:[#allocation5 + $0x68] ss:$16 sps:$4 sm:$0xff]  }
  0x74   : > { %878 = vmatpush1.bf16.msra.mxu1 %v2861_v5  ;;  %v2880_v19 = vld [vmem:[#allocation5 + $0x124] ss:$16 sps:$4 sm:$0xff]   ;;  %v2885_v22 = vld [vmem:[#allocation5 + $0x140] ss:$16 sps:$4 sm:$0xff]   ;;  %v2930_v45 = vld [vmem:[#allocation5 + $0x8c] ss:$16 sps:$4 sm:$0xff]  }
  0x75   : > { %879 = vmatprep.subr.bf16.mxu1 %v2862_v6  ;;  %v2883_v21 = vld [vmem:[#allocation5 + $0x144] ss:$16 sps:$4 sm:$0xff]   ;;  %v2888_v24 = vld [vmem:[#allocation5 + $0x160] ss:$16 sps:$4 sm:$0xff]   ;;  %v2928_v48 = vld [vmem:[#allocation5 + $0x88] ss:$16 sps:$4 sm:$0xff]  }
  0x76   : > { %v2886_v23 = vld [vmem:[#allocation5 + $0x164] ss:$16 sps:$4 sm:$0xff]   ;;  %v2891_v26 = vld [vmem:[#allocation5 + $0x180] ss:$16 sps:$4 sm:$0xff]   ;;  %v2936_v49 = vld [vmem:[#allocation5 + $0xac] ss:$16 sps:$4 sm:$0xff]  }
  0x77   : > { %v2889_v25 = vld [vmem:[#allocation5 + $0x184] ss:$16 sps:$4 sm:$0xff]   ;;  %v2894_v28 = vld [vmem:[#allocation5 + $0x1a0] ss:$16 sps:$4 sm:$0xff]   ;;  %v2934_v50 = vld [vmem:[#allocation5 + $0xa8] ss:$16 sps:$4 sm:$0xff]  }
  0x78   : > { %880 = vmatpush1.bf16.msra.mxu1 %v2864_v7  ;;  %v2892_v27 = vld [vmem:[#allocation5 + $0x1a4] ss:$16 sps:$4 sm:$0xff]   ;;  %v2897_v30 = vld [vmem:[#allocation5 + $0x1c0] ss:$16 sps:$4 sm:$0xff]   ;;  %v2942_v51 = vld [vmem:[#allocation5 + $0xcc] ss:$16 sps:$4 sm:$0xff]  }
  0x79   : > { %881 = vmatprep.subr.bf16.mxu1 %v2865_v8  ;;  %v2895_v29 = vld [vmem:[#allocation5 + $0x1c4] ss:$16 sps:$4 sm:$0xff]   ;;  %v2900_v32 = vld [vmem:[#allocation5 + $0x1e0] ss:$16 sps:$4 sm:$0xff]   ;;  %v2940_v54 = vld [vmem:[#allocation5 + $0xc8] ss:$16 sps:$4 sm:$0xff]  }
  0x7a   : > { %v2898_v31 = vld [vmem:[#allocation5 + $0x1e4] ss:$16 sps:$4 sm:$0xff]   ;;  %v3488_v34 = vld [vmem:[%s3473_s9] ss:$8 sps:$4 sm:$0xff]   ;;  %v3496_v40 = vld [vmem:[%s3473_s9 + $0x10] ss:$8 sps:$4 sm:$0xff]  }
  0x7b   : > { %v3499_v41 = vld [vmem:[%s3473_s9 + $0x24] ss:$8 sps:$4 sm:$0xff]   ;;  %v3504_v46 = vld [vmem:[%s3473_s9 + $0x20] ss:$8 sps:$4 sm:$0xff]   ;;  %v3507_v47 = vld [vmem:[%s3473_s9 + $0x34] ss:$8 sps:$4 sm:$0xff]  }
  0x7c   : > { %882 = vmatpush1.bf16.msra.mxu1 %v2867_v9  ;;  %v3512_v52 = vld [vmem:[%s3473_s9 + $0x30] ss:$8 sps:$4 sm:$0xff]   ;;  %v3515_v53 = vld [vmem:[%s3473_s9 + $0x44] ss:$8 sps:$4 sm:$0xff]   ;;  %v2999_v58 = vld [vmem:[#allocation7] ss:$8 sps:$4 sm:$0xff]  }
  0x7d   : > { %883 = vmatprep.subr.bf16.mxu1 %v2868_v10  ;;  %v2948_v55 = vld [vmem:[#allocation5 + $0xec] ss:$16 sps:$4 sm:$0xff]   ;;  %v2946_v57 = vld [vmem:[#allocation5 + $0xe8] ss:$16 sps:$4 sm:$0xff]   ;;  %s2481_s10 = sshll.u32 %s3469_s17, 9  ;;  %s2651_s14 = sshll.u32 %s3312_s22, 13 }
  0x7e   : > { %v2997_v56 = vld [vmem:[#allocation7 + $0x4] ss:$8 sps:$4 sm:$0xff]   ;;  %v3520_v60 = vld [vmem:[%s3473_s9 + $0x40] ss:$8 sps:$4 sm:$0xff]   ;;  %v3523_v61 = vld [vmem:[%s3473_s9 + $0x54] ss:$8 sps:$4 sm:$0xff]   ;;  %s3942_s23 = scalar_lea.hbm %s3996_s5, %s2651_s14 }
  0x7f   : > { %v2954_v59 = vld [vmem:[#allocation5 + $0x10c] ss:$16 sps:$4 sm:$0xff]   ;;  %1847 = vmatprep.subr.bf16.mxu0 %v2997_v56  ;;  %v2952_v62 = vld [vmem:[#allocation5 + $0x108] ss:$16 sps:$4 sm:$0xff]   ;;  %s3814_s28 = scalar_lea.vmem [#allocation8], %s2481_s10  ;;  %s2362_s22 = scalar_lea.sflag [#allocation4], %s3469_s17 }
  0x80   : > { %884 = vmatpush1.bf16.msra.mxu1 %v2870_v11  ;;  %1848 = vmatpush1.bf16.msra.mxu0 %v2999_v58  ;;  %v2960_v63 = vld [vmem:[#allocation5 + $0x12c] ss:$16 sps:$4 sm:$0xff]   ;;  %v3002_v1 = vld [vmem:[#allocation7 + $0x10] ss:$8 sps:$4 sm:$0xff]   ;;  %v3005_v5 = vld [vmem:[#allocation7 + $0x20] ss:$8 sps:$4 sm:$0xff]  }
  0x81   : > { %885 = vmatprep.subr.bf16.mxu1 %v2871_v12  ;;  %v3000_v0 = vld [vmem:[#allocation7 + $0x14] ss:$8 sps:$4 sm:$0xff]   ;;  %v3003_v2 = vld [vmem:[#allocation7 + $0x24] ss:$8 sps:$4 sm:$0xff]   ;;  %v2958_v3 = vld [vmem:[#allocation5 + $0x128] ss:$16 sps:$4 sm:$0xff]  }
  0x82   : > { %v2966_v4 = vld [vmem:[#allocation5 + $0x14c] ss:$16 sps:$4 sm:$0xff]   ;;  %1849 = vmatprep.subr.bf16.mxu0 %v3000_v0  ;;  %v3528_v6 = vld [vmem:[%s3473_s9 + $0x50] ss:$8 sps:$4 sm:$0xff]   ;;  %v3568_v56 = vld [vmem:[%s3473_s9 + $0xa0] ss:$8 sps:$4 sm:$0xff]  }
  0x83   : > { %v3531_v7 = vld [vmem:[%s3473_s9 + $0x64] ss:$8 sps:$4 sm:$0xff]   ;;  %v2964_v8 = vld [vmem:[#allocation5 + $0x148] ss:$16 sps:$4 sm:$0xff]   ;;  %v3006_v10 = vld [vmem:[#allocation7 + $0x34] ss:$8 sps:$4 sm:$0xff]  }
  0x84   : > { %886 = vmatpush1.bf16.msra.mxu1 %v2873_v14  ;;  %1850 = vmatpush1.bf16.msra.mxu0 %v3002_v1  ;;  %v2972_v9 = vld [vmem:[#allocation5 + $0x16c] ss:$16 sps:$4 sm:$0xff]   ;;  %v3008_v11 = vld [vmem:[#allocation7 + $0x30] ss:$8 sps:$4 sm:$0xff]   ;;  %v3041_v1 = vld [vmem:[#allocation7 + $0xe0] ss:$8 sps:$4 sm:$0xff]  }
  0x85   : > { %887 = vmatprep.subr.bf16.mxu1 %v2874_v15  ;;  %1851 = vmatprep.subr.bf16.mxu0 %v3003_v2  ;;  %v3009_v12 = vld [vmem:[#allocation7 + $0x44] ss:$8 sps:$4 sm:$0xff]   ;;  %v2970_v14 = vld [vmem:[#allocation5 + $0x168] ss:$16 sps:$4 sm:$0xff]   ;;  %v3036_v58 = vld [vmem:[#allocation7 + $0xd4] ss:$8 sps:$4 sm:$0xff]  }
  0x86   : > { %v2978_v15 = vld [vmem:[#allocation5 + $0x18c] ss:$16 sps:$4 sm:$0xff]   ;;  %s2376_s15 = sshll.u32 %s3814_s28, 4  ;;  %p4010_p0 = scmp.ne.s32.totalorder %s4005_s29, 0  ;;  %s3944_s15 = int_to_ptr.vmem [resolvable:$true] %s2376_s15 }
  0x87   : > { %v3579_v0 = vld [vmem:[%s3473_s9 + $0xc4] ss:$8 sps:$4 sm:$0xff]   ;;  %v3042_v2 = vld [vmem:[#allocation7 + $0xf4] ss:$8 sps:$4 sm:$0xff]   ;;  %s3179_s7 = scalar_lea.vmem %s3944_s15, 8192  ;;  %s3258_s6 = smov [#allocation8]  }
  0x88   : > { %888 = vmatpush1.bf16.msra.mxu1 %v2876_v16  ;;  %1852 = vmatpush1.bf16.msra.mxu0 %v3005_v5  ;;  %v3011_v16 = vld [vmem:[#allocation7 + $0x40] ss:$8 sps:$4 sm:$0xff]   ;;  %v3587_v5 = vld [vmem:[%s3473_s9 + $0xd4] ss:$8 sps:$4 sm:$0xff]   ;;  %p3180_p11 = scmp.ne.s32.totalorder %s3944_s15, %s3179_s7  ;;  %s3183_s8 = sshll.u32 %s3258_s6, 4  ;;  %s3184_s8 = int_to_ptr.vmem [resolvable:$false] %s3183_s8 }
  0x89   : > { %889 = vmatprep.subr.bf16.mxu1 %v2877_v17  ;;  %1853 = vmatprep.subr.bf16.mxu0 %v3006_v10  ;;  %v3536_v17 = vld [vmem:[%s3473_s9 + $0x60] ss:$8 sps:$4 sm:$0xff]   ;;  %v3595_v10 = vld [vmem:[%s3473_s9 + $0xe4] ss:$8 sps:$4 sm:$0xff]   ;;  %p3186_p5 = scmp.lt.s32.totalorder %s3944_s15, %s3184_s8 }
  0x8a   : > { %p3181_p1 = pnand %p3180_p11, %p4010_p0 }
  0x8c   : > { %890 = vmatpush1.bf16.msra.mxu1 %v2879_v18  ;;  %1854 = vmatpush1.bf16.msra.mxu0 %v3008_v11  ;;  %v3539_v18 = vld [vmem:[%s3473_s9 + $0x74] ss:$8 sps:$4 sm:$0xff]   ;;  %v3600_v11 = vld [vmem:[%s3473_s9 + $0xe0] ss:$8 sps:$4 sm:$0xff]   ;;  %p3182_p3 = pneg %p3181_p1 }
  0x8d   : > { %891 = vmatprep.subr.bf16.mxu1 %v2880_v19  ;;  %1855 = vmatprep.subr.bf16.mxu0 %v3009_v12  ;;  %v2976_v19 = vld [vmem:[#allocation5 + $0x188] ss:$16 sps:$4 sm:$0xff]   ;;  %v3603_v12 = vld [vmem:[%s3473_s9 + $0xf4] ss:$8 sps:$4 sm:$0xff]  }
  0x90   : > { %892 = vmatpush1.bf16.msra.mxu1 %v2882_v20  ;;  %v2984_v20 = vld [vmem:[#allocation5 + $0x1ac] ss:$16 sps:$4 sm:$0xff]   ;;  %1856 = vmatpush1.bf16.msra.mxu0 %v3011_v16 }
  0x91   : > { %893 = vmatprep.subr.bf16.mxu1 %v2883_v21  ;;  %v3012_v21 = vld [vmem:[#allocation7 + $0x54] ss:$8 sps:$4 sm:$0xff]  }
  0x92   : > { %1857 = vmatprep.subr.bf16.mxu0 %v3012_v21 }
  0x94   : > { %894 = vmatpush1.bf16.msra.mxu1 %v2885_v22  ;;  %v3014_v22 = vld [vmem:[#allocation7 + $0x50] ss:$8 sps:$4 sm:$0xff]  }
  0x95   : > { %895 = vmatprep.subr.bf16.mxu1 %v2886_v23  ;;  %v3015_v23 = vld [vmem:[#allocation7 + $0x64] ss:$8 sps:$4 sm:$0xff]   ;;  %1858 = vmatpush1.bf16.msra.mxu0 %v3014_v22 }
  0x96   : > { %1859 = vmatprep.subr.bf16.mxu0 %v3015_v23 }
  0x98   : > { %896 = vmatpush1.bf16.msra.mxu1 %v2888_v24  ;;  %v2982_v24 = vld [vmem:[#allocation5 + $0x1a8] ss:$16 sps:$4 sm:$0xff]  }
  0x99   : > { %897 = vmatprep.subr.bf16.mxu1 %v2889_v25  ;;  %v2990_v25 = vld [vmem:[#allocation5 + $0x1cc] ss:$16 sps:$4 sm:$0xff]  }
  0x9c   : > { %898 = vmatpush1.bf16.msra.mxu1 %v2891_v26  ;;  %v3017_v26 = vld [vmem:[#allocation7 + $0x60] ss:$8 sps:$4 sm:$0xff]  }
  0x9d   : > { %899 = vmatprep.subr.bf16.mxu1 %v2892_v27  ;;  %v3544_v27 = vld [vmem:[%s3473_s9 + $0x70] ss:$8 sps:$4 sm:$0xff]   ;;  %1860 = vmatpush1.bf16.msra.mxu0 %v3017_v26 }
  0xa0   : > { %900 = vmatpush1.bf16.msra.mxu1 %v2894_v28  ;;  %v3547_v28 = vld [vmem:[%s3473_s9 + $0x84] ss:$8 sps:$4 sm:$0xff]  }
  0xa1   : > { %901 = vmatprep.subr.bf16.mxu1 %v2895_v29  ;;  %v2988_v29 = vld [vmem:[#allocation5 + $0x1c8] ss:$16 sps:$4 sm:$0xff]  }
  0xa4   : > { %902 = vmatpush1.bf16.msra.mxu1 %v2897_v30  ;;  %v2996_v30 = vld [vmem:[#allocation5 + $0x1ec] ss:$16 sps:$4 sm:$0xff]  }
  0xa5   : > { %903 = vmatprep.subr.bf16.mxu1 %v2898_v31  ;;  %v3018_v31 = vld [vmem:[#allocation7 + $0x74] ss:$8 sps:$4 sm:$0xff]  }
  0xa6   : > { %1861 = vmatprep.subr.bf16.mxu0 %v3018_v31 }
  0xa8   : > { %904 = vmatpush1.bf16.msra.mxu1 %v2900_v32  ;;  %v3020_v32 = vld [vmem:[#allocation7 + $0x70] ss:$8 sps:$4 sm:$0xff]  }
  0xa9   : > { %1066 = vmatprep.subr.bf16.mxu1 %v2906_v33  ;;  %v3021_v33 = vld [vmem:[#allocation7 + $0x84] ss:$8 sps:$4 sm:$0xff]   ;;  %1862 = vmatpush1.bf16.msra.mxu0 %v3020_v32 }
  0xaa   : > { %1863 = vmatprep.subr.bf16.mxu0 %v3021_v33  ;;  %v3048_v33 = vld [vmem:[#allocation7 + $0x110] ss:$8 sps:$4 sm:$0xff]  }
  0xab   : > { %906 = vmatmul.mubr.bf16.vlgmr.msra.gmra.mrb[0].mxu1 %v3488_v34 }
  0xac   : > { %1067 = vmatpush1.bf16.msra.mxu1 %v2904_v35  ;;  %915 = vmatprep.mubr.bf16.mxu1 %v3491_v36  ;;  %v2994_v35 = vld [vmem:[#allocation5 + $0x1e8] ss:$16 sps:$4 sm:$0xff]  }
  0xad   : > { %1068 = vmatprep.subr.bf16.mxu1 %v2912_v37  ;;  %v3023_v37 = vld [vmem:[#allocation7 + $0x80] ss:$8 sps:$4 sm:$0xff]  }
  0xae   : > { %1864 = vmatpush1.bf16.msra.mxu0 %v3023_v37 }
  0xb0   : > { %1069 = vmatpush1.bf16.msra.mxu1 %v2910_v38  ;;  %v3552_v38 = vld [vmem:[%s3473_s9 + $0x80] ss:$8 sps:$4 sm:$0xff]  }
  0xb1   : > { %1070 = vmatprep.subr.bf16.mxu1 %v2918_v39  ;;  %v3555_v39 = vld [vmem:[%s3473_s9 + $0x94] ss:$8 sps:$4 sm:$0xff]  }
  0xb3   : > { %916 = vmatmul.mubr.bf16.gmra.mrb[4].mxu1 %v3496_v40 }
  0xb4   : > { %925 = vmatprep.mubr.bf16.mxu1 %v3499_v41  ;;  %1071 = vmatpush1.bf16.msra.mxu1 %v2916_v42  ;;  %v3024_v42 = vld [vmem:[#allocation7 + $0x94] ss:$8 sps:$4 sm:$0xff]  }
  0xb5   : > { %1072 = vmatprep.subr.bf16.mxu1 %v2924_v43  ;;  %v3026_v43 = vld [vmem:[#allocation7 + $0x90] ss:$8 sps:$4 sm:$0xff]   ;;  %1865 = vmatprep.subr.bf16.mxu0 %v3024_v42 }
  0xb6   : > { %1866 = vmatpush1.bf16.msra.mxu0 %v3026_v43 }
  0xb8   : > { %1073 = vmatpush1.bf16.msra.mxu1 %v2922_v44  ;;  %v3027_v44 = vld [vmem:[#allocation7 + $0xa4] ss:$8 sps:$4 sm:$0xff]  }
  0xb9   : > { %1074 = vmatprep.subr.bf16.mxu1 %v2930_v45  ;;  %v3029_v45 = vld [vmem:[#allocation7 + $0xa0] ss:$8 sps:$4 sm:$0xff]   ;;  %1867 = vmatprep.subr.bf16.mxu0 %v3027_v44 }
  0xba   : > { %1868 = vmatpush1.bf16.msra.mxu0 %v3029_v45 }
  0xbb   : > { %926 = vmatmul.mubr.bf16.gmra.mrb[8].mxu1 %v3504_v46 }
  0xbc   : > { %935 = vmatprep.mubr.bf16.mxu1 %v3507_v47  ;;  %1075 = vmatpush1.bf16.msra.mxu1 %v2928_v48  ;;  %v3560_v48 = vld [vmem:[%s3473_s9 + $0x90] ss:$8 sps:$4 sm:$0xff]  }
  0xbd   : > { %1076 = vmatprep.subr.bf16.mxu1 %v2936_v49  ;;  %v3563_v49 = vld [vmem:[%s3473_s9 + $0xa4] ss:$8 sps:$4 sm:$0xff]  }
  0xc0   : > { %1077 = vmatpush1.bf16.msra.mxu1 %v2934_v50  ;;  %v3030_v50 = vld [vmem:[#allocation7 + $0xb4] ss:$8 sps:$4 sm:$0xff]  }
  0xc1   : > { %1078 = vmatprep.subr.bf16.mxu1 %v2942_v51  ;;  %v3032_v51 = vld [vmem:[#allocation7 + $0xb0] ss:$8 sps:$4 sm:$0xff]   ;;  %1869 = vmatprep.subr.bf16.mxu0 %v3030_v50 }
  0xc2   : > { %1870 = vmatpush1.bf16.msra.mxu0 %v3032_v51  ;;  %v3056_v51 = vld [vmem:[#allocation7 + $0x134] ss:$8 sps:$4 sm:$0xff]  }
  0xc3   : > { %936 = vmatmul.mubr.bf16.gmra.mrb[12].mxu1 %v3512_v52 }
  0xc4   : > { %945 = vmatprep.mubr.bf16.mxu1 %v3515_v53  ;;  %1079 = vmatpush1.bf16.msra.mxu1 %v2940_v54  ;;  %v3033_v54 = vld [vmem:[#allocation7 + $0xc4] ss:$8 sps:$4 sm:$0xff]  }
  0xc5   : > { %1080 = vmatprep.subr.bf16.mxu1 %v2948_v55  ;;  %v3035_v55 = vld [vmem:[#allocation7 + $0xc0] ss:$8 sps:$4 sm:$0xff]   ;;  %1871 = vmatprep.subr.bf16.mxu0 %v3033_v54 }
  0xc6   : > { %1872 = vmatpush1.bf16.msra.mxu0 %v3035_v55 }
  0xc7   : > { %1873 = vmatprep.subr.bf16.mxu0 %v3036_v58 }
  0xc8   : > { %1081 = vmatpush1.bf16.msra.mxu1 %v2946_v57  ;;  %v3571_v57 = vld [vmem:[%s3473_s9 + $0xb4] ss:$8 sps:$4 sm:$0xff]  }
  0xc9   : > { %1082 = vmatprep.subr.bf16.mxu1 %v2954_v59  ;;  %v3038_v59 = vld [vmem:[#allocation7 + $0xd0] ss:$8 sps:$4 sm:$0xff]  }
  0xca   : > { %1874 = vmatpush1.bf16.msra.mxu0 %v3038_v59  ;;  %v3054_v59 = vld [vmem:[#allocation7 + $0x130] ss:$8 sps:$4 sm:$0xff]  }
  0xcb   : > { %946 = vmatmul.mubr.bf16.gmra.mrb[16].mxu1 %v3520_v60 }
  0xcc   : > { %955 = vmatprep.mubr.bf16.mxu1 %v3523_v61  ;;  %1083 = vmatpush1.bf16.msra.mxu1 %v2952_v62  ;;  %v3576_v62 = vld [vmem:[%s3473_s9 + $0xb0] ss:$8 sps:$4 sm:$0xff]  }
  0xcd   : > { %1084 = vmatprep.subr.bf16.mxu1 %v2960_v63  ;;  %v3039_v63 = vld [vmem:[#allocation7 + $0xe4] ss:$8 sps:$4 sm:$0xff]  }
  0xce   : > { %1875 = vmatprep.subr.bf16.mxu0 %v3039_v63 }
  0xcf   : > { %1876 = vmatpush1.bf16.msra.mxu0 %v3041_v1 }
  0xd0   : > { %1085 = vmatpush1.bf16.msra.mxu1 %v2958_v3  ;;  %v3044_v3 = vld [vmem:[#allocation7 + $0xf0] ss:$8 sps:$4 sm:$0xff]   ;;  %1877 = vmatprep.subr.bf16.mxu0 %v3042_v2 }
  0xd1   : > { %1086 = vmatprep.subr.bf16.mxu1 %v2966_v4  ;;  %v3584_v4 = vld [vmem:[%s3473_s9 + $0xc0] ss:$8 sps:$4 sm:$0xff]  }
  0xd3   : > { %956 = vmatmul.mubr.bf16.gmra.mrb[20].mxu1 %v3528_v6  ;;  %1878 = vmatpush1.bf16.msra.mxu0 %v3044_v3 }
  0xd4   : > { %965 = vmatprep.mubr.bf16.mxu1 %v3531_v7  ;;  %1087 = vmatpush1.bf16.msra.mxu1 %v2964_v8  ;;  %v3047_v8 = vld [vmem:[#allocation7 + $0x104] ss:$8 sps:$4 sm:$0xff]  }
  0xd5   : > { %1088 = vmatprep.subr.bf16.mxu1 %v2972_v9  ;;  %v3592_v9 = vld [vmem:[%s3473_s9 + $0xd0] ss:$8 sps:$4 sm:$0xff]   ;;  %2040 = vmatprep.subr.bf16.mxu0 %v3047_v8  ;;  %v3057_v8 = vld [vmem:[#allocation7 + $0x140] ss:$8 sps:$4 sm:$0xff]  }
  0xd8   : > { %1089 = vmatpush1.bf16.msra.mxu1 %v2970_v14  ;;  %v3608_v14 = vld [vmem:[%s3473_s9 + $0xf0] ss:$8 sps:$4 sm:$0xff]   ;;  %s3185_s9 = scalar_lea.vmem %s3184_s8, 16384 }
  0xd9   : > { %1090 = vmatprep.subr.bf16.mxu1 %v2978_v15  ;;  %p3187_p9 = scmp.lt.s32.totalorder %s3185_s9, %s3179_s7 }
  0xdb   : > { %966 = vmatmul.mubr.bf16.gmra.mrb[24].mxu1 %v3536_v17  ;;  %p3188_p12 = por %p3187_p9, %p3186_p5 }
  0xdc   : > { %975 = vmatprep.mubr.bf16.mxu1 %v3539_v18  ;;  %1091 = vmatpush1.bf16.msra.mxu1 %v2976_v19 }
  0xdd   : > { %1092 = vmatprep.subr.bf16.mxu1 %v2984_v20  ;;  %p3189_p2 = pnand %p3188_p12, %p3182_p3 }
  0xe0   : > { %1093 = vmatpush1.bf16.msra.mxu1 %v2982_v24  ;;  %v3045_v24 = vld [vmem:[#allocation7 + $0x100] ss:$8 sps:$4 sm:$0xff]  }
  0xe1   : > { %1094 = vmatprep.subr.bf16.mxu1 %v2990_v25 }
  0xe3   : > { %976 = vmatmul.mubr.bf16.gmra.mrb[28].mxu1 %v3544_v27 }
  0xe4   : > { %985 = vmatprep.mubr.bf16.mxu1 %v3547_v28  ;;  %1095 = vmatpush1.bf16.msra.mxu1 %v2988_v29 }
  0xe5   : > { %1096 = vmatprep.subr.bf16.mxu1 %v2996_v30 }
  0xe8   : > { %1097 = vmatpush1.bf16.msra.mxu1 %v2994_v35 }
  0xeb   : > { %986 = vmatmul.mubr.bf16.gmra.mrb[32].mxu1 %v3552_v38 }
  0xec   : > { %995 = vmatprep.mubr.bf16.mxu1 %v3555_v39 }
  0xf3   : > { %996 = vmatmul.mubr.bf16.gmra.mrb[36].mxu1 %v3560_v48 }
  0xf4   : > { %1005 = vmatprep.mubr.bf16.mxu1 %v3563_v49 }
  0xfb   : > { %1006 = vmatmul.mubr.bf16.gmra.mrb[40].mxu1 %v3568_v56 }
  0xfc   : > { %1015 = vmatprep.mubr.bf16.mxu1 %v3571_v57 }
 0x103   : > { %1016 = vmatmul.mubr.bf16.gmra.mrb[44].mxu1 %v3576_v62 }
 0x104   : > { %1025 = vmatprep.mubr.bf16.mxu1 %v3579_v0 }
 0x10b   : > { %1026 = vmatmul.mubr.bf16.gmra.mrb[48].mxu1 %v3584_v4 }
 0x10c   : > { %1035 = vmatprep.mubr.bf16.mxu1 %v3587_v5 }
 0x113   : > { %1036 = vmatmul.mubr.bf16.gmra.mrb[52].mxu1 %v3592_v9 }
 0x114   : > { %1045 = vmatprep.mubr.bf16.mxu1 %v3595_v10 }
 0x11b   : > { %1046 = vmatmul.mubr.bf16.gmra.mrb[56].mxu1 %v3600_v11 }
 0x11c   : > { %1055 = vmatprep.mubr.bf16.mxu1 %v3603_v12 }
 0x123   : > { %1056 = vmatmul.mubr.bf16.gmra.mrb[60].mxu1 %v3608_v14 }
 0x124   : > { %1098 = vmatprep.mubr.bf16.mxu1 %v3484_v13  ;;  %v373_v13 = vlaneseq }
 0x12b   : > { %1099 = vmatmul.mubr.bf16.vlgmr.msra.gmra.mrb[64].mxu1 %v3488_v34  ;;  %v3631_v34 = vshrl.u32 %v373_v13, 7 }
 0x12c   : > { %1108 = vmatprep.mubr.bf16.mxu1 %v3491_v36 }
 0x12d   : > { %v375_v36 = vsub.s32 0, %v3631_v34 }
 0x133   : > { %1109 = vmatmul.mubr.bf16.gmra.mrb[68].mxu1 %v3496_v40  ;;  %v3638_v40 = vld [vmem:[%s3993_s2] sm:$0xf] }
 0x134   : > { %1118 = vmatprep.mubr.bf16.mxu1 %v3499_v41  ;;  %v379_v41 = vsub.s32 1, %v3631_v34 }
 0x13b   : > { %1119 = vmatmul.mubr.bf16.gmra.mrb[72].mxu1 %v3504_v46  ;;  %v3645_v46 = vrot.slane %v3638_v40, %v375_v36 }
 0x13c   : > { %1128 = vmatprep.mubr.bf16.mxu1 %v3507_v47  ;;  %v3650_v47 = vrot.slane %v3638_v40, %v379_v41 }
 0x143   : > { %1129 = vmatmul.mubr.bf16.gmra.mrb[76].mxu1 %v3512_v52 }
 0x144   : > { %1138 = vmatprep.mubr.bf16.mxu1 %v3515_v53 }
 0x14b   : > { %1139 = vmatmul.mubr.bf16.gmra.mrb[80].mxu1 %v3520_v60 }
 0x14c   : > { %1148 = vmatprep.mubr.bf16.mxu1 %v3523_v61 }
 0x153   : > { %1149 = vmatmul.mubr.bf16.gmra.mrb[84].mxu1 %v3528_v6 }
 0x154   : > { %1158 = vmatprep.mubr.bf16.mxu1 %v3531_v7 }
 0x15b   : > { %1159 = vmatmul.mubr.bf16.gmra.mrb[88].mxu1 %v3536_v17 }
 0x15c   : > { %1168 = vmatprep.mubr.bf16.mxu1 %v3539_v18 }
 0x163   : > { %1169 = vmatmul.mubr.bf16.gmra.mrb[92].mxu1 %v3544_v27  ;;  %v3050_v27 = vld [vmem:[#allocation7 + $0x114] ss:$8 sps:$4 sm:$0xff]  }
 0x164   : > { %1178 = vmatprep.mubr.bf16.mxu1 %v3547_v28 }
 0x16b   : > { %1179 = vmatmul.mubr.bf16.gmra.mrb[96].mxu1 %v3552_v38  ;;  %v3053_v38 = vld [vmem:[#allocation7 + $0x124] ss:$8 sps:$4 sm:$0xff]  }
 0x16c   : > { %1188 = vmatprep.mubr.bf16.mxu1 %v3555_v39 }
 0x173   : > { %1189 = vmatmul.mubr.bf16.gmra.mrb[100].mxu1 %v3560_v48  ;;  %v3051_v48 = vld [vmem:[#allocation7 + $0x120] ss:$8 sps:$4 sm:$0xff]  }
 0x174   : > { %1198 = vmatprep.mubr.bf16.mxu1 %v3563_v49 }
 0x17b   : > { %1199 = vmatmul.mubr.bf16.gmra.mrb[104].mxu1 %v3568_v56 }
 0x17c   : > { %1208 = vmatprep.mubr.bf16.mxu1 %v3571_v57 }
 0x17e   : > { %v907_v52 = vpop.f32.mrb[0].mxu1 }
 0x17f   : > { %v908_v53 = vadd.f32 %v907_v52, %v3645_v46  ;;  %v909_v60 = vpop.f32.mrb[1].mxu1 }
 0x180   : > { %v910_v61 = vadd.f32 %v909_v60, %v3650_v47  ;;  %v911_v6 = vpop.f32.mrb[2].mxu1 }
 0x181   : > { %v912_v7 = vadd.f32 %v911_v6, %v3645_v46  ;;  %v913_v15 = vpop.f32.mrb[3].mxu1  ;;  %v1259_v17 = vmax.f32 %v908_v53, 0.0  ;;  %v3062_v53 = vld [vmem:[#allocation7 + $0x154] ss:$8 sps:$4 sm:$0xff]  }
 0x182   : > { %v914_v16 = vadd.f32 %v913_v15, %v3650_v47  ;;  %v1260_v19 = vmax.f32 %v910_v61, 0.0 }
 0x183   : > { %v1263_v18 = vmax.f32 %v912_v7, 0.0  ;;  %1209 = vmatmul.mubr.bf16.gmra.mrb[108].mxu1 %v3576_v62  ;;  %v3060_v7 = vld [vmem:[#allocation7 + $0x150] ss:$8 sps:$4 sm:$0xff]  }
 0x184   : > { %v1264_v20 = vmax.f32 %v914_v16, 0.0  ;;  %1218 = vmatprep.mubr.bf16.mxu1 %v3579_v0  ;;  %v3059_v0 = vld [vmem:[#allocation7 + $0x144] ss:$8 sps:$4 sm:$0xff]  }
 0x185   : > { %v1387_v21 = vpack.c.bf16 %v1263_v18, %v1259_v17  ;;  %v3065_v17 = vld [vmem:[#allocation7 + $0x164] ss:$8 sps:$4 sm:$0xff]  }
 0x186   : > { %v917_v22 = vpop.f32.mrb[4].mxu1  ;;  %v1388_v23 = vpack.c.bf16 %v1264_v20, %v1260_v19 }
 0x187   : > { %v918_v25 = vadd.f32 %v917_v22, %v3645_v46  ;;  %v919_v26 = vpop.f32.mrb[5].mxu1 }
 0x188   : > { %v920_v28 = vadd.f32 %v919_v26, %v3650_v47  ;;  %v921_v29 = vpop.f32.mrb[6].mxu1  ;;  %1879 = vmatprep.mubr.bf16.mxu0 %v1388_v23  ;;  %v3063_v23 = vld [vmem:[#allocation7 + $0x160] ss:$8 sps:$4 sm:$0xff]   ;;  %v3068_v26 = vld [vmem:[#allocation7 + $0x174] ss:$8 sps:$4 sm:$0xff]  }
 0x189   : > { %v922_v30 = vadd.f32 %v921_v29, %v3645_v46  ;;  %v923_v31 = vpop.f32.mrb[7].mxu1  ;;  %1880 = vmatmul.mubr.bf16.vlgmr.msra.gmra.mrb[0].mxu0 %v1387_v21  ;;  %v1267_v35 = vmax.f32 %v918_v25, 0.0 }
 0x18a   : > { %v924_v32 = vadd.f32 %v923_v31, %v3650_v47  ;;  %2041 = vmatpush1.bf16.msra.mxu0 %v3045_v24  ;;  %v1268_v39 = vmax.f32 %v920_v28, 0.0 }
 0x18b   : > { %v1271_v37 = vmax.f32 %v922_v30, 0.0  ;;  %1219 = vmatmul.mubr.bf16.gmra.mrb[112].mxu1 %v3584_v4  ;;  %2042 = vmatprep.subr.bf16.mxu0 %v3050_v27  ;;  %v3066_v30 = vld [vmem:[#allocation7 + $0x170] ss:$8 sps:$4 sm:$0xff]  }
 0x18c   : > { %v1272_v42 = vmax.f32 %v924_v32, 0.0  ;;  %1228 = vmatprep.mubr.bf16.mxu1 %v3587_v5 }
 0x18d   : > { %v1391_v43 = vpack.c.bf16 %v1271_v37, %v1267_v35 }
 0x18e   : > { %v1392_v44 = vpack.c.bf16 %v1272_v42, %v1268_v39  ;;  %v927_v45 = vpop.f32.mrb[8].mxu1  ;;  %2043 = vmatpush1.bf16.msra.mxu0 %v3048_v33  ;;  %v3071_v33 = vld [vmem:[#allocation7 + $0x184] ss:$8 sps:$4 sm:$0xff]  }
 0x18f   : > { %v928_v49 = vadd.f32 %v927_v45, %v3645_v46  ;;  %v929_v50 = vpop.f32.mrb[9].mxu1  ;;  %2044 = vmatprep.subr.bf16.mxu0 %v3053_v38 }
 0x190   : > { %v930_v54 = vadd.f32 %v929_v50, %v3650_v47  ;;  %v931_v55 = vpop.f32.mrb[10].mxu1  ;;  %1889 = vmatprep.mubr.bf16.mxu0 %v1392_v44 }
 0x191   : > { %v932_v56 = vadd.f32 %v931_v55, %v3645_v46  ;;  %v933_v57 = vpop.f32.mrb[11].mxu1  ;;  %1890 = vmatmul.mubr.bf16.gmra.mrb[4].mxu0 %v1391_v43  ;;  %v1275_v62 = vmax.f32 %v928_v49, 0.0  ;;  %v3069_v43 = vld [vmem:[#allocation7 + $0x180] ss:$8 sps:$4 sm:$0xff]   ;;  %v3072_v55 = vld [vmem:[#allocation7 + $0x190] ss:$8 sps:$4 sm:$0xff]  }
 0x192   : > { %v934_v58 = vadd.f32 %v933_v57, %v3650_v47  ;;  %2045 = vmatpush1.bf16.msra.mxu0 %v3051_v48  ;;  %v1276_v1 = vmax.f32 %v930_v54, 0.0  ;;  %v3074_v48 = vld [vmem:[#allocation7 + $0x194] ss:$8 sps:$4 sm:$0xff]  }
 0x193   : > { %v1279_v63 = vmax.f32 %v932_v56, 0.0  ;;  %1229 = vmatmul.mubr.bf16.gmra.mrb[116].mxu1 %v3592_v9  ;;  %2046 = vmatprep.subr.bf16.mxu0 %v3056_v51 }
 0x194   : > { %v1280_v2 = vmax.f32 %v934_v58, 0.0  ;;  %1238 = vmatprep.mubr.bf16.mxu1 %v3595_v10  ;;  %v3077_v58 = vld [vmem:[#allocation7 + $0x1a4] ss:$8 sps:$4 sm:$0xff]  }
 0x195   : > { %v1395_v3 = vpack.c.bf16 %v1279_v63, %v1275_v62 }
 0x196   : > { %v1396_v4 = vpack.c.bf16 %v1280_v2, %v1276_v1  ;;  %v937_v5 = vpop.f32.mrb[12].mxu1  ;;  %2047 = vmatpush1.bf16.msra.mxu0 %v3054_v59  ;;  %v3075_v2 = vld [vmem:[#allocation7 + $0x1a0] ss:$8 sps:$4 sm:$0xff]  }
 0x197   : > { %v938_v13 = vadd.f32 %v937_v5, %v3645_v46  ;;  %v939_v52 = vpop.f32.mrb[13].mxu1  ;;  %2048 = vmatprep.subr.bf16.mxu0 %v3059_v0  ;;  %v3080_v5 = vld [vmem:[#allocation7 + $0x1b4] ss:$8 sps:$4 sm:$0xff]  }
 0x198   : > { %v940_v60 = vadd.f32 %v939_v52, %v3650_v47  ;;  %v941_v61 = vpop.f32.mrb[14].mxu1  ;;  %1899 = vmatprep.mubr.bf16.mxu0 %v1396_v4 }
 0x199   : > { %v942_v9 = vadd.f32 %v941_v61, %v3645_v46  ;;  %v943_v6 = vpop.f32.mrb[15].mxu1  ;;  %1900 = vmatmul.mubr.bf16.gmra.mrb[8].mxu0 %v1395_v3  ;;  %v1283_v15 = vmax.f32 %v938_v13, 0.0  ;;  %v3078_v61 = vld [vmem:[#allocation7 + $0x1b0] ss:$8 sps:$4 sm:$0xff]  }
 0x19a   : > { %v944_v10 = vadd.f32 %v943_v6, %v3650_v47  ;;  %2049 = vmatpush1.bf16.msra.mxu0 %v3057_v8  ;;  %v1284_v18 = vmax.f32 %v940_v60, 0.0 }
 0x19b   : > { %v1287_v16 = vmax.f32 %v942_v9, 0.0  ;;  %1239 = vmatmul.mubr.bf16.gmra.mrb[120].mxu1 %v3600_v11  ;;  %2050 = vmatprep.subr.bf16.mxu0 %v3062_v53 }
 0x19c   : > { %v1288_v19 = vmax.f32 %v944_v10, 0.0  ;;  %1248 = vmatprep.mubr.bf16.mxu1 %v3603_v12  ;;  %v3083_v10 = vld [vmem:[#allocation7 + $0x1c4] ss:$8 sps:$4 sm:$0xff]  }
 0x19d   : > { %v1399_v20 = vpack.c.bf16 %v1287_v16, %v1283_v15 }
 0x19e   : > { %v1400_v21 = vpack.c.bf16 %v1288_v19, %v1284_v18  ;;  %v947_v22 = vpop.f32.mrb[16].mxu1  ;;  %2051 = vmatpush1.bf16.msra.mxu0 %v3060_v7  ;;  %v3081_v19 = vld [vmem:[#allocation7 + $0x1c0] ss:$8 sps:$4 sm:$0xff]  }
 0x19f   : > { %v948_v24 = vadd.f32 %v947_v22, %v3645_v46  ;;  %v949_v25 = vpop.f32.mrb[17].mxu1  ;;  %2052 = vmatprep.subr.bf16.mxu0 %v3065_v17  ;;  %v3086_v22 = vld [vmem:[#allocation7 + $0x1d4] ss:$8 sps:$4 sm:$0xff]  }
 0x1a0   : > { %v950_v27 = vadd.f32 %v949_v25, %v3650_v47  ;;  %v951_v28 = vpop.f32.mrb[18].mxu1  ;;  %1909 = vmatprep.mubr.bf16.mxu0 %v1400_v21 }
 0x1a1   : > { %v952_v11 = vadd.f32 %v951_v28, %v3645_v46  ;;  %v953_v29 = vpop.f32.mrb[19].mxu1  ;;  %1910 = vmatmul.mubr.bf16.gmra.mrb[12].mxu0 %v1399_v20  ;;  %v1291_v31 = vmax.f32 %v948_v24, 0.0  ;;  %v3084_v28 = vld [vmem:[#allocation7 + $0x1d0] ss:$8 sps:$4 sm:$0xff]  }
 0x1a2   : > { %v954_v12 = vadd.f32 %v953_v29, %v3650_v47  ;;  %2053 = vmatpush1.bf16.msra.mxu0 %v3063_v23  ;;  %v1292_v35 = vmax.f32 %v950_v27, 0.0 }
 0x1a3   : > { %v1295_v32 = vmax.f32 %v952_v11, 0.0  ;;  %1249 = vmatmul.mubr.bf16.gmra.mrb[124].mxu1 %v3608_v14  ;;  %2054 = vmatprep.subr.bf16.mxu0 %v3068_v26 }
 0x1a4   : > { %v1296_v37 = vmax.f32 %v954_v12, 0.0  ;;  %v3089_v12 = vld [vmem:[#allocation7 + $0x1e4] ss:$8 sps:$4 sm:$0xff]  }
 0x1a5   : > { %v1403_v38 = vpack.c.bf16 %v1295_v32, %v1291_v31 }
 0x1a6   : > { %v1404_v39 = vpack.c.bf16 %v1296_v37, %v1292_v35  ;;  %v957_v42 = vpop.f32.mrb[20].mxu1  ;;  %2055 = vmatpush1.bf16.msra.mxu0 %v3066_v30  ;;  %v3087_v37 = vld [vmem:[#allocation7 + $0x1e0] ss:$8 sps:$4 sm:$0xff]  }
 0x1a7   : > { %v958_v44 = vadd.f32 %v957_v42, %v3645_v46  ;;  %v959_v45 = vpop.f32.mrb[21].mxu1  ;;  %2056 = vmatprep.subr.bf16.mxu0 %v3071_v33  ;;  %v3092_v42 = vld [vmem:[#allocation7 + $0x1f4] ss:$8 sps:$4 sm:$0xff]  }
 0x1a8   : > { %v960_v49 = vadd.f32 %v959_v45, %v3650_v47  ;;  %v961_v50 = vpop.f32.mrb[22].mxu1  ;;  %1919 = vmatprep.mubr.bf16.mxu0 %v1404_v39 }
 0x1a9   : > { %v962_v14 = vadd.f32 %v961_v50, %v3645_v46  ;;  %v963_v51 = vpop.f32.mrb[23].mxu1  ;;  %1920 = vmatmul.mubr.bf16.gmra.mrb[16].mxu0 %v1403_v38  ;;  %v1299_v56 = vmax.f32 %v958_v44, 0.0  ;;  %v3090_v50 = vld [vmem:[#allocation7 + $0x1f0] ss:$8 sps:$4 sm:$0xff]  }
 0x1aa   : > { %v964_v54 = vadd.f32 %v963_v51, %v3650_v47  ;;  %2057 = vmatpush1.bf16.msra.mxu0 %v3069_v43  ;;  %v1300_v59 = vmax.f32 %v960_v49, 0.0 }
 0x1ab   : > { %v1303_v57 = vmax.f32 %v962_v14, 0.0  ;;  %2058 = vmatprep.subr.bf16.mxu0 %v3074_v48 }
 0x1ac   : > { %v1304_v62 = vmax.f32 %v964_v54, 0.0 }
 0x1ad   : > { %v1407_v63 = vpack.c.bf16 %v1303_v57, %v1299_v56 }
 0x1ae   : > { %v1408_v0 = vpack.c.bf16 %v1304_v62, %v1300_v59  ;;  %v967_v1 = vpop.f32.mrb[24].mxu1  ;;  %2059 = vmatpush1.bf16.msra.mxu0 %v3072_v55 }
 0x1af   : > { %v968_v3 = vadd.f32 %v967_v1, %v3645_v46  ;;  %v969_v4 = vpop.f32.mrb[25].mxu1  ;;  %2060 = vmatprep.subr.bf16.mxu0 %v3077_v58 }
 0x1b0   : > { %v970_v8 = vadd.f32 %v969_v4, %v3650_v47  ;;  %v971_v13 = vpop.f32.mrb[26].mxu1  ;;  %1929 = vmatprep.mubr.bf16.mxu0 %v1408_v0 }
 0x1b1   : > { %v972_v52 = vadd.f32 %v971_v13, %v3645_v46  ;;  %v973_v53 = vpop.f32.mrb[27].mxu1  ;;  %1930 = vmatmul.mubr.bf16.gmra.mrb[20].mxu0 %v1407_v63  ;;  %v1307_v9 = vmax.f32 %v968_v3, 0.0 }
 0x1b2   : > { %v974_v60 = vadd.f32 %v973_v53, %v3650_v47  ;;  %2061 = vmatpush1.bf16.msra.mxu0 %v3075_v2  ;;  %v1308_v7 = vmax.f32 %v970_v8, 0.0 }
 0x1b3   : > { %v1311_v6 = vmax.f32 %v972_v52, 0.0  ;;  %2062 = vmatprep.subr.bf16.mxu0 %v3080_v5 }
 0x1b4   : > { %v1312_v15 = vmax.f32 %v974_v60, 0.0 }
 0x1b5   : > { %v1411_v16 = vpack.c.bf16 %v1311_v6, %v1307_v9 }
 0x1b6   : > { %v1412_v17 = vpack.c.bf16 %v1312_v15, %v1308_v7  ;;  %v977_v18 = vpop.f32.mrb[28].mxu1  ;;  %2063 = vmatpush1.bf16.msra.mxu0 %v3078_v61 }
 0x1b7   : > { %v978_v20 = vadd.f32 %v977_v18, %v3645_v46  ;;  %v979_v21 = vpop.f32.mrb[29].mxu1  ;;  %2064 = vmatprep.subr.bf16.mxu0 %v3083_v10 }
 0x1b8   : > { %v980_v23 = vadd.f32 %v979_v21, %v3650_v47  ;;  %v981_v24 = vpop.f32.mrb[30].mxu1  ;;  %1939 = vmatprep.mubr.bf16.mxu0 %v1412_v17 }
 0x1b9   : > { %v982_v25 = vadd.f32 %v981_v24, %v3645_v46  ;;  %v983_v26 = vpop.f32.mrb[31].mxu1  ;;  %1940 = vmatmul.mubr.bf16.gmra.mrb[24].mxu0 %v1411_v16  ;;  %v1315_v11 = vmax.f32 %v978_v20, 0.0 }
 0x1ba   : > { %v984_v27 = vadd.f32 %v983_v26, %v3650_v47  ;;  %2065 = vmatpush1.bf16.msra.mxu0 %v3081_v19  ;;  %v1316_v30 = vmax.f32 %v980_v23, 0.0 }
 0x1bb   : > { %v1319_v29 = vmax.f32 %v982_v25, 0.0  ;;  %2066 = vmatprep.subr.bf16.mxu0 %v3086_v22 }
 0x1bc   : > { %v1320_v31 = vmax.f32 %v984_v27, 0.0 }
 0x1bd   : > { %v1415_v32 = vpack.c.bf16 %v1319_v29, %v1315_v11 }
 0x1be   : > { %v1416_v33 = vpack.c.bf16 %v1320_v31, %v1316_v30  ;;  %v987_v35 = vpop.f32.mrb[32].mxu1  ;;  %2067 = vmatpush1.bf16.msra.mxu0 %v3084_v28 }
 0x1bf   : > { %v988_v38 = vadd.f32 %v987_v35, %v3645_v46  ;;  %v989_v39 = vpop.f32.mrb[33].mxu1  ;;  %2068 = vmatprep.subr.bf16.mxu0 %v3089_v12 }
 0x1c0   : > { %v990_v43 = vadd.f32 %v989_v39, %v3650_v47  ;;  %v991_v44 = vpop.f32.mrb[34].mxu1  ;;  %1949 = vmatprep.mubr.bf16.mxu0 %v1416_v33 }
 0x1c1   : > { %v992_v45 = vadd.f32 %v991_v44, %v3645_v46  ;;  %v993_v48 = vpop.f32.mrb[35].mxu1  ;;  %1950 = vmatmul.mubr.bf16.gmra.mrb[28].mxu0 %v1415_v32  ;;  %v1323_v14 = vmax.f32 %v988_v38, 0.0 }
 0x1c2   : > { %v994_v49 = vadd.f32 %v993_v48, %v3650_v47  ;;  %2069 = vmatpush1.bf16.msra.mxu0 %v3087_v37  ;;  %v1324_v54 = vmax.f32 %v990_v43, 0.0 }
 0x1c3   : > { %v1327_v51 = vmax.f32 %v992_v45, 0.0  ;;  %2070 = vmatprep.subr.bf16.mxu0 %v3092_v42 }
 0x1c4   : > { %v1328_v55 = vmax.f32 %v994_v49, 0.0 }
 0x1c5   : > { %v1419_v56 = vpack.c.bf16 %v1327_v51, %v1323_v14 }
 0x1c6   : > { %v1420_v57 = vpack.c.bf16 %v1328_v55, %v1324_v54  ;;  %v997_v58 = vpop.f32.mrb[36].mxu1  ;;  %2071 = vmatpush1.bf16.msra.mxu0 %v3090_v50 }
 0x1c7   : > { %v998_v59 = vadd.f32 %v997_v58, %v3645_v46  ;;  %v999_v62 = vpop.f32.mrb[37].mxu1 }
 0x1c8   : > { %v1000_v63 = vadd.f32 %v999_v62, %v3650_v47  ;;  %v1001_v0 = vpop.f32.mrb[38].mxu1  ;;  %1959 = vmatprep.mubr.bf16.mxu0 %v1420_v57 }
 0x1c9   : > { %v1002_v1 = vadd.f32 %v1001_v0, %v3645_v46  ;;  %v1003_v2 = vpop.f32.mrb[39].mxu1  ;;  %1960 = vmatmul.mubr.bf16.gmra.mrb[32].mxu0 %v1419_v56  ;;  %v1331_v4 = vmax.f32 %v998_v59, 0.0 }
 0x1ca   : > { %v1004_v3 = vadd.f32 %v1003_v2, %v3650_v47  ;;  %v1332_v8 = vmax.f32 %v1000_v63, 0.0 }
 0x1cb   : > { %v1335_v5 = vmax.f32 %v1002_v1, 0.0 }
 0x1cc   : > { %v1336_v13 = vmax.f32 %v1004_v3, 0.0 }
 0x1cd   : > { %v1423_v52 = vpack.c.bf16 %v1335_v5, %v1331_v4 }
 0x1ce   : > { %v1424_v53 = vpack.c.bf16 %v1336_v13, %v1332_v8  ;;  %v1007_v60 = vpop.f32.mrb[40].mxu1 }
 0x1cf   : > { %v1008_v61 = vadd.f32 %v1007_v60, %v3645_v46  ;;  %v1009_v9 = vpop.f32.mrb[41].mxu1 }
 0x1d0   : > { %v1010_v6 = vadd.f32 %v1009_v9, %v3650_v47  ;;  %v1011_v10 = vpop.f32.mrb[42].mxu1  ;;  %1969 = vmatprep.mubr.bf16.mxu0 %v1424_v53 }
 0x1d1   : > { %v1012_v7 = vadd.f32 %v1011_v10, %v3645_v46  ;;  %v1013_v15 = vpop.f32.mrb[43].mxu1  ;;  %1970 = vmatmul.mubr.bf16.gmra.mrb[36].mxu0 %v1423_v52  ;;  %v1339_v17 = vmax.f32 %v1008_v61, 0.0 }
 0x1d2   : > { %v1014_v16 = vadd.f32 %v1013_v15, %v3650_v47  ;;  %v1340_v19 = vmax.f32 %v1010_v6, 0.0 }
 0x1d3   : > { %v1343_v18 = vmax.f32 %v1012_v7, 0.0 }
 0x1d4   : > { %v1344_v20 = vmax.f32 %v1014_v16, 0.0 }
 0x1d5   : > { %v1427_v21 = vpack.c.bf16 %v1343_v18, %v1339_v17 }
 0x1d6   : > { %v1428_v22 = vpack.c.bf16 %v1344_v20, %v1340_v19  ;;  %v1017_v23 = vpop.f32.mrb[44].mxu1 }
 0x1d7   : > { %v1018_v24 = vadd.f32 %v1017_v23, %v3645_v46  ;;  %v1019_v25 = vpop.f32.mrb[45].mxu1 }
 0x1d8   : > { %v1020_v26 = vadd.f32 %v1019_v25, %v3650_v47  ;;  %v1021_v27 = vpop.f32.mrb[46].mxu1  ;;  %1979 = vmatprep.mubr.bf16.mxu0 %v1428_v22 }
 0x1d9   : > { %v1022_v28 = vadd.f32 %v1021_v27, %v3645_v46  ;;  %v1023_v11 = vpop.f32.mrb[47].mxu1  ;;  %1980 = vmatmul.mubr.bf16.gmra.mrb[40].mxu0 %v1427_v21  ;;  %v1347_v12 = vmax.f32 %v1018_v24, 0.0  ;;  %v383_v24 = vsub.s32 2, %v3631_v34  ;;  %v387_v27 = vsub.s32 3, %v3631_v34 }
 0x1da   : > { %v1024_v29 = vadd.f32 %v1023_v11, %v3650_v47  ;;  %v1348_v31 = vmax.f32 %v1020_v26, 0.0 }
 0x1db   : > { %v1351_v30 = vmax.f32 %v1022_v28, 0.0 }
 0x1dc   : > { %v1352_v32 = vmax.f32 %v1024_v29, 0.0 }
 0x1dd   : > { %v1431_v33 = vpack.c.bf16 %v1351_v30, %v1347_v12 }
 0x1de   : > { %v1432_v35 = vpack.c.bf16 %v1352_v32, %v1348_v31  ;;  %v1027_v37 = vpop.f32.mrb[48].mxu1  ;;  %v3729_v31 = vrot.slane %v3638_v40, %v383_v24 }
 0x1df   : > { %v1028_v38 = vadd.f32 %v1027_v37, %v3645_v46  ;;  %v1029_v39 = vpop.f32.mrb[49].mxu1 }
 0x1e0   : > { %v1030_v42 = vadd.f32 %v1029_v39, %v3650_v47  ;;  %v1031_v43 = vpop.f32.mrb[50].mxu1  ;;  %1989 = vmatprep.mubr.bf16.mxu0 %v1432_v35  ;;  %v3732_v35 = vrot.slane %v3638_v40, %v387_v27 }
 0x1e1   : > { %v1032_v44 = vadd.f32 %v1031_v43, %v3645_v46  ;;  %v1033_v45 = vpop.f32.mrb[51].mxu1  ;;  %1990 = vmatmul.mubr.bf16.gmra.mrb[44].mxu0 %v1431_v33  ;;  %v1355_v49 = vmax.f32 %v1028_v38, 0.0 }
 0x1e2   : > { %v1034_v48 = vadd.f32 %v1033_v45, %v3650_v47  ;;  %v1356_v14 = vmax.f32 %v1030_v42, 0.0 }
 0x1e3   : > { %v1359_v50 = vmax.f32 %v1032_v44, 0.0 }
 0x1e4   : > { %v1360_v51 = vmax.f32 %v1034_v48, 0.0 }
 0x1e5   : > { %v1435_v54 = vpack.c.bf16 %v1359_v50, %v1355_v49 }
 0x1e6   : > { %v1436_v55 = vpack.c.bf16 %v1360_v51, %v1356_v14  ;;  %v1037_v56 = vpop.f32.mrb[52].mxu1 }
 0x1e7   : > { %v1038_v57 = vadd.f32 %v1037_v56, %v3645_v46  ;;  %v1039_v58 = vpop.f32.mrb[53].mxu1 }
 0x1e8   : > { %v1040_v59 = vadd.f32 %v1039_v58, %v3650_v47  ;;  %v1041_v62 = vpop.f32.mrb[54].mxu1  ;;  %1999 = vmatprep.mubr.bf16.mxu0 %v1436_v55 }
 0x1e9   : > { %v1042_v63 = vadd.f32 %v1041_v62, %v3645_v46  ;;  %v1043_v0 = vpop.f32.mrb[55].mxu1  ;;  %2000 = vmatmul.mubr.bf16.gmra.mrb[48].mxu0 %v1435_v54  ;;  %v1363_v2 = vmax.f32 %v1038_v57, 0.0 }
 0x1ea   : > { %v1044_v1 = vadd.f32 %v1043_v0, %v3650_v47  ;;  %v1364_v4 = vmax.f32 %v1040_v59, 0.0 }
 0x1eb   : > { %v1367_v3 = vmax.f32 %v1042_v63, 0.0 }
 0x1ec   : > { %v1368_v5 = vmax.f32 %v1044_v1, 0.0 }
 0x1ed   : > { %v1439_v8 = vpack.c.bf16 %v1367_v3, %v1363_v2 }
 0x1ee   : > { %v1440_v13 = vpack.c.bf16 %v1368_v5, %v1364_v4  ;;  %v1047_v52 = vpop.f32.mrb[56].mxu1 }
 0x1ef   : > { %v1048_v53 = vadd.f32 %v1047_v52, %v3645_v46  ;;  %v1049_v60 = vpop.f32.mrb[57].mxu1 }
 0x1f0   : > { %v1050_v61 = vadd.f32 %v1049_v60, %v3650_v47  ;;  %v1051_v9 = vpop.f32.mrb[58].mxu1  ;;  %2009 = vmatprep.mubr.bf16.mxu0 %v1440_v13 }
 0x1f1   : > { %v1052_v6 = vadd.f32 %v1051_v9, %v3645_v46  ;;  %v1053_v10 = vpop.f32.mrb[59].mxu1  ;;  %2010 = vmatmul.mubr.bf16.gmra.mrb[52].mxu0 %v1439_v8  ;;  %v1371_v15 = vmax.f32 %v1048_v53, 0.0 }
 0x1f2   : > { %v1054_v7 = vadd.f32 %v1053_v10, %v3650_v47  ;;  %v1372_v17 = vmax.f32 %v1050_v61, 0.0 }
 0x1f3   : > { %v1375_v16 = vmax.f32 %v1052_v6, 0.0 }
 0x1f4   : > { %v1376_v18 = vmax.f32 %v1054_v7, 0.0 }
 0x1f5   : > { %v1443_v19 = vpack.c.bf16 %v1375_v16, %v1371_v15 }
 0x1f6   : > { %v1444_v20 = vpack.c.bf16 %v1376_v18, %v1372_v17  ;;  %v1057_v21 = vpop.f32.mrb[60].mxu1 }
 0x1f7   : > { %v1058_v22 = vadd.f32 %v1057_v21, %v3645_v46  ;;  %v1059_v23 = vpop.f32.mrb[61].mxu1 }
 0x1f8   : > { %v1060_v25 = vadd.f32 %v1059_v23, %v3650_v47  ;;  %v1061_v26 = vpop.f32.mrb[62].mxu1  ;;  %2019 = vmatprep.mubr.bf16.mxu0 %v1444_v20 }
 0x1f9   : > { %v1062_v28 = vadd.f32 %v1061_v26, %v3645_v46  ;;  %v1063_v11 = vpop.f32.mrb[63].mxu1  ;;  %2020 = vmatmul.mubr.bf16.gmra.mrb[56].mxu0 %v1443_v19  ;;  %v1379_v12 = vmax.f32 %v1058_v22, 0.0 }
 0x1fa   : > { %v1064_v29 = vadd.f32 %v1063_v11, %v3650_v47  ;;  %v1380_v32 = vmax.f32 %v1060_v25, 0.0 }
 0x1fb   : > { %v1383_v30 = vmax.f32 %v1062_v28, 0.0 }
 0x1fc   : > { %v1384_v33 = vmax.f32 %v1064_v29, 0.0 }
 0x1fd   : > { %v1447_v37 = vpack.c.bf16 %v1383_v30, %v1379_v12 }
 0x1fe   : > { %v1448_v38 = vpack.c.bf16 %v1384_v33, %v1380_v32  ;;  %v1100_v39 = vpop.f32.mrb[64].mxu1 }
 0x1ff   : > { %v1101_v42 = vadd.f32 %v1100_v39, %v3729_v31  ;;  %v1102_v46 = vpop.f32.mrb[65].mxu1 }
 0x200   : > { %v1103_v43 = vadd.f32 %v1102_v46, %v3732_v35  ;;  %v1104_v44 = vpop.f32.mrb[66].mxu1  ;;  %2029 = vmatprep.mubr.bf16.mxu0 %v1448_v38 }
 0x201   : > { %v1105_v47 = vadd.f32 %v1104_v44, %v3729_v31  ;;  %v1106_v45 = vpop.f32.mrb[67].mxu1  ;;  %2030 = vmatmul.mubr.bf16.gmra.mrb[60].mxu0 %v1447_v37  ;;  %v1261_v49 = vmax.f32 %v1101_v42, 0.0 }
 0x202   : > { %v1107_v48 = vadd.f32 %v1106_v45, %v3732_v35  ;;  %v1262_v40 = vmax.f32 %v1103_v43, 0.0 }
 0x203   : > { %v1265_v50 = vmax.f32 %v1105_v47, 0.0 }
 0x204   : > { %v1266_v14 = vmax.f32 %v1107_v48, 0.0 }
 0x205   : > { %v1389_v51 = vpack.c.bf16 %v1265_v50, %v1261_v49 }
 0x206   : > { %v1390_v54 = vpack.c.bf16 %v1266_v14, %v1262_v40  ;;  %v1110_v55 = vpop.f32.mrb[68].mxu1 }
 0x207   : > { %v1111_v56 = vadd.f32 %v1110_v55, %v3729_v31  ;;  %v1112_v57 = vpop.f32.mrb[69].mxu1 }
 0x208   : > { %v1113_v58 = vadd.f32 %v1112_v57, %v3732_v35  ;;  %v1114_v59 = vpop.f32.mrb[70].mxu1  ;;  %2072 = vmatprep.mubr.bf16.mxu0 %v1390_v54 }
 0x209   : > { %v1115_v62 = vadd.f32 %v1114_v59, %v3729_v31  ;;  %v1116_v63 = vpop.f32.mrb[71].mxu1  ;;  %2073 = vmatmul.mubr.bf16.vlgmr.msra.gmra.mrb[0].mxu0 %v1389_v51  ;;  %v1269_v1 = vmax.f32 %v1111_v56, 0.0 }
 0x20a   : > { %v1117_v0 = vadd.f32 %v1116_v63, %v3732_v35  ;;  %v1270_v3 = vmax.f32 %v1113_v58, 0.0 }
 0x20b   : > { %v1273_v2 = vmax.f32 %v1115_v62, 0.0 }
 0x20c   : > { %v1274_v4 = vmax.f32 %v1117_v0, 0.0 }
 0x20d   : > { %v1393_v5 = vpack.c.bf16 %v1273_v2, %v1269_v1 }
 0x20e   : > { %v1394_v8 = vpack.c.bf16 %v1274_v4, %v1270_v3  ;;  %v1120_v13 = vpop.f32.mrb[72].mxu1 }
 0x20f   : > { %v1121_v52 = vadd.f32 %v1120_v13, %v3729_v31  ;;  %v1122_v53 = vpop.f32.mrb[73].mxu1 }
 0x210   : > { %v1123_v60 = vadd.f32 %v1122_v53, %v3732_v35  ;;  %v1124_v61 = vpop.f32.mrb[74].mxu1  ;;  %2082 = vmatprep.mubr.bf16.mxu0 %v1394_v8 }
 0x211   : > { %v1125_v9 = vadd.f32 %v1124_v61, %v3729_v31  ;;  %v1126_v6 = vpop.f32.mrb[75].mxu1  ;;  %2083 = vmatmul.mubr.bf16.gmra.mrb[4].mxu0 %v1393_v5  ;;  %v1277_v7 = vmax.f32 %v1121_v52, 0.0 }
 0x212   : > { %v1127_v10 = vadd.f32 %v1126_v6, %v3732_v35  ;;  %v1278_v16 = vmax.f32 %v1123_v60, 0.0 }
 0x213   : > { %v1281_v15 = vmax.f32 %v1125_v9, 0.0 }
 0x214   : > { %v1282_v17 = vmax.f32 %v1127_v10, 0.0 }
 0x215   : > { %v1397_v18 = vpack.c.bf16 %v1281_v15, %v1277_v7 }
 0x216   : > { %v1398_v19 = vpack.c.bf16 %v1282_v17, %v1278_v16  ;;  %v1130_v20 = vpop.f32.mrb[76].mxu1 }
 0x217   : > { %v1131_v21 = vadd.f32 %v1130_v20, %v3729_v31  ;;  %v1132_v22 = vpop.f32.mrb[77].mxu1 }
 0x218   : > { %v1133_v23 = vadd.f32 %v1132_v22, %v3732_v35  ;;  %v1134_v24 = vpop.f32.mrb[78].mxu1  ;;  %2092 = vmatprep.mubr.bf16.mxu0 %v1398_v19 }
 0x219   : > { %v1135_v25 = vadd.f32 %v1134_v24, %v3729_v31  ;;  %v1136_v26 = vpop.f32.mrb[79].mxu1  ;;  %2093 = vmatmul.mubr.bf16.gmra.mrb[8].mxu0 %v1397_v18  ;;  %v1285_v28 = vmax.f32 %v1131_v21, 0.0 }
 0x21a   : > { %v1137_v27 = vadd.f32 %v1136_v26, %v3732_v35  ;;  %v1286_v29 = vmax.f32 %v1133_v23, 0.0 }
 0x21b   : > { %v1289_v11 = vmax.f32 %v1135_v25, 0.0 }
 0x21c   : > { %v1290_v12 = vmax.f32 %v1137_v27, 0.0 }
 0x21d   : > { %v1401_v30 = vpack.c.bf16 %v1289_v11, %v1285_v28 }
 0x21e   : > { %v1402_v32 = vpack.c.bf16 %v1290_v12, %v1286_v29  ;;  %v1140_v33 = vpop.f32.mrb[80].mxu1 }
 0x21f   : > { %v1141_v37 = vadd.f32 %v1140_v33, %v3729_v31  ;;  %v1142_v38 = vpop.f32.mrb[81].mxu1 }
 0x220   : > { %v1143_v39 = vadd.f32 %v1142_v38, %v3732_v35  ;;  %v1144_v42 = vpop.f32.mrb[82].mxu1  ;;  %2102 = vmatprep.mubr.bf16.mxu0 %v1402_v32 }
 0x221   : > { %v1145_v46 = vadd.f32 %v1144_v42, %v3729_v31  ;;  %v1146_v43 = vpop.f32.mrb[83].mxu1  ;;  %2103 = vmatmul.mubr.bf16.gmra.mrb[12].mxu0 %v1401_v30  ;;  %v1293_v47 = vmax.f32 %v1141_v37, 0.0 }
 0x222   : > { %v1147_v44 = vadd.f32 %v1146_v43, %v3732_v35  ;;  %v1294_v48 = vmax.f32 %v1143_v39, 0.0 }
 0x223   : > { %v1297_v45 = vmax.f32 %v1145_v46, 0.0 }
 0x224   : > { %v1298_v49 = vmax.f32 %v1147_v44, 0.0 }
 0x225   : > { %v1405_v50 = vpack.c.bf16 %v1297_v45, %v1293_v47 }
 0x226   : > { %v1406_v40 = vpack.c.bf16 %v1298_v49, %v1294_v48  ;;  %v1150_v14 = vpop.f32.mrb[84].mxu1 }
 0x227   : > { %v1151_v51 = vadd.f32 %v1150_v14, %v3729_v31  ;;  %v1152_v54 = vpop.f32.mrb[85].mxu1 }
 0x228   : > { %v1153_v55 = vadd.f32 %v1152_v54, %v3732_v35  ;;  %v1154_v56 = vpop.f32.mrb[86].mxu1  ;;  %2112 = vmatprep.mubr.bf16.mxu0 %v1406_v40 }
 0x229   : > { %v1155_v57 = vadd.f32 %v1154_v56, %v3729_v31  ;;  %v1156_v58 = vpop.f32.mrb[87].mxu1  ;;  %2113 = vmatmul.mubr.bf16.gmra.mrb[16].mxu0 %v1405_v50  ;;  %v1301_v62 = vmax.f32 %v1151_v51, 0.0 }
 0x22a   : > { %v1157_v59 = vadd.f32 %v1156_v58, %v3732_v35  ;;  %v1302_v0 = vmax.f32 %v1153_v55, 0.0 }
 0x22b   : > { %v1305_v63 = vmax.f32 %v1155_v57, 0.0 }
 0x22c   : > { %v1306_v1 = vmax.f32 %v1157_v59, 0.0 }
 0x22d   : > { %v1409_v2 = vpack.c.bf16 %v1305_v63, %v1301_v62 }
 0x22e   : > { %v1410_v3 = vpack.c.bf16 %v1306_v1, %v1302_v0  ;;  %v1160_v4 = vpop.f32.mrb[88].mxu1 }
 0x22f   : > { %v1161_v5 = vadd.f32 %v1160_v4, %v3729_v31  ;;  %v1162_v8 = vpop.f32.mrb[89].mxu1 }
 0x230   : > { %v1163_v13 = vadd.f32 %v1162_v8, %v3732_v35  ;;  %v1164_v52 = vpop.f32.mrb[90].mxu1  ;;  %2122 = vmatprep.mubr.bf16.mxu0 %v1410_v3 }
 0x231   : > { %v1165_v53 = vadd.f32 %v1164_v52, %v3729_v31  ;;  %v1166_v60 = vpop.f32.mrb[91].mxu1  ;;  %2123 = vmatmul.mubr.bf16.gmra.mrb[20].mxu0 %v1409_v2  ;;  %v1309_v9 = vmax.f32 %v1161_v5, 0.0 }
 0x232   : > { %v1167_v61 = vadd.f32 %v1166_v60, %v3732_v35  ;;  %v1310_v10 = vmax.f32 %v1163_v13, 0.0 }
 0x233   : > { %v1313_v6 = vmax.f32 %v1165_v53, 0.0 }
 0x234   : > { %v1314_v7 = vmax.f32 %v1167_v61, 0.0 }
 0x235   : > { %v1413_v15 = vpack.c.bf16 %v1313_v6, %v1309_v9 }
 0x236   : > { %v1414_v16 = vpack.c.bf16 %v1314_v7, %v1310_v10  ;;  %v1170_v17 = vpop.f32.mrb[92].mxu1 }
 0x237   : > { %v1171_v18 = vadd.f32 %v1170_v17, %v3729_v31  ;;  %v1172_v19 = vpop.f32.mrb[93].mxu1 }
 0x238   : > { %v1173_v20 = vadd.f32 %v1172_v19, %v3732_v35  ;;  %v1174_v21 = vpop.f32.mrb[94].mxu1  ;;  %2132 = vmatprep.mubr.bf16.mxu0 %v1414_v16 }
 0x239   : > { %v1175_v22 = vadd.f32 %v1174_v21, %v3729_v31  ;;  %v1176_v23 = vpop.f32.mrb[95].mxu1  ;;  %2133 = vmatmul.mubr.bf16.gmra.mrb[24].mxu0 %v1413_v15  ;;  %v1317_v25 = vmax.f32 %v1171_v18, 0.0 }
 0x23a   : > { %v1177_v24 = vadd.f32 %v1176_v23, %v3732_v35  ;;  %v1318_v27 = vmax.f32 %v1173_v20, 0.0 }
 0x23b   : > { %v1321_v26 = vmax.f32 %v1175_v22, 0.0 }
 0x23c   : > { %v1322_v28 = vmax.f32 %v1177_v24, 0.0 }
 0x23d   : > { %v1417_v11 = vpack.c.bf16 %v1321_v26, %v1317_v25 }
 0x23e   : > { %v1418_v29 = vpack.c.bf16 %v1322_v28, %v1318_v27  ;;  %v1180_v12 = vpop.f32.mrb[96].mxu1 }
 0x23f   : > { %v1181_v30 = vadd.f32 %v1180_v12, %v3729_v31  ;;  %v1182_v32 = vpop.f32.mrb[97].mxu1 }
 0x240   : > { %v1183_v33 = vadd.f32 %v1182_v32, %v3732_v35  ;;  %v1184_v37 = vpop.f32.mrb[98].mxu1  ;;  %2142 = vmatprep.mubr.bf16.mxu0 %v1418_v29 }
 0x241   : > { %v1185_v38 = vadd.f32 %v1184_v37, %v3729_v31  ;;  %v1186_v39 = vpop.f32.mrb[99].mxu1  ;;  %2143 = vmatmul.mubr.bf16.gmra.mrb[28].mxu0 %v1417_v11  ;;  %v1325_v46 = vmax.f32 %v1181_v30, 0.0 }
 0x242   : > { %v1187_v42 = vadd.f32 %v1186_v39, %v3732_v35  ;;  %v1326_v44 = vmax.f32 %v1183_v33, 0.0 }
 0x243   : > { %v1329_v43 = vmax.f32 %v1185_v38, 0.0 }
 0x244   : > { %v1330_v47 = vmax.f32 %v1187_v42, 0.0 }
 0x245   : > { %v1421_v45 = vpack.c.bf16 %v1329_v43, %v1325_v46 }
 0x246   : > { %v1422_v48 = vpack.c.bf16 %v1330_v47, %v1326_v44  ;;  %v1190_v49 = vpop.f32.mrb[100].mxu1 }
 0x247   : > { %v1191_v50 = vadd.f32 %v1190_v49, %v3729_v31  ;;  %v1192_v40 = vpop.f32.mrb[101].mxu1 }
 0x248   : > { %v1193_v14 = vadd.f32 %v1192_v40, %v3732_v35  ;;  %v1194_v51 = vpop.f32.mrb[102].mxu1  ;;  %2152 = vmatprep.mubr.bf16.mxu0 %v1422_v48 }
 0x249   : > { %v1195_v54 = vadd.f32 %v1194_v51, %v3729_v31  ;;  %v1196_v55 = vpop.f32.mrb[103].mxu1  ;;  %2153 = vmatmul.mubr.bf16.gmra.mrb[32].mxu0 %v1421_v45  ;;  %v1333_v57 = vmax.f32 %v1191_v50, 0.0 }
 0x24a   : > { %v1197_v56 = vadd.f32 %v1196_v55, %v3732_v35  ;;  %v1334_v59 = vmax.f32 %v1193_v14, 0.0 }
 0x24b   : > { %v1337_v58 = vmax.f32 %v1195_v54, 0.0 }
 0x24c   : > { %v1338_v62 = vmax.f32 %v1197_v56, 0.0 }
 0x24d   : > { %v1425_v63 = vpack.c.bf16 %v1337_v58, %v1333_v57 }
 0x24e   : > { %v1426_v0 = vpack.c.bf16 %v1338_v62, %v1334_v59  ;;  %v1200_v1 = vpop.f32.mrb[104].mxu1 }
 0x24f   : > { %v1201_v2 = vadd.f32 %v1200_v1, %v3729_v31  ;;  %v1202_v3 = vpop.f32.mrb[105].mxu1 }
 0x250   : > { %v1203_v4 = vadd.f32 %v1202_v3, %v3732_v35  ;;  %v1204_v5 = vpop.f32.mrb[106].mxu1  ;;  %2162 = vmatprep.mubr.bf16.mxu0 %v1426_v0 }
 0x251   : > { %v1205_v8 = vadd.f32 %v1204_v5, %v3729_v31  ;;  %v1206_v13 = vpop.f32.mrb[107].mxu1  ;;  %2163 = vmatmul.mubr.bf16.gmra.mrb[36].mxu0 %v1425_v63  ;;  %v1341_v53 = vmax.f32 %v1201_v2, 0.0 }
 0x252   : > { %v1207_v52 = vadd.f32 %v1206_v13, %v3732_v35  ;;  %v1342_v61 = vmax.f32 %v1203_v4, 0.0 }
 0x253   : > { %v1345_v60 = vmax.f32 %v1205_v8, 0.0 }
 0x254   : > { %v1346_v9 = vmax.f32 %v1207_v52, 0.0 }
 0x255   : > { %v1429_v6 = vpack.c.bf16 %v1345_v60, %v1341_v53 }
 0x256   : > { %v1430_v10 = vpack.c.bf16 %v1346_v9, %v1342_v61  ;;  %v1210_v7 = vpop.f32.mrb[108].mxu1 }
 0x257   : > { %v1211_v15 = vadd.f32 %v1210_v7, %v3729_v31  ;;  %v1212_v16 = vpop.f32.mrb[109].mxu1 }
 0x258   : > { %v1213_v17 = vadd.f32 %v1212_v16, %v3732_v35  ;;  %v1214_v18 = vpop.f32.mrb[110].mxu1  ;;  %2172 = vmatprep.mubr.bf16.mxu0 %v1430_v10 }
 0x259   : > { %v1215_v19 = vadd.f32 %v1214_v18, %v3729_v31  ;;  %v1216_v20 = vpop.f32.mrb[111].mxu1  ;;  %2173 = vmatmul.mubr.bf16.gmra.mrb[40].mxu0 %v1429_v6  ;;  %v1349_v22 = vmax.f32 %v1211_v15, 0.0 }
 0x25a   : > { %v1217_v21 = vadd.f32 %v1216_v20, %v3732_v35  ;;  %v1350_v24 = vmax.f32 %v1213_v17, 0.0 }
 0x25b   : > { %v1353_v23 = vmax.f32 %v1215_v19, 0.0 }
 0x25c   : > { %v1354_v25 = vmax.f32 %v1217_v21, 0.0 }
 0x25d   : > { %v1433_v26 = vpack.c.bf16 %v1353_v23, %v1349_v22 }
 0x25e   : > { %v1434_v27 = vpack.c.bf16 %v1354_v25, %v1350_v24  ;;  %v1220_v28 = vpop.f32.mrb[112].mxu1  ;;  %v1515_v25 = vld [vmem:[%s3995_s4] sm:$0x3] }
 0x25f   : > { %v1221_v11 = vadd.f32 %v1220_v28, %v3729_v31  ;;  %v1222_v29 = vpop.f32.mrb[113].mxu1 }
 0x260   : > { %v1223_v12 = vadd.f32 %v1222_v29, %v3732_v35  ;;  %v1224_v30 = vpop.f32.mrb[114].mxu1  ;;  %2182 = vmatprep.mubr.bf16.mxu0 %v1434_v27 }
 0x261   : > { %v1225_v32 = vadd.f32 %v1224_v30, %v3729_v31  ;;  %v1226_v33 = vpop.f32.mrb[115].mxu1  ;;  %2183 = vmatmul.mubr.bf16.gmra.mrb[44].mxu0 %v1433_v26  ;;  %v1357_v38 = vmax.f32 %v1221_v11, 0.0  ;;  %v3803_v26 = vrot.slane %v1515_v25, %v375_v36 }
 0x262   : > { %v1227_v37 = vadd.f32 %v1226_v33, %v3732_v35  ;;  %v1358_v42 = vmax.f32 %v1223_v12, 0.0 }
 0x263   : > { %v1361_v39 = vmax.f32 %v1225_v32, 0.0 }
 0x264   : > { %v1362_v46 = vmax.f32 %v1227_v37, 0.0 }
 0x265   : > { %v1437_v43 = vpack.c.bf16 %v1361_v39, %v1357_v38 }
 0x266   : > { %v1438_v44 = vpack.c.bf16 %v1362_v46, %v1358_v42  ;;  %v1230_v47 = vpop.f32.mrb[116].mxu1 }
 0x267   : > { %v1231_v45 = vadd.f32 %v1230_v47, %v3729_v31  ;;  %v1232_v48 = vpop.f32.mrb[117].mxu1 }
 0x268   : > { %v1233_v49 = vadd.f32 %v1232_v48, %v3732_v35  ;;  %v1234_v50 = vpop.f32.mrb[118].mxu1  ;;  %2192 = vmatprep.mubr.bf16.mxu0 %v1438_v44 }
 0x269   : > { %v1235_v40 = vadd.f32 %v1234_v50, %v3729_v31  ;;  %v1236_v14 = vpop.f32.mrb[119].mxu1  ;;  %2193 = vmatmul.mubr.bf16.gmra.mrb[48].mxu0 %v1437_v43  ;;  %v1365_v54 = vmax.f32 %v1231_v45, 0.0 }
 0x26a   : > { %v1237_v51 = vadd.f32 %v1236_v14, %v3732_v35  ;;  %v1366_v56 = vmax.f32 %v1233_v49, 0.0 }
 0x26b   : > { %v1369_v55 = vmax.f32 %v1235_v40, 0.0 }
 0x26c   : > { %v1370_v57 = vmax.f32 %v1237_v51, 0.0 }
 0x26d   : > { %v1441_v58 = vpack.c.bf16 %v1369_v55, %v1365_v54 }
 0x26e   : > { %v1442_v59 = vpack.c.bf16 %v1370_v57, %v1366_v56  ;;  %v1240_v62 = vpop.f32.mrb[120].mxu1 }
 0x26f   : > { %v1241_v63 = vadd.f32 %v1240_v62, %v3729_v31  ;;  %v1242_v0 = vpop.f32.mrb[121].mxu1 }
 0x270   : > { %v1243_v1 = vadd.f32 %v1242_v0, %v3732_v35  ;;  %v1244_v2 = vpop.f32.mrb[122].mxu1  ;;  %2202 = vmatprep.mubr.bf16.mxu0 %v1442_v59 }
 0x271   : > { %v1245_v3 = vadd.f32 %v1244_v2, %v3729_v31  ;;  %v1246_v4 = vpop.f32.mrb[123].mxu1  ;;  %2203 = vmatmul.mubr.bf16.gmra.mrb[52].mxu0 %v1441_v58  ;;  %v1373_v8 = vmax.f32 %v1241_v63, 0.0 }
 0x272   : > { %v1247_v5 = vadd.f32 %v1246_v4, %v3732_v35  ;;  %v1374_v52 = vmax.f32 %v1243_v1, 0.0 }
 0x273   : > { %v1377_v13 = vmax.f32 %v1245_v3, 0.0 }
 0x274   : > { %v1378_v53 = vmax.f32 %v1247_v5, 0.0 }
 0x275   : > { %v1445_v60 = vpack.c.bf16 %v1377_v13, %v1373_v8 }
 0x276   : > { %v1446_v61 = vpack.c.bf16 %v1378_v53, %v1374_v52  ;;  %v1250_v9 = vpop.f32.mrb[124].mxu1 }
 0x277   : > { %v1251_v6 = vadd.f32 %v1250_v9, %v3729_v31  ;;  %v1252_v10 = vpop.f32.mrb[125].mxu1 }
 0x278   : > { %v1253_v7 = vadd.f32 %v1252_v10, %v3732_v35  ;;  %v1254_v15 = vpop.f32.mrb[126].mxu1  ;;  %2212 = vmatprep.mubr.bf16.mxu0 %v1446_v61 }
 0x279   : > { %v1255_v16 = vadd.f32 %v1254_v15, %v3729_v31  ;;  %v1256_v17 = vpop.f32.mrb[127].mxu1  ;;  %2213 = vmatmul.mubr.bf16.gmra.mrb[56].mxu0 %v1445_v60  ;;  %v1381_v19 = vmax.f32 %v1251_v6, 0.0  ;;  %v3807_v31 = vrot.slane %v1515_v25, %v379_v41 }
 0x27a   : > { %v1257_v18 = vadd.f32 %v1256_v17, %v3732_v35  ;;  %v1382_v21 = vmax.f32 %v1253_v7, 0.0 }
 0x27b   : > { %v1385_v20 = vmax.f32 %v1255_v16, 0.0 }
 0x27c   : > { %v1386_v22 = vmax.f32 %v1257_v18, 0.0 }
 0x27d   : > { %v1449_v23 = vpack.c.bf16 %v1385_v20, %v1381_v19 }
 0x27e   : > { %v1450_v24 = vpack.c.bf16 %v1386_v22, %v1382_v21 }
 0x280   : > { %2222 = vmatprep.mubr.bf16.mxu0 %v1450_v24 }
 0x281   : > { %2223 = vmatmul.mubr.bf16.gmra.mrb[60].mxu0 %v1449_v23 }
 0x2dc   : > { %v2074_v35 = vpop.f32.mrb[0].mxu0 }
 0x2dd   : > { %v2652_v27 = vadd.f32 %v2074_v35, %v3803_v26  ;;  %v2076_v28 = vpop.f32.mrb[1].mxu0 }
 0x2de   : > { %v2653_v11 = vadd.f32 %v2076_v28, %v3807_v31  ;;  %v2078_v29 = vpop.f32.mrb[2].mxu0 }
 0x2df   : > { %v2233_v12 = vmax.f32 %v2652_v27, 0.0  ;;  %v2654_v30 = vadd.f32 %v2078_v29, %v3803_v26  ;;  %v2080_v32 = vpop.f32.mrb[3].mxu0 }
 0x2e0   : > { %v2234_v33 = vmax.f32 %v2653_v11, 0.0  ;;  %v2655_v36 = vadd.f32 %v2080_v32, %v3807_v31 }
 0x2e1   : > { %2297 = vst [vmem:[%s3814_s28] sm:$0xff] %v2233_v12  ;;  %v2235_v34 = vmax.f32 %v2654_v30, 0.0 }
 0x2e2   : > { %2298 = vst [vmem:[%s3814_s28 + $0x8] sm:$0xff] %v2234_v33  ;;  %v2236_v41 = vmax.f32 %v2655_v36, 0.0 }
 0x2e3   : > { %2299 = vst [vmem:[%s3814_s28 + $0x10] sm:$0xff] %v2235_v34 }
 0x2e4   : > { %2300 = vst [vmem:[%s3814_s28 + $0x18] sm:$0xff] %v2236_v41  ;;  %v2084_v37 = vpop.f32.mrb[4].mxu0 }
 0x2e5   : > { %v2656_v38 = vadd.f32 %v2084_v37, %v3803_v26  ;;  %v2086_v39 = vpop.f32.mrb[5].mxu0 }
 0x2e6   : > { %v2657_v42 = vadd.f32 %v2086_v39, %v3807_v31  ;;  %v2088_v46 = vpop.f32.mrb[6].mxu0 }
 0x2e7   : > { %v2237_v43 = vmax.f32 %v2656_v38, 0.0  ;;  %v2658_v44 = vadd.f32 %v2088_v46, %v3803_v26  ;;  %v2090_v47 = vpop.f32.mrb[7].mxu0 }
 0x2e8   : > { %v2238_v45 = vmax.f32 %v2657_v42, 0.0  ;;  %v2659_v48 = vadd.f32 %v2090_v47, %v3807_v31 }
 0x2e9   : > { %2301 = vst [vmem:[%s3814_s28 + $0x20] sm:$0xff] %v2237_v43  ;;  %v2239_v49 = vmax.f32 %v2658_v44, 0.0 }
 0x2ea   : > { %2302 = vst [vmem:[%s3814_s28 + $0x28] sm:$0xff] %v2238_v45  ;;  %v2240_v50 = vmax.f32 %v2659_v48, 0.0 }
 0x2eb   : > { %2303 = vst [vmem:[%s3814_s28 + $0x30] sm:$0xff] %v2239_v49 }
 0x2ec   : > { %2304 = vst [vmem:[%s3814_s28 + $0x38] sm:$0xff] %v2240_v50  ;;  %v2094_v40 = vpop.f32.mrb[8].mxu0 }
 0x2ed   : > { %v2660_v14 = vadd.f32 %v2094_v40, %v3803_v26  ;;  %v2096_v51 = vpop.f32.mrb[9].mxu0 }
 0x2ee   : > { %v2661_v54 = vadd.f32 %v2096_v51, %v3807_v31  ;;  %v2098_v55 = vpop.f32.mrb[10].mxu0 }
 0x2ef   : > { %v2241_v56 = vmax.f32 %v2660_v14, 0.0  ;;  %v2662_v57 = vadd.f32 %v2098_v55, %v3803_v26  ;;  %v2100_v58 = vpop.f32.mrb[11].mxu0 }
 0x2f0   : > { %v2242_v59 = vmax.f32 %v2661_v54, 0.0  ;;  %v2663_v62 = vadd.f32 %v2100_v58, %v3807_v31 }
 0x2f1   : > { %2305 = vst [vmem:[%s3814_s28 + $0x40] sm:$0xff] %v2241_v56  ;;  %v2243_v63 = vmax.f32 %v2662_v57, 0.0 }
 0x2f2   : > { %2306 = vst [vmem:[%s3814_s28 + $0x48] sm:$0xff] %v2242_v59  ;;  %v2244_v0 = vmax.f32 %v2663_v62, 0.0 }
 0x2f3   : > { %2307 = vst [vmem:[%s3814_s28 + $0x50] sm:$0xff] %v2243_v63 }
 0x2f4   : > { %2308 = vst [vmem:[%s3814_s28 + $0x58] sm:$0xff] %v2244_v0  ;;  %v2104_v1 = vpop.f32.mrb[12].mxu0 }
 0x2f5   : > { %v2664_v2 = vadd.f32 %v2104_v1, %v3803_v26  ;;  %v2106_v3 = vpop.f32.mrb[13].mxu0 }
 0x2f6   : > { %v2665_v4 = vadd.f32 %v2106_v3, %v3807_v31  ;;  %v2108_v5 = vpop.f32.mrb[14].mxu0 }
 0x2f7   : > { %v2245_v8 = vmax.f32 %v2664_v2, 0.0  ;;  %v2666_v13 = vadd.f32 %v2108_v5, %v3803_v26  ;;  %v2110_v52 = vpop.f32.mrb[15].mxu0 }
 0x2f8   : > { %v2246_v53 = vmax.f32 %v2665_v4, 0.0  ;;  %v2667_v60 = vadd.f32 %v2110_v52, %v3807_v31 }
 0x2f9   : > { %2309 = vst [vmem:[%s3814_s28 + $0x60] sm:$0xff] %v2245_v8  ;;  %v2247_v61 = vmax.f32 %v2666_v13, 0.0 }
 0x2fa   : > { %2310 = vst [vmem:[%s3814_s28 + $0x68] sm:$0xff] %v2246_v53  ;;  %v2248_v9 = vmax.f32 %v2667_v60, 0.0 }
 0x2fb   : > { %2311 = vst [vmem:[%s3814_s28 + $0x70] sm:$0xff] %v2247_v61 }
 0x2fc   : > { %2312 = vst [vmem:[%s3814_s28 + $0x78] sm:$0xff] %v2248_v9  ;;  %v2114_v6 = vpop.f32.mrb[16].mxu0 }
 0x2fd   : > { %v2668_v10 = vadd.f32 %v2114_v6, %v3803_v26  ;;  %v2116_v7 = vpop.f32.mrb[17].mxu0 }
 0x2fe   : > { %v2669_v15 = vadd.f32 %v2116_v7, %v3807_v31  ;;  %v2118_v16 = vpop.f32.mrb[18].mxu0 }
 0x2ff   : > { %v2249_v17 = vmax.f32 %v2668_v10, 0.0  ;;  %v2670_v18 = vadd.f32 %v2118_v16, %v3803_v26  ;;  %v2120_v19 = vpop.f32.mrb[19].mxu0 }
 0x300   : > { %v2250_v20 = vmax.f32 %v2669_v15, 0.0  ;;  %v2671_v21 = vadd.f32 %v2120_v19, %v3807_v31 }
 0x301   : > { %2313 = vst [vmem:[%s3814_s28 + $0x80] sm:$0xff] %v2249_v17  ;;  %v2251_v22 = vmax.f32 %v2670_v18, 0.0 }
 0x302   : > { %2314 = vst [vmem:[%s3814_s28 + $0x88] sm:$0xff] %v2250_v20  ;;  %v2252_v23 = vmax.f32 %v2671_v21, 0.0 }
 0x303   : > { %2315 = vst [vmem:[%s3814_s28 + $0x90] sm:$0xff] %v2251_v22 }
 0x304   : > { %2316 = vst [vmem:[%s3814_s28 + $0x98] sm:$0xff] %v2252_v23  ;;  %v2124_v24 = vpop.f32.mrb[20].mxu0 }
 0x305   : > { %v2672_v25 = vadd.f32 %v2124_v24, %v3803_v26  ;;  %v2126_v35 = vpop.f32.mrb[21].mxu0 }
 0x306   : > { %v2673_v27 = vadd.f32 %v2126_v35, %v3807_v31  ;;  %v2128_v28 = vpop.f32.mrb[22].mxu0 }
 0x307   : > { %v2253_v11 = vmax.f32 %v2672_v25, 0.0  ;;  %v2674_v29 = vadd.f32 %v2128_v28, %v3803_v26  ;;  %v2130_v12 = vpop.f32.mrb[23].mxu0 }
 0x308   : > { %v2254_v30 = vmax.f32 %v2673_v27, 0.0  ;;  %v2675_v32 = vadd.f32 %v2130_v12, %v3807_v31 }
 0x309   : > { %2317 = vst [vmem:[%s3814_s28 + $0xa0] sm:$0xff] %v2253_v11  ;;  %v2255_v33 = vmax.f32 %v2674_v29, 0.0 }
 0x30a   : > { %2318 = vst [vmem:[%s3814_s28 + $0xa8] sm:$0xff] %v2254_v30  ;;  %v2256_v36 = vmax.f32 %v2675_v32, 0.0 }
 0x30b   : > { %2319 = vst [vmem:[%s3814_s28 + $0xb0] sm:$0xff] %v2255_v33 }
 0x30c   : > { %2320 = vst [vmem:[%s3814_s28 + $0xb8] sm:$0xff] %v2256_v36  ;;  %v2134_v34 = vpop.f32.mrb[24].mxu0 }
 0x30d   : > { %v2676_v41 = vadd.f32 %v2134_v34, %v3803_v26  ;;  %v2136_v37 = vpop.f32.mrb[25].mxu0 }
 0x30e   : > { %v2677_v38 = vadd.f32 %v2136_v37, %v3807_v31  ;;  %v2138_v39 = vpop.f32.mrb[26].mxu0 }
 0x30f   : > { %v2257_v42 = vmax.f32 %v2676_v41, 0.0  ;;  %v2678_v46 = vadd.f32 %v2138_v39, %v3803_v26  ;;  %v2140_v43 = vpop.f32.mrb[27].mxu0 }
 0x310   : > { %v2258_v44 = vmax.f32 %v2677_v38, 0.0  ;;  %v2679_v47 = vadd.f32 %v2140_v43, %v3807_v31 }
 0x311   : > { %2321 = vst [vmem:[%s3814_s28 + $0xc0] sm:$0xff] %v2257_v42  ;;  %v2259_v45 = vmax.f32 %v2678_v46, 0.0 }
 0x312   : > { %2322 = vst [vmem:[%s3814_s28 + $0xc8] sm:$0xff] %v2258_v44  ;;  %v2260_v48 = vmax.f32 %v2679_v47, 0.0 }
 0x313   : > { %2323 = vst [vmem:[%s3814_s28 + $0xd0] sm:$0xff] %v2259_v45 }
 0x314   : > { %2324 = vst [vmem:[%s3814_s28 + $0xd8] sm:$0xff] %v2260_v48  ;;  %v2144_v49 = vpop.f32.mrb[28].mxu0 }
 0x315   : > { %v2680_v50 = vadd.f32 %v2144_v49, %v3803_v26  ;;  %v2146_v40 = vpop.f32.mrb[29].mxu0 }
 0x316   : > { %v2681_v14 = vadd.f32 %v2146_v40, %v3807_v31  ;;  %v2148_v51 = vpop.f32.mrb[30].mxu0 }
 0x317   : > { %v2261_v54 = vmax.f32 %v2680_v50, 0.0  ;;  %v2682_v55 = vadd.f32 %v2148_v51, %v3803_v26  ;;  %v2150_v56 = vpop.f32.mrb[31].mxu0 }
 0x318   : > { %v2262_v57 = vmax.f32 %v2681_v14, 0.0  ;;  %v2683_v58 = vadd.f32 %v2150_v56, %v3807_v31 }
 0x319   : > { %2325 = vst [vmem:[%s3814_s28 + $0xe0] sm:$0xff] %v2261_v54  ;;  %v2263_v59 = vmax.f32 %v2682_v55, 0.0 }
 0x31a   : > { %2326 = vst [vmem:[%s3814_s28 + $0xe8] sm:$0xff] %v2262_v57  ;;  %v2264_v62 = vmax.f32 %v2683_v58, 0.0 }
 0x31b   : > { %2327 = vst [vmem:[%s3814_s28 + $0xf0] sm:$0xff] %v2263_v59 }
 0x31c   : > { %2328 = vst [vmem:[%s3814_s28 + $0xf8] sm:$0xff] %v2264_v62  ;;  %v2154_v63 = vpop.f32.mrb[32].mxu0 }
 0x31d   : > { %v2684_v0 = vadd.f32 %v2154_v63, %v3803_v26  ;;  %v2156_v1 = vpop.f32.mrb[33].mxu0 }
 0x31e   : > { %v2685_v2 = vadd.f32 %v2156_v1, %v3807_v31  ;;  %v2158_v3 = vpop.f32.mrb[34].mxu0 }
 0x31f   : > { %v2265_v4 = vmax.f32 %v2684_v0, 0.0  ;;  %v2686_v5 = vadd.f32 %v2158_v3, %v3803_v26  ;;  %v2160_v8 = vpop.f32.mrb[35].mxu0 }
 0x320   : > { %v2266_v13 = vmax.f32 %v2685_v2, 0.0  ;;  %v2687_v52 = vadd.f32 %v2160_v8, %v3807_v31 }
 0x321   : > { %2329 = vst [vmem:[%s3814_s28 + $0x100] sm:$0xff] %v2265_v4  ;;  %v2267_v53 = vmax.f32 %v2686_v5, 0.0 }
 0x322   : > { %2330 = vst [vmem:[%s3814_s28 + $0x108] sm:$0xff] %v2266_v13  ;;  %v2268_v60 = vmax.f32 %v2687_v52, 0.0 }
 0x323   : > { %2331 = vst [vmem:[%s3814_s28 + $0x110] sm:$0xff] %v2267_v53 }
 0x324   : > { %2332 = vst [vmem:[%s3814_s28 + $0x118] sm:$0xff] %v2268_v60  ;;  %v2164_v61 = vpop.f32.mrb[36].mxu0 }
 0x325   : > { %v2688_v9 = vadd.f32 %v2164_v61, %v3803_v26  ;;  %v2166_v6 = vpop.f32.mrb[37].mxu0 }
 0x326   : > { %v2689_v10 = vadd.f32 %v2166_v6, %v3807_v31  ;;  %v2168_v7 = vpop.f32.mrb[38].mxu0 }
 0x327   : > { %v2269_v15 = vmax.f32 %v2688_v9, 0.0  ;;  %v2690_v16 = vadd.f32 %v2168_v7, %v3803_v26  ;;  %v2170_v17 = vpop.f32.mrb[39].mxu0 }
 0x328   : > { %v2270_v18 = vmax.f32 %v2689_v10, 0.0  ;;  %v2691_v19 = vadd.f32 %v2170_v17, %v3807_v31 }
 0x329   : > { %2333 = vst [vmem:[%s3814_s28 + $0x120] sm:$0xff] %v2269_v15  ;;  %v2271_v20 = vmax.f32 %v2690_v16, 0.0 }
 0x32a   : > { %2334 = vst [vmem:[%s3814_s28 + $0x128] sm:$0xff] %v2270_v18  ;;  %v2272_v21 = vmax.f32 %v2691_v19, 0.0 }
 0x32b   : > { %2335 = vst [vmem:[%s3814_s28 + $0x130] sm:$0xff] %v2271_v20 }
 0x32c   : > { %2336 = vst [vmem:[%s3814_s28 + $0x138] sm:$0xff] %v2272_v21  ;;  %v2174_v22 = vpop.f32.mrb[40].mxu0 }
 0x32d   : > { %v2692_v23 = vadd.f32 %v2174_v22, %v3803_v26  ;;  %v2176_v24 = vpop.f32.mrb[41].mxu0 }
 0x32e   : > { %v2693_v25 = vadd.f32 %v2176_v24, %v3807_v31  ;;  %v2178_v35 = vpop.f32.mrb[42].mxu0 }
 0x32f   : > { %v2273_v27 = vmax.f32 %v2692_v23, 0.0  ;;  %v2694_v28 = vadd.f32 %v2178_v35, %v3803_v26  ;;  %v2180_v11 = vpop.f32.mrb[43].mxu0 }
 0x330   : > { %v2274_v29 = vmax.f32 %v2693_v25, 0.0  ;;  %v2695_v12 = vadd.f32 %v2180_v11, %v3807_v31 }
 0x331   : > { %2337 = vst [vmem:[%s3814_s28 + $0x140] sm:$0xff] %v2273_v27  ;;  %v2275_v30 = vmax.f32 %v2694_v28, 0.0 }
 0x332   : > { %2338 = vst [vmem:[%s3814_s28 + $0x148] sm:$0xff] %v2274_v29  ;;  %v2276_v32 = vmax.f32 %v2695_v12, 0.0 }
 0x333   : > { %2339 = vst [vmem:[%s3814_s28 + $0x150] sm:$0xff] %v2275_v30 }
 0x334   : > { %2340 = vst [vmem:[%s3814_s28 + $0x158] sm:$0xff] %v2276_v32  ;;  %v2184_v33 = vpop.f32.mrb[44].mxu0 }
 0x335   : > { %v2696_v36 = vadd.f32 %v2184_v33, %v3803_v26  ;;  %v2186_v34 = vpop.f32.mrb[45].mxu0 }
 0x336   : > { %v2697_v41 = vadd.f32 %v2186_v34, %v3807_v31  ;;  %v2188_v37 = vpop.f32.mrb[46].mxu0 }
 0x337   : > { %v2277_v38 = vmax.f32 %v2696_v36, 0.0  ;;  %v2698_v39 = vadd.f32 %v2188_v37, %v3803_v26  ;;  %v2190_v42 = vpop.f32.mrb[47].mxu0 }
 0x338   : > { %v2278_v46 = vmax.f32 %v2697_v41, 0.0  ;;  %v2699_v43 = vadd.f32 %v2190_v42, %v3807_v31 }
 0x339   : > { %2341 = vst [vmem:[%s3814_s28 + $0x160] sm:$0xff] %v2277_v38  ;;  %v2279_v44 = vmax.f32 %v2698_v39, 0.0 }
 0x33a   : > { %2342 = vst [vmem:[%s3814_s28 + $0x168] sm:$0xff] %v2278_v46  ;;  %v2280_v47 = vmax.f32 %v2699_v43, 0.0 }
 0x33b   : > { %2343 = vst [vmem:[%s3814_s28 + $0x170] sm:$0xff] %v2279_v44 }
 0x33c   : > { %2344 = vst [vmem:[%s3814_s28 + $0x178] sm:$0xff] %v2280_v47  ;;  %v2194_v45 = vpop.f32.mrb[48].mxu0 }
 0x33d   : > { %v2700_v48 = vadd.f32 %v2194_v45, %v3803_v26  ;;  %v2196_v49 = vpop.f32.mrb[49].mxu0 }
 0x33e   : > { %v2701_v50 = vadd.f32 %v2196_v49, %v3807_v31  ;;  %v2198_v40 = vpop.f32.mrb[50].mxu0 }
 0x33f   : > { %v2281_v14 = vmax.f32 %v2700_v48, 0.0  ;;  %v2702_v51 = vadd.f32 %v2198_v40, %v3803_v26  ;;  %v2200_v54 = vpop.f32.mrb[51].mxu0 }
 0x340   : > { %v2282_v55 = vmax.f32 %v2701_v50, 0.0  ;;  %v2703_v56 = vadd.f32 %v2200_v54, %v3807_v31 }
 0x341   : > { %2345 = vst [vmem:[%s3814_s28 + $0x180] sm:$0xff] %v2281_v14  ;;  %v2283_v57 = vmax.f32 %v2702_v51, 0.0 }
 0x342   : > { %2346 = vst [vmem:[%s3814_s28 + $0x188] sm:$0xff] %v2282_v55  ;;  %v2284_v58 = vmax.f32 %v2703_v56, 0.0 }
 0x343   : > { %2347 = vst [vmem:[%s3814_s28 + $0x190] sm:$0xff] %v2283_v57 }
 0x344   : > { %2348 = vst [vmem:[%s3814_s28 + $0x198] sm:$0xff] %v2284_v58  ;;  %v2204_v59 = vpop.f32.mrb[52].mxu0 }
 0x345   : > { %v2704_v62 = vadd.f32 %v2204_v59, %v3803_v26  ;;  %v2206_v63 = vpop.f32.mrb[53].mxu0 }
 0x346   : > { %v2705_v0 = vadd.f32 %v2206_v63, %v3807_v31  ;;  %v2208_v1 = vpop.f32.mrb[54].mxu0 }
 0x347   : > { %v2285_v2 = vmax.f32 %v2704_v62, 0.0  ;;  %v2706_v3 = vadd.f32 %v2208_v1, %v3803_v26  ;;  %v2210_v4 = vpop.f32.mrb[55].mxu0 }
 0x348   : > { %v2286_v5 = vmax.f32 %v2705_v0, 0.0  ;;  %v2707_v8 = vadd.f32 %v2210_v4, %v3807_v31 }
 0x349   : > { %2349 = vst [vmem:[%s3814_s28 + $0x1a0] sm:$0xff] %v2285_v2  ;;  %v2287_v13 = vmax.f32 %v2706_v3, 0.0 }
 0x34a   : > { %2350 = vst [vmem:[%s3814_s28 + $0x1a8] sm:$0xff] %v2286_v5  ;;  %v2288_v52 = vmax.f32 %v2707_v8, 0.0 }
 0x34b   : > { %2351 = vst [vmem:[%s3814_s28 + $0x1b0] sm:$0xff] %v2287_v13 }
 0x34c   : > { %2352 = vst [vmem:[%s3814_s28 + $0x1b8] sm:$0xff] %v2288_v52  ;;  %v2214_v53 = vpop.f32.mrb[56].mxu0 }
 0x34d   : > { %v2708_v60 = vadd.f32 %v2214_v53, %v3803_v26  ;;  %v2216_v61 = vpop.f32.mrb[57].mxu0 }
 0x34e   : > { %v2709_v9 = vadd.f32 %v2216_v61, %v3807_v31  ;;  %v2218_v6 = vpop.f32.mrb[58].mxu0 }
 0x34f   : > { %v2289_v10 = vmax.f32 %v2708_v60, 0.0  ;;  %v2710_v7 = vadd.f32 %v2218_v6, %v3803_v26  ;;  %v2220_v15 = vpop.f32.mrb[59].mxu0 }
 0x350   : > { %v2290_v16 = vmax.f32 %v2709_v9, 0.0  ;;  %v2711_v17 = vadd.f32 %v2220_v15, %v3807_v31 }
 0x351   : > { %2353 = vst [vmem:[%s3814_s28 + $0x1c0] sm:$0xff] %v2289_v10  ;;  %v2291_v18 = vmax.f32 %v2710_v7, 0.0 }
 0x352   : > { %2354 = vst [vmem:[%s3814_s28 + $0x1c8] sm:$0xff] %v2290_v16  ;;  %v2292_v19 = vmax.f32 %v2711_v17, 0.0 }
 0x353   : > { %2355 = vst [vmem:[%s3814_s28 + $0x1d0] sm:$0xff] %v2291_v18 }
 0x354   : > { %2356 = vst [vmem:[%s3814_s28 + $0x1d8] sm:$0xff] %v2292_v19  ;;  %v2224_v20 = vpop.f32.mrb[60].mxu0 }
 0x355   : > { %v2712_v21 = vadd.f32 %v2224_v20, %v3803_v26  ;;  %v2226_v22 = vpop.f32.mrb[61].mxu0 }
 0x356   : > { %v2713_v23 = vadd.f32 %v2226_v22, %v3807_v31  ;;  %v2228_v24 = vpop.f32.mrb[62].mxu0 }
 0x357   : > { %v2293_v25 = vmax.f32 %v2712_v21, 0.0  ;;  %v2714_v35 = vadd.f32 %v2228_v24, %v3803_v26  ;;  %v2230_v27 = vpop.f32.mrb[63].mxu0 }
 0x358   : > { %v2294_v28 = vmax.f32 %v2713_v23, 0.0  ;;  %v2715_v11 = vadd.f32 %v2230_v27, %v3807_v31 }
 0x359   : > { %2357 = vst [vmem:[%s3814_s28 + $0x1e0] sm:$0xff] %v2293_v25  ;;  %v2295_v29 = vmax.f32 %v2714_v35, 0.0 }
 0x35a   : > { %2358 = vst [vmem:[%s3814_s28 + $0x1e8] sm:$0xff] %v2294_v28  ;;  %v2296_v12 = vmax.f32 %v2715_v11, 0.0 }
 0x35b   : > { %2359 = vst [vmem:[%s3814_s28 + $0x1f0] sm:$0xff] %v2295_v29 }
 0x35c   : > { %2360 = vst [vmem:[%s3814_s28 + $0x1f8] sm:$0xff] %v2296_v12 }
 0x35d   : > { %3192 = shalt.err (!%p3189_p2)
}
 0x35e   : > { %s3193_s24 = scalar_lea.hbm %s3942_s23, 8192  ;;  %s3197_s13 = scalar_lea.hbm %s3996_s5, 16384 }
 0x35f   : > { %p3194_p13 = scmp.ne.s32.totalorder %s3942_s23, %s3193_s24  ;;  %p3198_p4 = scmp.lt.u32.totalorder %s3942_s23, %s3996_s5 }
 0x360   : > { %p3199_p7 = scmp.lt.u32.totalorder %s3197_s13, %s3193_s24  ;;  %p3201_p11 = scmp.lt.u32.totalorder %s3193_s24, %s3942_s23 }
 0x361   : > { %p3195_p6 = pnand %p3194_p13, %p4010_p0 }
 0x362   : > { %p3200_p8 = por %p3199_p7, %p3198_p4 }
 0x363   : > { %p3196_p10 = pneg %p3195_p6 }
 0x364   : > { %p3202_p1 = por %p3201_p11, %p3200_p8 }
 0x366   : > { %p3203_p3 = pnand %p3202_p1, %p3196_p10 }
 0x368   : > { %3206 = shalt.err (!%p3203_p3)
}
 0x369   : > { %s3259_s14 = smov 256   ;;  %s3260_s30 = smov 16  }
 0x36a   : > { %2790 = dma.vmem_to_hbm [thread:$0]  (%p4010_p0), %s3944_s15, 8192, %s3942_s23, %s2362_s22, %s3259_s14, %s3259_s14, %s3260_s30  }
 0x36b PF: > { %s2391_s11 = sand.u32 1, %s3237_s18   ;;  %p4011_p5 = scmp.ne.s32.totalorder %s4001_s25, 0 }
 0x36c   : > { %p4012_p9 = scmp.ge.s32.totalorder %s3249_s21, 2  ;;  %s2392_s7 = scalar_lea.sflag [#allocation4], %s2391_s11 }
 0x36e   : > { %p2804_p12 = pnand %p4012_p9, %p4011_p5 }
 0x370   : > { %3232 = dma.done.wait (!%p2804_p12), %s2392_s7, 8192  }
 0x371   : > { %3234 = vsyncadd (!%p2804_p12), %s2392_s7, 4294959104  ;;  %p19_p2 = scmp.ge.s32.totalorder %s3404_s16, 4   ;;  %s4013_s18 = smov %s3241_s19 }
 0x372   : > { %s4014_s19 = smov %s3245_s20  ;;  %s4015_s20 = smov %s3413_s27 }
 0x373   : > { %s4016_s21 = smov %s3404_s16  ;;  %21 = sbr.rel (!%p19_p2) target bundleno = 6 (0x6), region = 93 }
 0x37a   :  { %2397 = vsyncpa [#allocation3], 1 }
 0x37b   :  { %2399 = vsyncpa [#allocation3 + $0x1], 1 }
 0x37c   :  { %2400 = vsyncpa [#allocation6], 1 }
 0x37d   :  { %2401 = vsyncpa [#allocation4], 1 }
 0x37e   :  { %2403 = vsyncpa [#allocation4 + $0x1], 1 }

// kernel: tpu_custom_call.1
= control target key start
LH: loop header
LB: loop body
LE: loop exit
PB: predicated region body
PF: predicated region fallthrough
CT: control target
= control target key end

     0   :  { %10 = vsyncpa [#allocation3], 0  ;;  %s3991_s0 = inlined_call_operand.hbm [shape: bf16[512,256], index: 0, kind: input, shape index: {}]   ;;  %s3992_s1 = inlined_call_operand.hbm [shape: bf16[256,512], index: 1, kind: input, shape index: {}]   ;;  %s3993_s2 = inlined_call_operand.vmem [shape: f32[1,512], index: 2, kind: input, shape index: {}]   ;;  %s3994_s3 = inlined_call_operand.hbm [shape: bf16[512,256], index: 3, kind: input, shape index: {}]   ;;  %s3995_s4 = inlined_call_operand.vmem [shape: f32[1,256], index: 4, kind: input, shape index: {}]   ;;  %s3996_s5 = inlined_call_operand.hbm [shape: f32[512,256], index: 5, kind: output, shape index: {}]  }
   0x1   :  { %12 = vsyncpa [#allocation3 + $0x1], 0 }
   0x2   :  { %13 = vsyncpa [#allocation6], 0 }
   0x3   :  { %14 = vsyncpa [#allocation4], 0 }
   0x4   :  { %16 = vsyncpa [#allocation4 + $0x1], 0  ;;  %s3291_s18 = smov 0   ;;  %s3293_s19 = smov 0  }
   0x5   :  { %s3295_s20 = smov 0   ;;  %s3297_s21 = smov 0  }
   0x6 LB: > { %s3312_s22 = sadd.s32 4294967295, %s3249_s21   ;;  %s2468_s23 = sadd.s32 4294967294, %s3249_s21   ;;  %s3249_s21 = sphi %s3297_s21, %s4016_s21   ;;  %s3245_s20 = sphi %s3295_s20, %s4015_s20   ;;  %s3241_s19 = sphi %s3293_s19, %s4014_s19   ;;  %s3237_s18 = sphi %s3291_s18, %s4013_s18  }
   0x7   : > { %p42_p0 = scmp.ne.s32.totalorder %s3241_s19, %s3237_s18  ;;  %p3997_p1 = scmp.eq.s32.totalorder %s3312_s22, 0 }
   0x8   : > { %p156_p3 = scmp.eq.s32.totalorder %s2468_s23, 1  ;;  %p2469_p5 = scmp.ge.s32.totalorder %s3249_s21, 1 }
   0x9   : > { %p3321_p4 = por %p3997_p1, %p42_p0  ;;  %p163_p7 = scmp.lt.s32.totalorder %s3249_s21, 3 }
   0xa   : > { %p3326_p6 = por %p156_p3, %p42_p0  ;;  %s3251_s27 = smov [#allocation5]  }
   0xb   : > { %s4000_s24 = scalar_select %p3321_p4, 1, 0 }
   0xc   : > { %s4001_s25 = scalar_select %p3326_p6, 1, 0 }
   0xd   : > { %p3331_p8 = pnand %p2469_p5, %p163_p7  ;;  %s175_s28 = sshll.u32 %s3251_s27, 4  ;;  %s3335_s28 = int_to_ptr.vmem [resolvable:$true] %s175_s28 }
   0xe   : > { %s3252_s30 = smov [#allocation7]   ;;  %s3093_s9 = scalar_lea.hbm %s3992_s1, 8192 }
   0xf   : > { %p2792_p9 = pneg %p3331_p8  ;;  %s191_s6 = sshll.u32 %s3252_s30, 4  ;;  %s3346_s6 = int_to_ptr.vmem [resolvable:$true] %s191_s6 }
  0x10   : > { %p3094_p12 = scmp.ne.s32.totalorder %s3992_s1, %s3093_s9  ;;  %p3100_p5 = scmp.lt.u32.totalorder %s3093_s9, %s3992_s1 }
  0x11   : > { %p3342_p11 = pnand %p2792_p9, %p3997_p1 }
  0x13   : > { %p3095_p13 = pneg %p3342_p11 }
  0x15   : > { %p3096_p0 = pnand %p3095_p13, %p3094_p12 }
  0x17   : > { %p3097_p3 = pneg %p3096_p0 }
  0x19   : > { %p3102_p7 = pnand %p3100_p5, %p3097_p3 }
  0x1b   : > { %3105 = shalt.err (!%p3102_p7)
}
  0x1c   : > { %s3106_s14 = scalar_lea.vmem %s3335_s28, 8192  ;;  %p3114_p2 = scmp.lt.s32.totalorder %s3335_s28, %s3335_s28 }
  0x1d   : > { %p3107_p9 = scmp.ne.s32.totalorder %s3335_s28, %s3106_s14  ;;  %p3115_p12 = scmp.lt.s32.totalorder %s3106_s14, %s3106_s14 }
  0x1f   : > { %p3109_p10 = pnand %p3107_p9, %p3095_p13  ;;  %p3116_p0 = por %p3115_p12, %p3114_p2 }
  0x21   : > { %p3110_p1 = pneg %p3109_p10 }
  0x23   : > { %p3117_p6 = pnand %p3116_p0, %p3110_p1 }
  0x25   : > { %3120 = shalt.err (!%p3117_p6)
}
  0x26   : > { %s3253_s15 = smov 256   ;;  %s3254_s16 = smov 16  }
  0x27   : > { %2795 = dma.hbm_to_vmem [thread:$0]  (!%p3342_p11), %s3992_s1, 8192, %s3335_s28, [#allocation6], %s3253_s15, %s3253_s15, %s3254_s16  }
  0x28   : > { %s3121_s7 = scalar_lea.hbm %s3994_s3, 8192 }
  0x29   : > { %p3122_p2 = scmp.ne.s32.totalorder %s3994_s3, %s3121_s7  ;;  %p3128_p10 = scmp.lt.u32.totalorder %s3121_s7, %s3994_s3 }
  0x2b   : > { %p3124_p1 = pnand %p3122_p2, %p3095_p13 }
  0x2d   : > { %p3125_p6 = pneg %p3124_p1 }
  0x2f   : > { %p3130_p3 = pnand %p3128_p10, %p3125_p6 }
  0x31   : > { %3133 = shalt.err (!%p3130_p3)
}
  0x32   : > { %s3134_s28 = scalar_lea.vmem %s3346_s6, 8192  ;;  %p3142_p12 = scmp.lt.s32.totalorder %s3346_s6, %s3346_s6 }
  0x33   : > { %p3135_p5 = scmp.ne.s32.totalorder %s3346_s6, %s3134_s28  ;;  %p3143_p0 = scmp.lt.s32.totalorder %s3134_s28, %s3134_s28 }
  0x35   : > { %p3137_p7 = pnand %p3135_p5, %p3095_p13  ;;  %p3144_p2 = por %p3143_p0, %p3142_p12 }
  0x37   : > { %p3138_p9 = pneg %p3137_p7 }
  0x39   : > { %p3145_p1 = pnand %p3144_p2, %p3138_p9 }
  0x3b   : > { %3148 = shalt.err (!%p3145_p1)
}
  0x3c   : > { %s3255_s12 = smov 128   ;;  %s3256_s13 = smov 8  }
  0x3d   : > { %2798 = dma.hbm_to_vmem [thread:$0]  (!%p3342_p11), %s3994_s3, 8192, %s3346_s6, [#allocation6], %s3255_s12, %s3255_s12, %s3256_s13  }
  0x3e   : > { %s3404_s16 = sadd.s32 1, %s3249_s21   ;;  %s29_s23 = sadd.s32 1, %s3245_s20 }
  0x3f   : > { %s26_s17 = ssub.s32 %s3249_s21, %s3404_s16  ;;  %p36_p6 = scmp.ne.s32.totalorder %s3245_s20, %s3241_s19 }
  0x40   : > { %p27_p13 = scmp.eq.s32.totalorder %s26_s17, 0  ;;  %p37_p10 = scmp.eq.s32.totalorder %s3249_s21, 0 }
  0x41   : > { %p4004_p5 = scmp.eq.s32.totalorder %s3312_s22, 1  ;;  %p2809_p9 = scmp.lt.s32.totalorder %s3249_s21, 2 }
  0x42   : > { %s3413_s27 = scalar_select %p27_p13, %s3245_s20, %s29_s23  }
  0x43   : > { %p38_p3 = por %p37_p10, %p36_p6  ;;  %p3417_p7 = por %p4004_p5, %p36_p6 }
  0x44   : > { %s208_s30 = sand.u32 1, %s3245_s20   ;;  %s2649_s6 = sshll.u32 %s3249_s21, 12 }
  0x45   : > { %s4005_s29 = scalar_select %p3417_p7, 1, 0 }
  0x46   : > { %s2473_s7 = sshll.u32 %s208_s30, 8  ;;  %s3427_s10 = scalar_lea.hbm %s3991_s0, %s2649_s6 }
  0x47   : > { %s212_s11 = scalar_lea.vmem [#allocation2], %s2473_s7  ;;  %p3431_p11 = pnand %p2809_p9, %p38_p3 }
  0x48   : > { %s220_s28 = sshll.u32 %s212_s11, 4  ;;  %s3435_s15 = scalar_lea.sflag [#allocation3], %s208_s30  ;;  %s3429_s28 = int_to_ptr.vmem [resolvable:$true] %s220_s28 }
  0x49   : > { %s3149_s17 = scalar_lea.hbm %s3427_s10, 4096  ;;  %p3151_p0 = pneg %p3431_p11 }
  0x4a   : > { %p3150_p12 = scmp.ne.s32.totalorder %s3427_s10, %s3149_s17  ;;  %s3154_s6 = scalar_lea.hbm %s3991_s0, 8192 }
  0x4b   : > { %p3155_p13 = scmp.lt.u32.totalorder %s3427_s10, %s3991_s0  ;;  %p3156_p6 = scmp.lt.u32.totalorder %s3154_s6, %s3149_s17 }
  0x4c   : > { %p3152_p2 = pnand %p3151_p0, %p3150_p12  ;;  %p3158_p3 = scmp.lt.u32.totalorder %s3149_s17, %s3427_s10 }
  0x4d   : > { %p3157_p10 = por %p3156_p6, %p3155_p13 }
  0x4e   : > { %p3153_p1 = pneg %p3152_p2 }
  0x4f   : > { %p3159_p5 = por %p3158_p3, %p3157_p10 }
  0x51   : > { %p3160_p9 = pnand %p3159_p5, %p3153_p1 }
  0x53   : > { %3163 = shalt.err (!%p3160_p9)
}
  0x54   : > { %s3164_s30 = scalar_lea.vmem %s3429_s28, 4096  ;;  %s3257_s11 = smov [#allocation2]  }
  0x55   : > { %p3165_p12 = scmp.ne.s32.totalorder %s3429_s28, %s3164_s30  ;;  %s3169_s23 = sshll.u32 %s3257_s11, 4  ;;  %s3170_s23 = int_to_ptr.vmem [resolvable:$false] %s3169_s23 }
  0x56   : > { %s3171_s7 = scalar_lea.vmem %s3170_s23, 8192  ;;  %p3172_p4 = scmp.lt.s32.totalorder %s3429_s28, %s3170_s23 }
  0x57   : > { %p3167_p2 = pnand %p3165_p12, %p3151_p0  ;;  %p3173_p13 = scmp.lt.s32.totalorder %s3171_s7, %s3164_s30 }
  0x59   : > { %p3168_p7 = pneg %p3167_p2  ;;  %p3174_p6 = por %p3173_p13, %p3172_p4 }
  0x5b   : > { %p3175_p10 = pnand %p3174_p6, %p3168_p7 }
  0x5d   : > { %3178 = shalt.err (!%p3175_p10)
}
  0x5e   : > { %2802 = dma.hbm_to_vmem [thread:$0]  (!%p3431_p11), %s3427_s10, 4096, %s3429_s28, %s3435_s15, %s3255_s12, %s3255_s12, %s3256_s13  }
  0x5f   : > { %232 = sbr.rel (%p3331_p8) target bundleno = 875 (0x36b), region = 40  ;;  %s3469_s17 = sand.u32 (!%p3331_p8), 1, %s3241_s19  }
  0x60   : > { %s2478_s6 = sshll.u32 (!%p3331_p8), %s3469_s17, 8  ;;  %s235_s8 = scalar_lea.sflag (!%p3331_p8), [#allocation3], %s3469_s17 }
  0x61   : > { %s3473_s9 = scalar_lea.vmem (!%p3331_p8), [#allocation2], %s2478_s6  ;;  %p4007_p4 = scmp.ne.s32.totalorder (!%p3331_p8), %s4000_s24, 0 }
  0x66   : > { %3224 = dma.done.wait (%p4007_p4), %s235_s8, 4096  }
  0x67   : > { %3226 = vsyncadd (%p4007_p4), %s235_s8, 4294963200  ;;  %p4008_p7 = scmp.eq.s32.totalorder %s3312_s22, 0 }
  0x69   : > { %3228 = dma.done.wait (%p4008_p7), [#allocation6], 16384   ;;  %p4009_p8 = pmov %p4008_p7 }
  0x6a   : > { %v2853_v0 = vld [vmem:[#allocation5 + $0x4] ss:$16 sps:$4 sm:$0xff]   ;;  %v2855_v1 = vld [vmem:[#allocation5] ss:$16 sps:$4 sm:$0xff]   ;;  %v2906_v33 = vld [vmem:[#allocation5 + $0xc] ss:$16 sps:$4 sm:$0xff]  }
  0x6b   : > { %3230 = vsyncadd (%p4009_p8), [#allocation6], 4294950912  ;;  %873 = vmatprep.subr.bf16.mxu1 %v2853_v0  ;;  %v2856_v2 = vld [vmem:[#allocation5 + $0x24] ss:$16 sps:$4 sm:$0xff]   ;;  %v2858_v3 = vld [vmem:[#allocation5 + $0x20] ss:$16 sps:$4 sm:$0xff]  }
  0x6c   : > { %874 = vmatpush1.bf16.msra.mxu1 %v2855_v1  ;;  %v2859_v4 = vld [vmem:[#allocation5 + $0x44] ss:$16 sps:$4 sm:$0xff]   ;;  %v2861_v5 = vld [vmem:[#allocation5 + $0x40] ss:$16 sps:$4 sm:$0xff]   ;;  %v2904_v35 = vld [vmem:[#allocation5 + $0x8] ss:$16 sps:$4 sm:$0xff]  }
  0x6d   : > { %875 = vmatprep.subr.bf16.mxu1 %v2856_v2  ;;  %v2862_v6 = vld [vmem:[#allocation5 + $0x64] ss:$16 sps:$4 sm:$0xff]   ;;  %v2864_v7 = vld [vmem:[#allocation5 + $0x60] ss:$16 sps:$4 sm:$0xff]   ;;  %v2912_v37 = vld [vmem:[#allocation5 + $0x2c] ss:$16 sps:$4 sm:$0xff]  }
  0x6e   : > { %v2865_v8 = vld [vmem:[#allocation5 + $0x84] ss:$16 sps:$4 sm:$0xff]   ;;  %v2867_v9 = vld [vmem:[#allocation5 + $0x80] ss:$16 sps:$4 sm:$0xff]   ;;  %v2910_v38 = vld [vmem:[#allocation5 + $0x28] ss:$16 sps:$4 sm:$0xff]  }
  0x6f   : > { %v2868_v10 = vld [vmem:[#allocation5 + $0xa4] ss:$16 sps:$4 sm:$0xff]   ;;  %v2870_v11 = vld [vmem:[#allocation5 + $0xa0] ss:$16 sps:$4 sm:$0xff]   ;;  %v2918_v39 = vld [vmem:[#allocation5 + $0x4c] ss:$16 sps:$4 sm:$0xff]  }
  0x70   : > { %876 = vmatpush1.bf16.msra.mxu1 %v2858_v3  ;;  %v2871_v12 = vld [vmem:[#allocation5 + $0xc4] ss:$16 sps:$4 sm:$0xff]   ;;  %v2873_v14 = vld [vmem:[#allocation5 + $0xc0] ss:$16 sps:$4 sm:$0xff]   ;;  %v2916_v42 = vld [vmem:[#allocation5 + $0x48] ss:$16 sps:$4 sm:$0xff]  }
  0x71   : > { %877 = vmatprep.subr.bf16.mxu1 %v2859_v4  ;;  %v3484_v13 = vld [vmem:[%s3473_s9 + $0x4] ss:$8 sps:$4 sm:$0xff]   ;;  %v2876_v16 = vld [vmem:[#allocation5 + $0xe0] ss:$16 sps:$4 sm:$0xff]   ;;  %v3491_v36 = vld [vmem:[%s3473_s9 + $0x14] ss:$8 sps:$4 sm:$0xff]  }
  0x72   : > { %v2874_v15 = vld [vmem:[#allocation5 + $0xe4] ss:$16 sps:$4 sm:$0xff]   ;;  %905 = vmatprep.mubr.bf16.mxu1 %v3484_v13  ;;  %v2879_v18 = vld [vmem:[#allocation5 + $0x100] ss:$16 sps:$4 sm:$0xff]   ;;  %v2924_v43 = vld [vmem:[#allocation5 + $0x6c] ss:$16 sps:$4 sm:$0xff]  }
  0x73   : > { %v2877_v17 = vld [vmem:[#allocation5 + $0x104] ss:$16 sps:$4 sm:$0xff]   ;;  %v2882_v20 = vld [vmem:[#allocation5 + $0x120] ss:$16 sps:$4 sm:$0xff]   ;;  %v2922_v44 = vld [vmem:[#allocation5 + $0x68] ss:$16 sps:$4 sm:$0xff]  }
  0x74   : > { %878 = vmatpush1.bf16.msra.mxu1 %v2861_v5  ;;  %v2880_v19 = vld [vmem:[#allocation5 + $0x124] ss:$16 sps:$4 sm:$0xff]   ;;  %v2885_v22 = vld [vmem:[#allocation5 + $0x140] ss:$16 sps:$4 sm:$0xff]   ;;  %v2930_v45 = vld [vmem:[#allocation5 + $0x8c] ss:$16 sps:$4 sm:$0xff]  }
  0x75   : > { %879 = vmatprep.subr.bf16.mxu1 %v2862_v6  ;;  %v2883_v21 = vld [vmem:[#allocation5 + $0x144] ss:$16 sps:$4 sm:$0xff]   ;;  %v2888_v24 = vld [vmem:[#allocation5 + $0x160] ss:$16 sps:$4 sm:$0xff]   ;;  %v2928_v48 = vld [vmem:[#allocation5 + $0x88] ss:$16 sps:$4 sm:$0xff]  }
  0x76   : > { %v2886_v23 = vld [vmem:[#allocation5 + $0x164] ss:$16 sps:$4 sm:$0xff]   ;;  %v2891_v26 = vld [vmem:[#allocation5 + $0x180] ss:$16 sps:$4 sm:$0xff]   ;;  %v2936_v49 = vld [vmem:[#allocation5 + $0xac] ss:$16 sps:$4 sm:$0xff]  }
  0x77   : > { %v2889_v25 = vld [vmem:[#allocation5 + $0x184] ss:$16 sps:$4 sm:$0xff]   ;;  %v2894_v28 = vld [vmem:[#allocation5 + $0x1a0] ss:$16 sps:$4 sm:$0xff]   ;;  %v2934_v50 = vld [vmem:[#allocation5 + $0xa8] ss:$16 sps:$4 sm:$0xff]  }
  0x78   : > { %880 = vmatpush1.bf16.msra.mxu1 %v2864_v7  ;;  %v2892_v27 = vld [vmem:[#allocation5 + $0x1a4] ss:$16 sps:$4 sm:$0xff]   ;;  %v2897_v30 = vld [vmem:[#allocation5 + $0x1c0] ss:$16 sps:$4 sm:$0xff]   ;;  %v2942_v51 = vld [vmem:[#allocation5 + $0xcc] ss:$16 sps:$4 sm:$0xff]  }
  0x79   : > { %881 = vmatprep.subr.bf16.mxu1 %v2865_v8  ;;  %v2895_v29 = vld [vmem:[#allocation5 + $0x1c4] ss:$16 sps:$4 sm:$0xff]   ;;  %v2900_v32 = vld [vmem:[#allocation5 + $0x1e0] ss:$16 sps:$4 sm:$0xff]   ;;  %v2940_v54 = vld [vmem:[#allocation5 + $0xc8] ss:$16 sps:$4 sm:$0xff]  }
  0x7a   : > { %v2898_v31 = vld [vmem:[#allocation5 + $0x1e4] ss:$16 sps:$4 sm:$0xff]   ;;  %v3488_v34 = vld [vmem:[%s3473_s9] ss:$8 sps:$4 sm:$0xff]   ;;  %v3496_v40 = vld [vmem:[%s3473_s9 + $0x10] ss:$8 sps:$4 sm:$0xff]  }
  0x7b   : > { %v3499_v41 = vld [vmem:[%s3473_s9 + $0x24] ss:$8 sps:$4 sm:$0xff]   ;;  %v3504_v46 = vld [vmem:[%s3473_s9 + $0x20] ss:$8 sps:$4 sm:$0xff]   ;;  %v3507_v47 = vld [vmem:[%s3473_s9 + $0x34] ss:$8 sps:$4 sm:$0xff]  }
  0x7c   : > { %882 = vmatpush1.bf16.msra.mxu1 %v2867_v9  ;;  %v3512_v52 = vld [vmem:[%s3473_s9 + $0x30] ss:$8 sps:$4 sm:$0xff]   ;;  %v3515_v53 = vld [vmem:[%s3473_s9 + $0x44] ss:$8 sps:$4 sm:$0xff]   ;;  %v2999_v58 = vld [vmem:[#allocation7] ss:$8 sps:$4 sm:$0xff]  }
  0x7d   : > { %883 = vmatprep.subr.bf16.mxu1 %v2868_v10  ;;  %v2948_v55 = vld [vmem:[#allocation5 + $0xec] ss:$16 sps:$4 sm:$0xff]   ;;  %v2946_v57 = vld [vmem:[#allocation5 + $0xe8] ss:$16 sps:$4 sm:$0xff]   ;;  %s2481_s10 = sshll.u32 %s3469_s17, 9  ;;  %s2651_s14 = sshll.u32 %s3312_s22, 13 }
  0x7e   : > { %v2997_v56 = vld [vmem:[#allocation7 + $0x4] ss:$8 sps:$4 sm:$0xff]   ;;  %v3520_v60 = vld [vmem:[%s3473_s9 + $0x40] ss:$8 sps:$4 sm:$0xff]   ;;  %v3523_v61 = vld [vmem:[%s3473_s9 + $0x54] ss:$8 sps:$4 sm:$0xff]   ;;  %s3942_s23 = scalar_lea.hbm %s3996_s5, %s2651_s14 }
  0x7f   : > { %v2954_v59 = vld [vmem:[#allocation5 + $0x10c] ss:$16 sps:$4 sm:$0xff]   ;;  %1847 = vmatprep.subr.bf16.mxu0 %v2997_v56  ;;  %v2952_v62 = vld [vmem:[#allocation5 + $0x108] ss:$16 sps:$4 sm:$0xff]   ;;  %s3814_s28 = scalar_lea.vmem [#allocation8], %s2481_s10  ;;  %s2362_s22 = scalar_lea.sflag [#allocation4], %s3469_s17 }
  0x80   : > { %884 = vmatpush1.bf16.msra.mxu1 %v2870_v11  ;;  %1848 = vmatpush1.bf16.msra.mxu0 %v2999_v58  ;;  %v2960_v63 = vld [vmem:[#allocation5 + $0x12c] ss:$16 sps:$4 sm:$0xff]   ;;  %v3002_v1 = vld [vmem:[#allocation7 + $0x10] ss:$8 sps:$4 sm:$0xff]   ;;  %v3005_v5 = vld [vmem:[#allocation7 + $0x20] ss:$8 sps:$4 sm:$0xff]  }
  0x81   : > { %885 = vmatprep.subr.bf16.mxu1 %v2871_v12  ;;  %v3000_v0 = vld [vmem:[#allocation7 + $0x14] ss:$8 sps:$4 sm:$0xff]   ;;  %v3003_v2 = vld [vmem:[#allocation7 + $0x24] ss:$8 sps:$4 sm:$0xff]   ;;  %v2958_v3 = vld [vmem:[#allocation5 + $0x128] ss:$16 sps:$4 sm:$0xff]  }
  0x82   : > { %v2966_v4 = vld [vmem:[#allocation5 + $0x14c] ss:$16 sps:$4 sm:$0xff]   ;;  %1849 = vmatprep.subr.bf16.mxu0 %v3000_v0  ;;  %v3528_v6 = vld [vmem:[%s3473_s9 + $0x50] ss:$8 sps:$4 sm:$0xff]   ;;  %v3568_v56 = vld [vmem:[%s3473_s9 + $0xa0] ss:$8 sps:$4 sm:$0xff]  }
  0x83   : > { %v3531_v7 = vld [vmem:[%s3473_s9 + $0x64] ss:$8 sps:$4 sm:$0xff]   ;;  %v2964_v8 = vld [vmem:[#allocation5 + $0x148] ss:$16 sps:$4 sm:$0xff]   ;;  %v3006_v10 = vld [vmem:[#allocation7 + $0x34] ss:$8 sps:$4 sm:$0xff]  }
  0x84   : > { %886 = vmatpush1.bf16.msra.mxu1 %v2873_v14  ;;  %1850 = vmatpush1.bf16.msra.mxu0 %v3002_v1  ;;  %v2972_v9 = vld [vmem:[#allocation5 + $0x16c] ss:$16 sps:$4 sm:$0xff]   ;;  %v3008_v11 = vld [vmem:[#allocation7 + $0x30] ss:$8 sps:$4 sm:$0xff]   ;;  %v3041_v1 = vld [vmem:[#allocation7 + $0xe0] ss:$8 sps:$4 sm:$0xff]  }
  0x85   : > { %887 = vmatprep.subr.bf16.mxu1 %v2874_v15  ;;  %1851 = vmatprep.subr.bf16.mxu0 %v3003_v2  ;;  %v3009_v12 = vld [vmem:[#allocation7 + $0x44] ss:$8 sps:$4 sm:$0xff]   ;;  %v2970_v14 = vld [vmem:[#allocation5 + $0x168] ss:$16 sps:$4 sm:$0xff]   ;;  %v3036_v58 = vld [vmem:[#allocation7 + $0xd4] ss:$8 sps:$4 sm:$0xff]  }
  0x86   : > { %v2978_v15 = vld [vmem:[#allocation5 + $0x18c] ss:$16 sps:$4 sm:$0xff]   ;;  %s2376_s15 = sshll.u32 %s3814_s28, 4  ;;  %p4010_p0 = scmp.ne.s32.totalorder %s4005_s29, 0  ;;  %s3944_s15 = int_to_ptr.vmem [resolvable:$true] %s2376_s15 }
  0x87   : > { %v3579_v0 = vld [vmem:[%s3473_s9 + $0xc4] ss:$8 sps:$4 sm:$0xff]   ;;  %v3042_v2 = vld [vmem:[#allocation7 + $0xf4] ss:$8 sps:$4 sm:$0xff]   ;;  %s3179_s7 = scalar_lea.vmem %s3944_s15, 8192  ;;  %s3258_s6 = smov [#allocation8]  }
  0x88   : > { %888 = vmatpush1.bf16.msra.mxu1 %v2876_v16  ;;  %1852 = vmatpush1.bf16.msra.mxu0 %v3005_v5  ;;  %v3011_v16 = vld [vmem:[#allocation7 + $0x40] ss:$8 sps:$4 sm:$0xff]   ;;  %v3587_v5 = vld [vmem:[%s3473_s9 + $0xd4] ss:$8 sps:$4 sm:$0xff]   ;;  %p3180_p11 = scmp.ne.s32.totalorder %s3944_s15, %s3179_s7  ;;  %s3183_s8 = sshll.u32 %s3258_s6, 4  ;;  %s3184_s8 = int_to_ptr.vmem [resolvable:$false] %s3183_s8 }
  0x89   : > { %889 = vmatprep.subr.bf16.mxu1 %v2877_v17  ;;  %1853 = vmatprep.subr.bf16.mxu0 %v3006_v10  ;;  %v3536_v17 = vld [vmem:[%s3473_s9 + $0x60] ss:$8 sps:$4 sm:$0xff]   ;;  %v3595_v10 = vld [vmem:[%s3473_s9 + $0xe4] ss:$8 sps:$4 sm:$0xff]   ;;  %p3186_p5 = scmp.lt.s32.totalorder %s3944_s15, %s3184_s8 }
  0x8a   : > { %p3181_p1 = pnand %p3180_p11, %p4010_p0 }
  0x8c   : > { %890 = vmatpush1.bf16.msra.mxu1 %v2879_v18  ;;  %1854 = vmatpush1.bf16.msra.mxu0 %v3008_v11  ;;  %v3539_v18 = vld [vmem:[%s3473_s9 + $0x74] ss:$8 sps:$4 sm:$0xff]   ;;  %v3600_v11 = vld [vmem:[%s3473_s9 + $0xe0] ss:$8 sps:$4 sm:$0xff]   ;;  %p3182_p3 = pneg %p3181_p1 }
  0x8d   : > { %891 = vmatprep.subr.bf16.mxu1 %v2880_v19  ;;  %1855 = vmatprep.subr.bf16.mxu0 %v3009_v12  ;;  %v2976_v19 = vld [vmem:[#allocation5 + $0x188] ss:$16 sps:$4 sm:$0xff]   ;;  %v3603_v12 = vld [vmem:[%s3473_s9 + $0xf4] ss:$8 sps:$4 sm:$0xff]  }
  0x90   : > { %892 = vmatpush1.bf16.msra.mxu1 %v2882_v20  ;;  %v2984_v20 = vld [vmem:[#allocation5 + $0x1ac] ss:$16 sps:$4 sm:$0xff]   ;;  %1856 = vmatpush1.bf16.msra.mxu0 %v3011_v16 }
  0x91   : > { %893 = vmatprep.subr.bf16.mxu1 %v2883_v21  ;;  %v3012_v21 = vld [vmem:[#allocation7 + $0x54] ss:$8 sps:$4 sm:$0xff]  }
  0x92   : > { %1857 = vmatprep.subr.bf16.mxu0 %v3012_v21 }
  0x94   : > { %894 = vmatpush1.bf16.msra.mxu1 %v2885_v22  ;;  %v3014_v22 = vld [vmem:[#allocation7 + $0x50] ss:$8 sps:$4 sm:$0xff]  }
  0x95   : > { %895 = vmatprep.subr.bf16.mxu1 %v2886_v23  ;;  %v3015_v23 = vld [vmem:[#allocation7 + $0x64] ss:$8 sps:$4 sm:$0xff]   ;;  %1858 = vmatpush1.bf16.msra.mxu0 %v3014_v22 }
  0x96   : > { %1859 = vmatprep.subr.bf16.mxu0 %v3015_v23 }
  0x98   : > { %896 = vmatpush1.bf16.msra.mxu1 %v2888_v24  ;;  %v2982_v24 = vld [vmem:[#allocation5 + $0x1a8] ss:$16 sps:$4 sm:$0xff]  }
  0x99   : > { %897 = vmatprep.subr.bf16.mxu1 %v2889_v25  ;;  %v2990_v25 = vld [vmem:[#allocation5 + $0x1cc] ss:$16 sps:$4 sm:$0xff]  }
  0x9c   : > { %898 = vmatpush1.bf16.msra.mxu1 %v2891_v26  ;;  %v3017_v26 = vld [vmem:[#allocation7 + $0x60] ss:$8 sps:$4 sm:$0xff]  }
  0x9d   : > { %899 = vmatprep.subr.bf16.mxu1 %v2892_v27  ;;  %v3544_v27 = vld [vmem:[%s3473_s9 + $0x70] ss:$8 sps:$4 sm:$0xff]   ;;  %1860 = vmatpush1.bf16.msra.mxu0 %v3017_v26 }
  0xa0   : > { %900 = vmatpush1.bf16.msra.mxu1 %v2894_v28  ;;  %v3547_v28 = vld [vmem:[%s3473_s9 + $0x84] ss:$8 sps:$4 sm:$0xff]  }
  0xa1   : > { %901 = vmatprep.subr.bf16.mxu1 %v2895_v29  ;;  %v2988_v29 = vld [vmem:[#allocation5 + $0x1c8] ss:$16 sps:$4 sm:$0xff]  }
  0xa4   : > { %902 = vmatpush1.bf16.msra.mxu1 %v2897_v30  ;;  %v2996_v30 = vld [vmem:[#allocation5 + $0x1ec] ss:$16 sps:$4 sm:$0xff]  }
  0xa5   : > { %903 = vmatprep.subr.bf16.mxu1 %v2898_v31  ;;  %v3018_v31 = vld [vmem:[#allocation7 + $0x74] ss:$8 sps:$4 sm:$0xff]  }
  0xa6   : > { %1861 = vmatprep.subr.bf16.mxu0 %v3018_v31 }
  0xa8   : > { %904 = vmatpush1.bf16.msra.mxu1 %v2900_v32  ;;  %v3020_v32 = vld [vmem:[#allocation7 + $0x70] ss:$8 sps:$4 sm:$0xff]  }
  0xa9   : > { %1066 = vmatprep.subr.bf16.mxu1 %v2906_v33  ;;  %v3021_v33 = vld [vmem:[#allocation7 + $0x84] ss:$8 sps:$4 sm:$0xff]   ;;  %1862 = vmatpush1.bf16.msra.mxu0 %v3020_v32 }
  0xaa   : > { %1863 = vmatprep.subr.bf16.mxu0 %v3021_v33  ;;  %v3048_v33 = vld [vmem:[#allocation7 + $0x110] ss:$8 sps:$4 sm:$0xff]  }
  0xab   : > { %906 = vmatmul.mubr.bf16.vlgmr.msra.gmra.mrb[0].mxu1 %v3488_v34 }
  0xac   : > { %1067 = vmatpush1.bf16.msra.mxu1 %v2904_v35  ;;  %915 = vmatprep.mubr.bf16.mxu1 %v3491_v36  ;;  %v2994_v35 = vld [vmem:[#allocation5 + $0x1e8] ss:$16 sps:$4 sm:$0xff]  }
  0xad   : > { %1068 = vmatprep.subr.bf16.mxu1 %v2912_v37  ;;  %v3023_v37 = vld [vmem:[#allocation7 + $0x80] ss:$8 sps:$4 sm:$0xff]  }
  0xae   : > { %1864 = vmatpush1.bf16.msra.mxu0 %v3023_v37 }
  0xb0   : > { %1069 = vmatpush1.bf16.msra.mxu1 %v2910_v38  ;;  %v3552_v38 = vld [vmem:[%s3473_s9 + $0x80] ss:$8 sps:$4 sm:$0xff]  }
  0xb1   : > { %1070 = vmatprep.subr.bf16.mxu1 %v2918_v39  ;;  %v3555_v39 = vld [vmem:[%s3473_s9 + $0x94] ss:$8 sps:$4 sm:$0xff]  }
  0xb3   : > { %916 = vmatmul.mubr.bf16.gmra.mrb[4].mxu1 %v3496_v40 }
  0xb4   : > { %925 = vmatprep.mubr.bf16.mxu1 %v3499_v41  ;;  %1071 = vmatpush1.bf16.msra.mxu1 %v2916_v42  ;;  %v3024_v42 = vld [vmem:[#allocation7 + $0x94] ss:$8 sps:$4 sm:$0xff]  }
  0xb5   : > { %1072 = vmatprep.subr.bf16.mxu1 %v2924_v43  ;;  %v3026_v43 = vld [vmem:[#allocation7 + $0x90] ss:$8 sps:$4 sm:$0xff]   ;;  %1865 = vmatprep.subr.bf16.mxu0 %v3024_v42 }
  0xb6   : > { %1866 = vmatpush1.bf16.msra.mxu0 %v3026_v43 }
  0xb8   : > { %1073 = vmatpush1.bf16.msra.mxu1 %v2922_v44  ;;  %v3027_v44 = vld [vmem:[#allocation7 + $0xa4] ss:$8 sps:$4 sm:$0xff]  }
  0xb9   : > { %1074 = vmatprep.subr.bf16.mxu1 %v2930_v45  ;;  %v3029_v45 = vld [vmem:[#allocation7 + $0xa0] ss:$8 sps:$4 sm:$0xff]   ;;  %1867 = vmatprep.subr.bf16.mxu0 %v3027_v44 }
  0xba   : > { %1868 = vmatpush1.bf16.msra.mxu0 %v3029_v45 }
  0xbb   : > { %926 = vmatmul.mubr.bf16.gmra.mrb[8].mxu1 %v3504_v46 }
  0xbc   : > { %935 = vmatprep.mubr.bf16.mxu1 %v3507_v47  ;;  %1075 = vmatpush1.bf16.msra.mxu1 %v2928_v48  ;;  %v3560_v48 = vld [vmem:[%s3473_s9 + $0x90] ss:$8 sps:$4 sm:$0xff]  }
  0xbd   : > { %1076 = vmatprep.subr.bf16.mxu1 %v2936_v49  ;;  %v3563_v49 = vld [vmem:[%s3473_s9 + $0xa4] ss:$8 sps:$4 sm:$0xff]  }
  0xc0   : > { %1077 = vmatpush1.bf16.msra.mxu1 %v2934_v50  ;;  %v3030_v50 = vld [vmem:[#allocation7 + $0xb4] ss:$8 sps:$4 sm:$0xff]  }
  0xc1   : > { %1078 = vmatprep.subr.bf16.mxu1 %v2942_v51  ;;  %v3032_v51 = vld [vmem:[#allocation7 + $0xb0] ss:$8 sps:$4 sm:$0xff]   ;;  %1869 = vmatprep.subr.bf16.mxu0 %v3030_v50 }
  0xc2   : > { %1870 = vmatpush1.bf16.msra.mxu0 %v3032_v51  ;;  %v3056_v51 = vld [vmem:[#allocation7 + $0x134] ss:$8 sps:$4 sm:$0xff]  }
  0xc3   : > { %936 = vmatmul.mubr.bf16.gmra.mrb[12].mxu1 %v3512_v52 }
  0xc4   : > { %945 = vmatprep.mubr.bf16.mxu1 %v3515_v53  ;;  %1079 = vmatpush1.bf16.msra.mxu1 %v2940_v54  ;;  %v3033_v54 = vld [vmem:[#allocation7 + $0xc4] ss:$8 sps:$4 sm:$0xff]  }
  0xc5   : > { %1080 = vmatprep.subr.bf16.mxu1 %v2948_v55  ;;  %v3035_v55 = vld [vmem:[#allocation7 + $0xc0] ss:$8 sps:$4 sm:$0xff]   ;;  %1871 = vmatprep.subr.bf16.mxu0 %v3033_v54 }
  0xc6   : > { %1872 = vmatpush1.bf16.msra.mxu0 %v3035_v55 }
  0xc7   : > { %1873 = vmatprep.subr.bf16.mxu0 %v3036_v58 }
  0xc8   : > { %1081 = vmatpush1.bf16.msra.mxu1 %v2946_v57  ;;  %v3571_v57 = vld [vmem:[%s3473_s9 + $0xb4] ss:$8 sps:$4 sm:$0xff]  }
  0xc9   : > { %1082 = vmatprep.subr.bf16.mxu1 %v2954_v59  ;;  %v3038_v59 = vld [vmem:[#allocation7 + $0xd0] ss:$8 sps:$4 sm:$0xff]  }
  0xca   : > { %1874 = vmatpush1.bf16.msra.mxu0 %v3038_v59  ;;  %v3054_v59 = vld [vmem:[#allocation7 + $0x130] ss:$8 sps:$4 sm:$0xff]  }
  0xcb   : > { %946 = vmatmul.mubr.bf16.gmra.mrb[16].mxu1 %v3520_v60 }
  0xcc   : > { %955 = vmatprep.mubr.bf16.mxu1 %v3523_v61  ;;  %1083 = vmatpush1.bf16.msra.mxu1 %v2952_v62  ;;  %v3576_v62 = vld [vmem:[%s3473_s9 + $0xb0] ss:$8 sps:$4 sm:$0xff]  }
  0xcd   : > { %1084 = vmatprep.subr.bf16.mxu1 %v2960_v63  ;;  %v3039_v63 = vld [vmem:[#allocation7 + $0xe4] ss:$8 sps:$4 sm:$0xff]  }
  0xce   : > { %1875 = vmatprep.subr.bf16.mxu0 %v3039_v63 }
  0xcf   : > { %1876 = vmatpush1.bf16.msra.mxu0 %v3041_v1 }
  0xd0   : > { %1085 = vmatpush1.bf16.msra.mxu1 %v2958_v3  ;;  %v3044_v3 = vld [vmem:[#allocation7 + $0xf0] ss:$8 sps:$4 sm:$0xff]   ;;  %1877 = vmatprep.subr.bf16.mxu0 %v3042_v2 }
  0xd1   : > { %1086 = vmatprep.subr.bf16.mxu1 %v2966_v4  ;;  %v3584_v4 = vld [vmem:[%s3473_s9 + $0xc0] ss:$8 sps:$4 sm:$0xff]  }
  0xd3   : > { %956 = vmatmul.mubr.bf16.gmra.mrb[20].mxu1 %v3528_v6  ;;  %1878 = vmatpush1.bf16.msra.mxu0 %v3044_v3 }
  0xd4   : > { %965 = vmatprep.mubr.bf16.mxu1 %v3531_v7  ;;  %1087 = vmatpush1.bf16.msra.mxu1 %v2964_v8  ;;  %v3047_v8 = vld [vmem:[#allocation7 + $0x104] ss:$8 sps:$4 sm:$0xff]  }
  0xd5   : > { %1088 = vmatprep.subr.bf16.mxu1 %v2972_v9  ;;  %v3592_v9 = vld [vmem:[%s3473_s9 + $0xd0] ss:$8 sps:$4 sm:$0xff]   ;;  %2040 = vmatprep.subr.bf16.mxu0 %v3047_v8  ;;  %v3057_v8 = vld [vmem:[#allocation7 + $0x140] ss:$8 sps:$4 sm:$0xff]  }
  0xd8   : > { %1089 = vmatpush1.bf16.msra.mxu1 %v2970_v14  ;;  %v3608_v14 = vld [vmem:[%s3473_s9 + $0xf0] ss:$8 sps:$4 sm:$0xff]   ;;  %s3185_s9 = scalar_lea.vmem %s3184_s8, 16384 }
  0xd9   : > { %1090 = vmatprep.subr.bf16.mxu1 %v2978_v15  ;;  %p3187_p9 = scmp.lt.s32.totalorder %s3185_s9, %s3179_s7 }
  0xdb   : > { %966 = vmatmul.mubr.bf16.gmra.mrb[24].mxu1 %v3536_v17  ;;  %p3188_p12 = por %p3187_p9, %p3186_p5 }
  0xdc   : > { %975 = vmatprep.mubr.bf16.mxu1 %v3539_v18  ;;  %1091 = vmatpush1.bf16.msra.mxu1 %v2976_v19 }
  0xdd   : > { %1092 = vmatprep.subr.bf16.mxu1 %v2984_v20  ;;  %p3189_p2 = pnand %p3188_p12, %p3182_p3 }
  0xe0   : > { %1093 = vmatpush1.bf16.msra.mxu1 %v2982_v24  ;;  %v3045_v24 = vld [vmem:[#allocation7 + $0x100] ss:$8 sps:$4 sm:$0xff]  }
  0xe1   : > { %1094 = vmatprep.subr.bf16.mxu1 %v2990_v25 }
  0xe3   : > { %976 = vmatmul.mubr.bf16.gmra.mrb[28].mxu1 %v3544_v27 }
  0xe4   : > { %985 = vmatprep.mubr.bf16.mxu1 %v3547_v28  ;;  %1095 = vmatpush1.bf16.msra.mxu1 %v2988_v29 }
  0xe5   : > { %1096 = vmatprep.subr.bf16.mxu1 %v2996_v30 }
  0xe8   : > { %1097 = vmatpush1.bf16.msra.mxu1 %v2994_v35 }
  0xeb   : > { %986 = vmatmul.mubr.bf16.gmra.mrb[32].mxu1 %v3552_v38 }
  0xec   : > { %995 = vmatprep.mubr.bf16.mxu1 %v3555_v39 }
  0xf3   : > { %996 = vmatmul.mubr.bf16.gmra.mrb[36].mxu1 %v3560_v48 }
  0xf4   : > { %1005 = vmatprep.mubr.bf16.mxu1 %v3563_v49 }
  0xfb   : > { %1006 = vmatmul.mubr.bf16.gmra.mrb[40].mxu1 %v3568_v56 }
  0xfc   : > { %1015 = vmatprep.mubr.bf16.mxu1 %v3571_v57 }
 0x103   : > { %1016 = vmatmul.mubr.bf16.gmra.mrb[44].mxu1 %v3576_v62 }
 0x104   : > { %1025 = vmatprep.mubr.bf16.mxu1 %v3579_v0 }
 0x10b   : > { %1026 = vmatmul.mubr.bf16.gmra.mrb[48].mxu1 %v3584_v4 }
 0x10c   : > { %1035 = vmatprep.mubr.bf16.mxu1 %v3587_v5 }
 0x113   : > { %1036 = vmatmul.mubr.bf16.gmra.mrb[52].mxu1 %v3592_v9 }
 0x114   : > { %1045 = vmatprep.mubr.bf16.mxu1 %v3595_v10 }
 0x11b   : > { %1046 = vmatmul.mubr.bf16.gmra.mrb[56].mxu1 %v3600_v11 }
 0x11c   : > { %1055 = vmatprep.mubr.bf16.mxu1 %v3603_v12 }
 0x123   : > { %1056 = vmatmul.mubr.bf16.gmra.mrb[60].mxu1 %v3608_v14 }
 0x124   : > { %1098 = vmatprep.mubr.bf16.mxu1 %v3484_v13  ;;  %v373_v13 = vlaneseq }
 0x12b   : > { %1099 = vmatmul.mubr.bf16.vlgmr.msra.gmra.mrb[64].mxu1 %v3488_v34  ;;  %v3631_v34 = vshrl.u32 %v373_v13, 7 }
 0x12c   : > { %1108 = vmatprep.mubr.bf16.mxu1 %v3491_v36 }
 0x12d   : > { %v375_v36 = vsub.s32 0, %v3631_v34 }
 0x133   : > { %1109 = vmatmul.mubr.bf16.gmra.mrb[68].mxu1 %v3496_v40  ;;  %v3638_v40 = vld [vmem:[%s3993_s2] sm:$0xf] }
 0x134   : > { %1118 = vmatprep.mubr.bf16.mxu1 %v3499_v41  ;;  %v379_v41 = vsub.s32 1, %v3631_v34 }
 0x13b   : > { %1119 = vmatmul.mubr.bf16.gmra.mrb[72].mxu1 %v3504_v46  ;;  %v3645_v46 = vrot.slane %v3638_v40, %v375_v36 }
 0x13c   : > { %1128 = vmatprep.mubr.bf16.mxu1 %v3507_v47  ;;  %v3650_v47 = vrot.slane %v3638_v40, %v379_v41 }
 0x143   : > { %1129 = vmatmul.mubr.bf16.gmra.mrb[76].mxu1 %v3512_v52 }
 0x144   : > { %1138 = vmatprep.mubr.bf16.mxu1 %v3515_v53 }
 0x14b   : > { %1139 = vmatmul.mubr.bf16.gmra.mrb[80].mxu1 %v3520_v60 }
 0x14c   : > { %1148 = vmatprep.mubr.bf16.mxu1 %v3523_v61 }
 0x153   : > { %1149 = vmatmul.mubr.bf16.gmra.mrb[84].mxu1 %v3528_v6 }
 0x154   : > { %1158 = vmatprep.mubr.bf16.mxu1 %v3531_v7 }
 0x15b   : > { %1159 = vmatmul.mubr.bf16.gmra.mrb[88].mxu1 %v3536_v17 }
 0x15c   : > { %1168 = vmatprep.mubr.bf16.mxu1 %v3539_v18 }
 0x163   : > { %1169 = vmatmul.mubr.bf16.gmra.mrb[92].mxu1 %v3544_v27  ;;  %v3050_v27 = vld [vmem:[#allocation7 + $0x114] ss:$8 sps:$4 sm:$0xff]  }
 0x164   : > { %1178 = vmatprep.mubr.bf16.mxu1 %v3547_v28 }
 0x16b   : > { %1179 = vmatmul.mubr.bf16.gmra.mrb[96].mxu1 %v3552_v38  ;;  %v3053_v38 = vld [vmem:[#allocation7 + $0x124] ss:$8 sps:$4 sm:$0xff]  }
 0x16c   : > { %1188 = vmatprep.mubr.bf16.mxu1 %v3555_v39 }
 0x173   : > { %1189 = vmatmul.mubr.bf16.gmra.mrb[100].mxu1 %v3560_v48  ;;  %v3051_v48 = vld [vmem:[#allocation7 + $0x120] ss:$8 sps:$4 sm:$0xff]  }
 0x174   : > { %1198 = vmatprep.mubr.bf16.mxu1 %v3563_v49 }
 0x17b   : > { %1199 = vmatmul.mubr.bf16.gmra.mrb[104].mxu1 %v3568_v56 }
 0x17c   : > { %1208 = vmatprep.mubr.bf16.mxu1 %v3571_v57 }
 0x17e   : > { %v907_v52 = vpop.f32.mrb[0].mxu1 }
 0x17f   : > { %v908_v53 = vadd.f32 %v907_v52, %v3645_v46  ;;  %v909_v60 = vpop.f32.mrb[1].mxu1 }
 0x180   : > { %v910_v61 = vadd.f32 %v909_v60, %v3650_v47  ;;  %v911_v6 = vpop.f32.mrb[2].mxu1 }
 0x181   : > { %v912_v7 = vadd.f32 %v911_v6, %v3645_v46  ;;  %v913_v15 = vpop.f32.mrb[3].mxu1  ;;  %v1259_v17 = vmax.f32 %v908_v53, 0.0  ;;  %v3062_v53 = vld [vmem:[#allocation7 + $0x154] ss:$8 sps:$4 sm:$0xff]  }
 0x182   : > { %v914_v16 = vadd.f32 %v913_v15, %v3650_v47  ;;  %v1260_v19 = vmax.f32 %v910_v61, 0.0 }
 0x183   : > { %v1263_v18 = vmax.f32 %v912_v7, 0.0  ;;  %1209 = vmatmul.mubr.bf16.gmra.mrb[108].mxu1 %v3576_v62  ;;  %v3060_v7 = vld [vmem:[#allocation7 + $0x150] ss:$8 sps:$4 sm:$0xff]  }
 0x184   : > { %v1264_v20 = vmax.f32 %v914_v16, 0.0  ;;  %1218 = vmatprep.mubr.bf16.mxu1 %v3579_v0  ;;  %v3059_v0 = vld [vmem:[#allocation7 + $0x144] ss:$8 sps:$4 sm:$0xff]  }
 0x185   : > { %v1387_v21 = vpack.c.bf16 %v1263_v18, %v1259_v17  ;;  %v3065_v17 = vld [vmem:[#allocation7 + $0x164] ss:$8 sps:$4 sm:$0xff]  }
 0x186   : > { %v917_v22 = vpop.f32.mrb[4].mxu1  ;;  %v1388_v23 = vpack.c.bf16 %v1264_v20, %v1260_v19 }
 0x187   : > { %v918_v25 = vadd.f32 %v917_v22, %v3645_v46  ;;  %v919_v26 = vpop.f32.mrb[5].mxu1 }
 0x188   : > { %v920_v28 = vadd.f32 %v919_v26, %v3650_v47  ;;  %v921_v29 = vpop.f32.mrb[6].mxu1  ;;  %1879 = vmatprep.mubr.bf16.mxu0 %v1388_v23  ;;  %v3063_v23 = vld [vmem:[#allocation7 + $0x160] ss:$8 sps:$4 sm:$0xff]   ;;  %v3068_v26 = vld [vmem:[#allocation7 + $0x174] ss:$8 sps:$4 sm:$0xff]  }
 0x189   : > { %v922_v30 = vadd.f32 %v921_v29, %v3645_v46  ;;  %v923_v31 = vpop.f32.mrb[7].mxu1  ;;  %1880 = vmatmul.mubr.bf16.vlgmr.msra.gmra.mrb[0].mxu0 %v1387_v21  ;;  %v1267_v35 = vmax.f32 %v918_v25, 0.0 }
 0x18a   : > { %v924_v32 = vadd.f32 %v923_v31, %v3650_v47  ;;  %2041 = vmatpush1.bf16.msra.mxu0 %v3045_v24  ;;  %v1268_v39 = vmax.f32 %v920_v28, 0.0 }
 0x18b   : > { %v1271_v37 = vmax.f32 %v922_v30, 0.0  ;;  %1219 = vmatmul.mubr.bf16.gmra.mrb[112].mxu1 %v3584_v4  ;;  %2042 = vmatprep.subr.bf16.mxu0 %v3050_v27  ;;  %v3066_v30 = vld [vmem:[#allocation7 + $0x170] ss:$8 sps:$4 sm:$0xff]  }
 0x18c   : > { %v1272_v42 = vmax.f32 %v924_v32, 0.0  ;;  %1228 = vmatprep.mubr.bf16.mxu1 %v3587_v5 }
 0x18d   : > { %v1391_v43 = vpack.c.bf16 %v1271_v37, %v1267_v35 }
 0x18e   : > { %v1392_v44 = vpack.c.bf16 %v1272_v42, %v1268_v39  ;;  %v927_v45 = vpop.f32.mrb[8].mxu1  ;;  %2043 = vmatpush1.bf16.msra.mxu0 %v3048_v33  ;;  %v3071_v33 = vld [vmem:[#allocation7 + $0x184] ss:$8 sps:$4 sm:$0xff]  }
 0x18f   : > { %v928_v49 = vadd.f32 %v927_v45, %v3645_v46  ;;  %v929_v50 = vpop.f32.mrb[9].mxu1  ;;  %2044 = vmatprep.subr.bf16.mxu0 %v3053_v38 }
 0x190   : > { %v930_v54 = vadd.f32 %v929_v50, %v3650_v47  ;;  %v931_v55 = vpop.f32.mrb[10].mxu1  ;;  %1889 = vmatprep.mubr.bf16.mxu0 %v1392_v44 }
 0x191   : > { %v932_v56 = vadd.f32 %v931_v55, %v3645_v46  ;;  %v933_v57 = vpop.f32.mrb[11].mxu1  ;;  %1890 = vmatmul.mubr.bf16.gmra.mrb[4].mxu0 %v1391_v43  ;;  %v1275_v62 = vmax.f32 %v928_v49, 0.0  ;;  %v3069_v43 = vld [vmem:[#allocation7 + $0x180] ss:$8 sps:$4 sm:$0xff]   ;;  %v3072_v55 = vld [vmem:[#allocation7 + $0x190] ss:$8 sps:$4 sm:$0xff]  }
 0x192   : > { %v934_v58 = vadd.f32 %v933_v57, %v3650_v47  ;;  %2045 = vmatpush1.bf16.msra.mxu0 %v3051_v48  ;;  %v1276_v1 = vmax.f32 %v930_v54, 0.0  ;;  %v3074_v48 = vld [vmem:[#allocation7 + $0x194] ss:$8 sps:$4 sm:$0xff]  }
 0x193   : > { %v1279_v63 = vmax.f32 %v932_v56, 0.0  ;;  %1229 = vmatmul.mubr.bf16.gmra.mrb[116].mxu1 %v3592_v9  ;;  %2046 = vmatprep.subr.bf16.mxu0 %v3056_v51 }
 0x194   : > { %v1280_v2 = vmax.f32 %v934_v58, 0.0  ;;  %1238 = vmatprep.mubr.bf16.mxu1 %v3595_v10  ;;  %v3077_v58 = vld [vmem:[#allocation7 + $0x1a4] ss:$8 sps:$4 sm:$0xff]  }
 0x195   : > { %v1395_v3 = vpack.c.bf16 %v1279_v63, %v1275_v62 }
 0x196   : > { %v1396_v4 = vpack.c.bf16 %v1280_v2, %v1276_v1  ;;  %v937_v5 = vpop.f32.mrb[12].mxu1  ;;  %2047 = vmatpush1.bf16.msra.mxu0 %v3054_v59  ;;  %v3075_v2 = vld [vmem:[#allocation7 + $0x1a0] ss:$8 sps:$4 sm:$0xff]  }
 0x197   : > { %v938_v13 = vadd.f32 %v937_v5, %v3645_v46  ;;  %v939_v52 = vpop.f32.mrb[13].mxu1  ;;  %2048 = vmatprep.subr.bf16.mxu0 %v3059_v0  ;;  %v3080_v5 = vld [vmem:[#allocation7 + $0x1b4] ss:$8 sps:$4 sm:$0xff]  }
 0x198   : > { %v940_v60 = vadd.f32 %v939_v52, %v3650_v47  ;;  %v941_v61 = vpop.f32.mrb[14].mxu1  ;;  %1899 = vmatprep.mubr.bf16.mxu0 %v1396_v4 }
 0x199   : > { %v942_v9 = vadd.f32 %v941_v61, %v3645_v46  ;;  %v943_v6 = vpop.f32.mrb[15].mxu1  ;;  %1900 = vmatmul.mubr.bf16.gmra.mrb[8].mxu0 %v1395_v3  ;;  %v1283_v15 = vmax.f32 %v938_v13, 0.0  ;;  %v3078_v61 = vld [vmem:[#allocation7 + $0x1b0] ss:$8 sps:$4 sm:$0xff]  }
 0x19a   : > { %v944_v10 = vadd.f32 %v943_v6, %v3650_v47  ;;  %2049 = vmatpush1.bf16.msra.mxu0 %v3057_v8  ;;  %v1284_v18 = vmax.f32 %v940_v60, 0.0 }
 0x19b   : > { %v1287_v16 = vmax.f32 %v942_v9, 0.0  ;;  %1239 = vmatmul.mubr.bf16.gmra.mrb[120].mxu1 %v3600_v11  ;;  %2050 = vmatprep.subr.bf16.mxu0 %v3062_v53 }
 0x19c   : > { %v1288_v19 = vmax.f32 %v944_v10, 0.0  ;;  %1248 = vmatprep.mubr.bf16.mxu1 %v3603_v12  ;;  %v3083_v10 = vld [vmem:[#allocation7 + $0x1c4] ss:$8 sps:$4 sm:$0xff]  }
 0x19d   : > { %v1399_v20 = vpack.c.bf16 %v1287_v16, %v1283_v15 }
 0x19e   : > { %v1400_v21 = vpack.c.bf16 %v1288_v19, %v1284_v18  ;;  %v947_v22 = vpop.f32.mrb[16].mxu1  ;;  %2051 = vmatpush1.bf16.msra.mxu0 %v3060_v7  ;;  %v3081_v19 = vld [vmem:[#allocation7 + $0x1c0] ss:$8 sps:$4 sm:$0xff]  }
 0x19f   : > { %v948_v24 = vadd.f32 %v947_v22, %v3645_v46  ;;  %v949_v25 = vpop.f32.mrb[17].mxu1  ;;  %2052 = vmatprep.subr.bf16.mxu0 %v3065_v17  ;;  %v3086_v22 = vld [vmem:[#allocation7 + $0x1d4] ss:$8 sps:$4 sm:$0xff]  }
 0x1a0   : > { %v950_v27 = vadd.f32 %v949_v25, %v3650_v47  ;;  %v951_v28 = vpop.f32.mrb[18].mxu1  ;;  %1909 = vmatprep.mubr.bf16.mxu0 %v1400_v21 }
 0x1a1   : > { %v952_v11 = vadd.f32 %v951_v28, %v3645_v46  ;;  %v953_v29 = vpop.f32.mrb[19].mxu1  ;;  %1910 = vmatmul.mubr.bf16.gmra.mrb[12].mxu0 %v1399_v20  ;;  %v1291_v31 = vmax.f32 %v948_v24, 0.0  ;;  %v3084_v28 = vld [vmem:[#allocation7 + $0x1d0] ss:$8 sps:$4 sm:$0xff]  }
 0x1a2   : > { %v954_v12 = vadd.f32 %v953_v29, %v3650_v47  ;;  %2053 = vmatpush1.bf16.msra.mxu0 %v3063_v23  ;;  %v1292_v35 = vmax.f32 %v950_v27, 0.0 }
 0x1a3   : > { %v1295_v32 = vmax.f32 %v952_v11, 0.0  ;;  %1249 = vmatmul.mubr.bf16.gmra.mrb[124].mxu1 %v3608_v14  ;;  %2054 = vmatprep.subr.bf16.mxu0 %v3068_v26 }
 0x1a4   : > { %v1296_v37 = vmax.f32 %v954_v12, 0.0  ;;  %v3089_v12 = vld [vmem:[#allocation7 + $0x1e4] ss:$8 sps:$4 sm:$0xff]  }
 0x1a5   : > { %v1403_v38 = vpack.c.bf16 %v1295_v32, %v1291_v31 }
 0x1a6   : > { %v1404_v39 = vpack.c.bf16 %v1296_v37, %v1292_v35  ;;  %v957_v42 = vpop.f32.mrb[20].mxu1  ;;  %2055 = vmatpush1.bf16.msra.mxu0 %v3066_v30  ;;  %v3087_v37 = vld [vmem:[#allocation7 + $0x1e0] ss:$8 sps:$4 sm:$0xff]  }
 0x1a7   : > { %v958_v44 = vadd.f32 %v957_v42, %v3645_v46  ;;  %v959_v45 = vpop.f32.mrb[21].mxu1  ;;  %2056 = vmatprep.subr.bf16.mxu0 %v3071_v33  ;;  %v3092_v42 = vld [vmem:[#allocation7 + $0x1f4] ss:$8 sps:$4 sm:$0xff]  }
 0x1a8   : > { %v960_v49 = vadd.f32 %v959_v45, %v3650_v47  ;;  %v961_v50 = vpop.f32.mrb[22].mxu1  ;;  %1919 = vmatprep.mubr.bf16.mxu0 %v1404_v39 }
 0x1a9   : > { %v962_v14 = vadd.f32 %v961_v50, %v3645_v46  ;;  %v963_v51 = vpop.f32.mrb[23].mxu1  ;;  %1920 = vmatmul.mubr.bf16.gmra.mrb[16].mxu0 %v1403_v38  ;;  %v1299_v56 = vmax.f32 %v958_v44, 0.0  ;;  %v3090_v50 = vld [vmem:[#allocation7 + $0x1f0] ss:$8 sps:$4 sm:$0xff]  }
 0x1aa   : > { %v964_v54 = vadd.f32 %v963_v51, %v3650_v47  ;;  %2057 = vmatpush1.bf16.msra.mxu0 %v3069_v43  ;;  %v1300_v59 = vmax.f32 %v960_v49, 0.0 }
 0x1ab   : > { %v1303_v57 = vmax.f32 %v962_v14, 0.0  ;;  %2058 = vmatprep.subr.bf16.mxu0 %v3074_v48 }
 0x1ac   : > { %v1304_v62 = vmax.f32 %v964_v54, 0.0 }
 0x1ad   : > { %v1407_v63 = vpack.c.bf16 %v1303_v57, %v1299_v56 }
 0x1ae   : > { %v1408_v0 = vpack.c.bf16 %v1304_v62, %v1300_v59  ;;  %v967_v1 = vpop.f32.mrb[24].mxu1  ;;  %2059 = vmatpush1.bf16.msra.mxu0 %v3072_v55 }
 0x1af   : > { %v968_v3 = vadd.f32 %v967_v1, %v3645_v46  ;;  %v969_v4 = vpop.f32.mrb[25].mxu1  ;;  %2060 = vmatprep.subr.bf16.mxu0 %v3077_v58 }
 0x1b0   : > { %v970_v8 = vadd.f32 %v969_v4, %v3650_v47  ;;  %v971_v13 = vpop.f32.mrb[26].mxu1  ;;  %1929 = vmatprep.mubr.bf16.mxu0 %v1408_v0 }
 0x1b1   : > { %v972_v52 = vadd.f32 %v971_v13, %v3645_v46  ;;  %v973_v53 = vpop.f32.mrb[27].mxu1  ;;  %1930 = vmatmul.mubr.bf16.gmra.mrb[20].mxu0 %v1407_v63  ;;  %v1307_v9 = vmax.f32 %v968_v3, 0.0 }
 0x1b2   : > { %v974_v60 = vadd.f32 %v973_v53, %v3650_v47  ;;  %2061 = vmatpush1.bf16.msra.mxu0 %v3075_v2  ;;  %v1308_v7 = vmax.f32 %v970_v8, 0.0 }
 0x1b3   : > { %v1311_v6 = vmax.f32 %v972_v52, 0.0  ;;  %2062 = vmatprep.subr.bf16.mxu0 %v3080_v5 }
 0x1b4   : > { %v1312_v15 = vmax.f32 %v974_v60, 0.0 }
 0x1b5   : > { %v1411_v16 = vpack.c.bf16 %v1311_v6, %v1307_v9 }
 0x1b6   : > { %v1412_v17 = vpack.c.bf16 %v1312_v15, %v1308_v7  ;;  %v977_v18 = vpop.f32.mrb[28].mxu1  ;;  %2063 = vmatpush1.bf16.msra.mxu0 %v3078_v61 }
 0x1b7   : > { %v978_v20 = vadd.f32 %v977_v18, %v3645_v46  ;;  %v979_v21 = vpop.f32.mrb[29].mxu1  ;;  %2064 = vmatprep.subr.bf16.mxu0 %v3083_v10 }
 0x1b8   : > { %v980_v23 = vadd.f32 %v979_v21, %v3650_v47  ;;  %v981_v24 = vpop.f32.mrb[30].mxu1  ;;  %1939 = vmatprep.mubr.bf16.mxu0 %v1412_v17 }
 0x1b9   : > { %v982_v25 = vadd.f32 %v981_v24, %v3645_v46  ;;  %v983_v26 = vpop.f32.mrb[31].mxu1  ;;  %1940 = vmatmul.mubr.bf16.gmra.mrb[24].mxu0 %v1411_v16  ;;  %v1315_v11 = vmax.f32 %v978_v20, 0.0 }
 0x1ba   : > { %v984_v27 = vadd.f32 %v983_v26, %v3650_v47  ;;  %2065 = vmatpush1.bf16.msra.mxu0 %v3081_v19  ;;  %v1316_v30 = vmax.f32 %v980_v23, 0.0 }
 0x1bb   : > { %v1319_v29 = vmax.f32 %v982_v25, 0.0  ;;  %2066 = vmatprep.subr.bf16.mxu0 %v3086_v22 }
 0x1bc   : > { %v1320_v31 = vmax.f32 %v984_v27, 0.0 }
 0x1bd   : > { %v1415_v32 = vpack.c.bf16 %v1319_v29, %v1315_v11 }
 0x1be   : > { %v1416_v33 = vpack.c.bf16 %v1320_v31, %v1316_v30  ;;  %v987_v35 = vpop.f32.mrb[32].mxu1  ;;  %2067 = vmatpush1.bf16.msra.mxu0 %v3084_v28 }
 0x1bf   : > { %v988_v38 = vadd.f32 %v987_v35, %v3645_v46  ;;  %v989_v39 = vpop.f32.mrb[33].mxu1  ;;  %2068 = vmatprep.subr.bf16.mxu0 %v3089_v12 }
 0x1c0   : > { %v990_v43 = vadd.f32 %v989_v39, %v3650_v47  ;;  %v991_v44 = vpop.f32.mrb[34].mxu1  ;;  %1949 = vmatprep.mubr.bf16.mxu0 %v1416_v33 }
 0x1c1   : > { %v992_v45 = vadd.f32 %v991_v44, %v3645_v46  ;;  %v993_v48 = vpop.f32.mrb[35].mxu1  ;;  %1950 = vmatmul.mubr.bf16.gmra.mrb[28].mxu0 %v1415_v32  ;;  %v1323_v14 = vmax.f32 %v988_v38, 0.0 }
 0x1c2   : > { %v994_v49 = vadd.f32 %v993_v48, %v3650_v47  ;;  %2069 = vmatpush1.bf16.msra.mxu0 %v3087_v37  ;;  %v1324_v54 = vmax.f32 %v990_v43, 0.0 }
 0x1c3   : > { %v1327_v51 = vmax.f32 %v992_v45, 0.0  ;;  %2070 = vmatprep.subr.bf16.mxu0 %v3092_v42 }
 0x1c4   : > { %v1328_v55 = vmax.f32 %v994_v49, 0.0 }
 0x1c5   : > { %v1419_v56 = vpack.c.bf16 %v1327_v51, %v1323_v14 }
 0x1c6   : > { %v1420_v57 = vpack.c.bf16 %v1328_v55, %v1324_v54  ;;  %v997_v58 = vpop.f32.mrb[36].mxu1  ;;  %2071 = vmatpush1.bf16.msra.mxu0 %v3090_v50 }
 0x1c7   : > { %v998_v59 = vadd.f32 %v997_v58, %v3645_v46  ;;  %v999_v62 = vpop.f32.mrb[37].mxu1 }
 0x1c8   : > { %v1000_v63 = vadd.f32 %v999_v62, %v3650_v47  ;;  %v1001_v0 = vpop.f32.mrb[38].mxu1  ;;  %1959 = vmatprep.mubr.bf16.mxu0 %v1420_v57 }
 0x1c9   : > { %v1002_v1 = vadd.f32 %v1001_v0, %v3645_v46  ;;  %v1003_v2 = vpop.f32.mrb[39].mxu1  ;;  %1960 = vmatmul.mubr.bf16.gmra.mrb[32].mxu0 %v1419_v56  ;;  %v1331_v4 = vmax.f32 %v998_v59, 0.0 }
 0x1ca   : > { %v1004_v3 = vadd.f32 %v1003_v2, %v3650_v47  ;;  %v1332_v8 = vmax.f32 %v1000_v63, 0.0 }
 0x1cb   : > { %v1335_v5 = vmax.f32 %v1002_v1, 0.0 }
 0x1cc   : > { %v1336_v13 = vmax.f32 %v1004_v3, 0.0 }
 0x1cd   : > { %v1423_v52 = vpack.c.bf16 %v1335_v5, %v1331_v4 }
 0x1ce   : > { %v1424_v53 = vpack.c.bf16 %v1336_v13, %v1332_v8  ;;  %v1007_v60 = vpop.f32.mrb[40].mxu1 }
 0x1cf   : > { %v1008_v61 = vadd.f32 %v1007_v60, %v3645_v46  ;;  %v1009_v9 = vpop.f32.mrb[41].mxu1 }
 0x1d0   : > { %v1010_v6 = vadd.f32 %v1009_v9, %v3650_v47  ;;  %v1011_v10 = vpop.f32.mrb[42].mxu1  ;;  %1969 = vmatprep.mubr.bf16.mxu0 %v1424_v53 }
 0x1d1   : > { %v1012_v7 = vadd.f32 %v1011_v10, %v3645_v46  ;;  %v1013_v15 = vpop.f32.mrb[43].mxu1  ;;  %1970 = vmatmul.mubr.bf16.gmra.mrb[36].mxu0 %v1423_v52  ;;  %v1339_v17 = vmax.f32 %v1008_v61, 0.0 }
 0x1d2   : > { %v1014_v16 = vadd.f32 %v1013_v15, %v3650_v47  ;;  %v1340_v19 = vmax.f32 %v1010_v6, 0.0 }
 0x1d3   : > { %v1343_v18 = vmax.f32 %v1012_v7, 0.0 }
 0x1d4   : > { %v1344_v20 = vmax.f32 %v1014_v16, 0.0 }
 0x1d5   : > { %v1427_v21 = vpack.c.bf16 %v1343_v18, %v1339_v17 }
 0x1d6   : > { %v1428_v22 = vpack.c.bf16 %v1344_v20, %v1340_v19  ;;  %v1017_v23 = vpop.f32.mrb[44].mxu1 }
 0x1d7   : > { %v1018_v24 = vadd.f32 %v1017_v23, %v3645_v46  ;;  %v1019_v25 = vpop.f32.mrb[45].mxu1 }
 0x1d8   : > { %v1020_v26 = vadd.f32 %v1019_v25, %v3650_v47  ;;  %v1021_v27 = vpop.f32.mrb[46].mxu1  ;;  %1979 = vmatprep.mubr.bf16.mxu0 %v1428_v22 }
 0x1d9   : > { %v1022_v28 = vadd.f32 %v1021_v27, %v3645_v46  ;;  %v1023_v11 = vpop.f32.mrb[47].mxu1  ;;  %1980 = vmatmul.mubr.bf16.gmra.mrb[40].mxu0 %v1427_v21  ;;  %v1347_v12 = vmax.f32 %v1018_v24, 0.0  ;;  %v383_v24 = vsub.s32 2, %v3631_v34  ;;  %v387_v27 = vsub.s32 3, %v3631_v34 }
 0x1da   : > { %v1024_v29 = vadd.f32 %v1023_v11, %v3650_v47  ;;  %v1348_v31 = vmax.f32 %v1020_v26, 0.0 }
 0x1db   : > { %v1351_v30 = vmax.f32 %v1022_v28, 0.0 }
 0x1dc   : > { %v1352_v32 = vmax.f32 %v1024_v29, 0.0 }
 0x1dd   : > { %v1431_v33 = vpack.c.bf16 %v1351_v30, %v1347_v12 }
 0x1de   : > { %v1432_v35 = vpack.c.bf16 %v1352_v32, %v1348_v31  ;;  %v1027_v37 = vpop.f32.mrb[48].mxu1  ;;  %v3729_v31 = vrot.slane %v3638_v40, %v383_v24 }
 0x1df   : > { %v1028_v38 = vadd.f32 %v1027_v37, %v3645_v46  ;;  %v1029_v39 = vpop.f32.mrb[49].mxu1 }
 0x1e0   : > { %v1030_v42 = vadd.f32 %v1029_v39, %v3650_v47  ;;  %v1031_v43 = vpop.f32.mrb[50].mxu1  ;;  %1989 = vmatprep.mubr.bf16.mxu0 %v1432_v35  ;;  %v3732_v35 = vrot.slane %v3638_v40, %v387_v27 }
 0x1e1   : > { %v1032_v44 = vadd.f32 %v1031_v43, %v3645_v46  ;;  %v1033_v45 = vpop.f32.mrb[51].mxu1  ;;  %1990 = vmatmul.mubr.bf16.gmra.mrb[44].mxu0 %v1431_v33  ;;  %v1355_v49 = vmax.f32 %v1028_v38, 0.0 }
 0x1e2   : > { %v1034_v48 = vadd.f32 %v1033_v45, %v3650_v47  ;;  %v1356_v14 = vmax.f32 %v1030_v42, 0.0 }
 0x1e3   : > { %v1359_v50 = vmax.f32 %v1032_v44, 0.0 }
 0x1e4   : > { %v1360_v51 = vmax.f32 %v1034_v48, 0.0 }
 0x1e5   : > { %v1435_v54 = vpack.c.bf16 %v1359_v50, %v1355_v49 }
 0x1e6   : > { %v1436_v55 = vpack.c.bf16 %v1360_v51, %v1356_v14  ;;  %v1037_v56 = vpop.f32.mrb[52].mxu1 }
 0x1e7   : > { %v1038_v57 = vadd.f32 %v1037_v56, %v3645_v46  ;;  %v1039_v58 = vpop.f32.mrb[53].mxu1 }
 0x1e8   : > { %v1040_v59 = vadd.f32 %v1039_v58, %v3650_v47  ;;  %v1041_v62 = vpop.f32.mrb[54].mxu1  ;;  %1999 = vmatprep.mubr.bf16.mxu0 %v1436_v55 }
 0x1e9   : > { %v1042_v63 = vadd.f32 %v1041_v62, %v3645_v46  ;;  %v1043_v0 = vpop.f32.mrb[55].mxu1  ;;  %2000 = vmatmul.mubr.bf16.gmra.mrb[48].mxu0 %v1435_v54  ;;  %v1363_v2 = vmax.f32 %v1038_v57, 0.0 }
 0x1ea   : > { %v1044_v1 = vadd.f32 %v1043_v0, %v3650_v47  ;;  %v1364_v4 = vmax.f32 %v1040_v59, 0.0 }
 0x1eb   : > { %v1367_v3 = vmax.f32 %v1042_v63, 0.0 }
 0x1ec   : > { %v1368_v5 = vmax.f32 %v1044_v1, 0.0 }
 0x1ed   : > { %v1439_v8 = vpack.c.bf16 %v1367_v3, %v1363_v2 }
 0x1ee   : > { %v1440_v13 = vpack.c.bf16 %v1368_v5, %v1364_v4  ;;  %v1047_v52 = vpop.f32.mrb[56].mxu1 }
 0x1ef   : > { %v1048_v53 = vadd.f32 %v1047_v52, %v3645_v46  ;;  %v1049_v60 = vpop.f32.mrb[57].mxu1 }
 0x1f0   : > { %v1050_v61 = vadd.f32 %v1049_v60, %v3650_v47  ;;  %v1051_v9 = vpop.f32.mrb[58].mxu1  ;;  %2009 = vmatprep.mubr.bf16.mxu0 %v1440_v13 }
 0x1f1   : > { %v1052_v6 = vadd.f32 %v1051_v9, %v3645_v46  ;;  %v1053_v10 = vpop.f32.mrb[59].mxu1  ;;  %2010 = vmatmul.mubr.bf16.gmra.mrb[52].mxu0 %v1439_v8  ;;  %v1371_v15 = vmax.f32 %v1048_v53, 0.0 }
 0x1f2   : > { %v1054_v7 = vadd.f32 %v1053_v10, %v3650_v47  ;;  %v1372_v17 = vmax.f32 %v1050_v61, 0.0 }
 0x1f3   : > { %v1375_v16 = vmax.f32 %v1052_v6, 0.0 }
 0x1f4   : > { %v1376_v18 = vmax.f32 %v1054_v7, 0.0 }
 0x1f5   : > { %v1443_v19 = vpack.c.bf16 %v1375_v16, %v1371_v15 }
 0x1f6   : > { %v1444_v20 = vpack.c.bf16 %v1376_v18, %v1372_v17  ;;  %v1057_v21 = vpop.f32.mrb[60].mxu1 }
 0x1f7   : > { %v1058_v22 = vadd.f32 %v1057_v21, %v3645_v46  ;;  %v1059_v23 = vpop.f32.mrb[61].mxu1 }
 0x1f8   : > { %v1060_v25 = vadd.f32 %v1059_v23, %v3650_v47  ;;  %v1061_v26 = vpop.f32.mrb[62].mxu1  ;;  %2019 = vmatprep.mubr.bf16.mxu0 %v1444_v20 }
 0x1f9   : > { %v1062_v28 = vadd.f32 %v1061_v26, %v3645_v46  ;;  %v1063_v11 = vpop.f32.mrb[63].mxu1  ;;  %2020 = vmatmul.mubr.bf16.gmra.mrb[56].mxu0 %v1443_v19  ;;  %v1379_v12 = vmax.f32 %v1058_v22, 0.0 }
 0x1fa   : > { %v1064_v29 = vadd.f32 %v1063_v11, %v3650_v47  ;;  %v1380_v32 = vmax.f32 %v1060_v25, 0.0 }
 0x1fb   : > { %v1383_v30 = vmax.f32 %v1062_v28, 0.0 }
 0x1fc   : > { %v1384_v33 = vmax.f32 %v1064_v29, 0.0 }
 0x1fd   : > { %v1447_v37 = vpack.c.bf16 %v1383_v30, %v1379_v12 }
 0x1fe   : > { %v1448_v38 = vpack.c.bf16 %v1384_v33, %v1380_v32  ;;  %v1100_v39 = vpop.f32.mrb[64].mxu1 }
 0x1ff   : > { %v1101_v42 = vadd.f32 %v1100_v39, %v3729_v31  ;;  %v1102_v46 = vpop.f32.mrb[65].mxu1 }
 0x200   : > { %v1103_v43 = vadd.f32 %v1102_v46, %v3732_v35  ;;  %v1104_v44 = vpop.f32.mrb[66].mxu1  ;;  %2029 = vmatprep.mubr.bf16.mxu0 %v1448_v38 }
 0x201   : > { %v1105_v47 = vadd.f32 %v1104_v44, %v3729_v31  ;;  %v1106_v45 = vpop.f32.mrb[67].mxu1  ;;  %2030 = vmatmul.mubr.bf16.gmra.mrb[60].mxu0 %v1447_v37  ;;  %v1261_v49 = vmax.f32 %v1101_v42, 0.0 }
 0x202   : > { %v1107_v48 = vadd.f32 %v1106_v45, %v3732_v35  ;;  %v1262_v40 = vmax.f32 %v1103_v43, 0.0 }
 0x203   : > { %v1265_v50 = vmax.f32 %v1105_v47, 0.0 }
 0x204   : > { %v1266_v14 = vmax.f32 %v1107_v48, 0.0 }
 0x205   : > { %v1389_v51 = vpack.c.bf16 %v1265_v50, %v1261_v49 }
 0x206   : > { %v1390_v54 = vpack.c.bf16 %v1266_v14, %v1262_v40  ;;  %v1110_v55 = vpop.f32.mrb[68].mxu1 }
 0x207   : > { %v1111_v56 = vadd.f32 %v1110_v55, %v3729_v31  ;;  %v1112_v57 = vpop.f32.mrb[69].mxu1 }
 0x208   : > { %v1113_v58 = vadd.f32 %v1112_v57, %v3732_v35  ;;  %v1114_v59 = vpop.f32.mrb[70].mxu1  ;;  %2072 = vmatprep.mubr.bf16.mxu0 %v1390_v54 }
 0x209   : > { %v1115_v62 = vadd.f32 %v1114_v59, %v3729_v31  ;;  %v1116_v63 = vpop.f32.mrb[71].mxu1  ;;  %2073 = vmatmul.mubr.bf16.vlgmr.msra.gmra.mrb[0].mxu0 %v1389_v51  ;;  %v1269_v1 = vmax.f32 %v1111_v56, 0.0 }
 0x20a   : > { %v1117_v0 = vadd.f32 %v1116_v63, %v3732_v35  ;;  %v1270_v3 = vmax.f32 %v1113_v58, 0.0 }
 0x20b   : > { %v1273_v2 = vmax.f32 %v1115_v62, 0.0 }
 0x20c   : > { %v1274_v4 = vmax.f32 %v1117_v0, 0.0 }
 0x20d   : > { %v1393_v5 = vpack.c.bf16 %v1273_v2, %v1269_v1 }
 0x20e   : > { %v1394_v8 = vpack.c.bf16 %v1274_v4, %v1270_v3  ;;  %v1120_v13 = vpop.f32.mrb[72].mxu1 }
 0x20f   : > { %v1121_v52 = vadd.f32 %v1120_v13, %v3729_v31  ;;  %v1122_v53 = vpop.f32.mrb[73].mxu1 }
 0x210   : > { %v1123_v60 = vadd.f32 %v1122_v53, %v3732_v35  ;;  %v1124_v61 = vpop.f32.mrb[74].mxu1  ;;  %2082 = vmatprep.mubr.bf16.mxu0 %v1394_v8 }
 0x211   : > { %v1125_v9 = vadd.f32 %v1124_v61, %v3729_v31  ;;  %v1126_v6 = vpop.f32.mrb[75].mxu1  ;;  %2083 = vmatmul.mubr.bf16.gmra.mrb[4].mxu0 %v1393_v5  ;;  %v1277_v7 = vmax.f32 %v1121_v52, 0.0 }
 0x212   : > { %v1127_v10 = vadd.f32 %v1126_v6, %v3732_v35  ;;  %v1278_v16 = vmax.f32 %v1123_v60, 0.0 }
 0x213   : > { %v1281_v15 = vmax.f32 %v1125_v9, 0.0 }
 0x214   : > { %v1282_v17 = vmax.f32 %v1127_v10, 0.0 }
 0x215   : > { %v1397_v18 = vpack.c.bf16 %v1281_v15, %v1277_v7 }
 0x216   : > { %v1398_v19 = vpack.c.bf16 %v1282_v17, %v1278_v16  ;;  %v1130_v20 = vpop.f32.mrb[76].mxu1 }
 0x217   : > { %v1131_v21 = vadd.f32 %v1130_v20, %v3729_v31  ;;  %v1132_v22 = vpop.f32.mrb[77].mxu1 }
 0x218   : > { %v1133_v23 = vadd.f32 %v1132_v22, %v3732_v35  ;;  %v1134_v24 = vpop.f32.mrb[78].mxu1  ;;  %2092 = vmatprep.mubr.bf16.mxu0 %v1398_v19 }
 0x219   : > { %v1135_v25 = vadd.f32 %v1134_v24, %v3729_v31  ;;  %v1136_v26 = vpop.f32.mrb[79].mxu1  ;;  %2093 = vmatmul.mubr.bf16.gmra.mrb[8].mxu0 %v1397_v18  ;;  %v1285_v28 = vmax.f32 %v1131_v21, 0.0 }
 0x21a   : > { %v1137_v27 = vadd.f32 %v1136_v26, %v3732_v35  ;;  %v1286_v29 = vmax.f32 %v1133_v23, 0.0 }
 0x21b   : > { %v1289_v11 = vmax.f32 %v1135_v25, 0.0 }
 0x21c   : > { %v1290_v12 = vmax.f32 %v1137_v27, 0.0 }
 0x21d   : > { %v1401_v30 = vpack.c.bf16 %v1289_v11, %v1285_v28 }
 0x21e   : > { %v1402_v32 = vpack.c.bf16 %v1290_v12, %v1286_v29  ;;  %v1140_v33 = vpop.f32.mrb[80].mxu1 }
 0x21f   : > { %v1141_v37 = vadd.f32 %v1140_v33, %v3729_v31  ;;  %v1142_v38 = vpop.f32.mrb[81].mxu1 }
 0x220   : > { %v1143_v39 = vadd.f32 %v1142_v38, %v3732_v35  ;;  %v1144_v42 = vpop.f32.mrb[82].mxu1  ;;  %2102 = vmatprep.mubr.bf16.mxu0 %v1402_v32 }
 0x221   : > { %v1145_v46 = vadd.f32 %v1144_v42, %v3729_v31  ;;  %v1146_v43 = vpop.f32.mrb[83].mxu1  ;;  %2103 = vmatmul.mubr.bf16.gmra.mrb[12].mxu0 %v1401_v30  ;;  %v1293_v47 = vmax.f32 %v1141_v37, 0.0 }
 0x222   : > { %v1147_v44 = vadd.f32 %v1146_v43, %v3732_v35  ;;  %v1294_v48 = vmax.f32 %v1143_v39, 0.0 }
 0x223   : > { %v1297_v45 = vmax.f32 %v1145_v46, 0.0 }
 0x224   : > { %v1298_v49 = vmax.f32 %v1147_v44, 0.0 }
 0x225   : > { %v1405_v50 = vpack.c.bf16 %v1297_v45, %v1293_v47 }
 0x226   : > { %v1406_v40 = vpack.c.bf16 %v1298_v49, %v1294_v48  ;;  %v1150_v14 = vpop.f32.mrb[84].mxu1 }
 0x227   : > { %v1151_v51 = vadd.f32 %v1150_v14, %v3729_v31  ;;  %v1152_v54 = vpop.f32.mrb[85].mxu1 }
 0x228   : > { %v1153_v55 = vadd.f32 %v1152_v54, %v3732_v35  ;;  %v1154_v56 = vpop.f32.mrb[86].mxu1  ;;  %2112 = vmatprep.mubr.bf16.mxu0 %v1406_v40 }
 0x229   : > { %v1155_v57 = vadd.f32 %v1154_v56, %v3729_v31  ;;  %v1156_v58 = vpop.f32.mrb[87].mxu1  ;;  %2113 = vmatmul.mubr.bf16.gmra.mrb[16].mxu0 %v1405_v50  ;;  %v1301_v62 = vmax.f32 %v1151_v51, 0.0 }
 0x22a   : > { %v1157_v59 = vadd.f32 %v1156_v58, %v3732_v35  ;;  %v1302_v0 = vmax.f32 %v1153_v55, 0.0 }
 0x22b   : > { %v1305_v63 = vmax.f32 %v1155_v57, 0.0 }
 0x22c   : > { %v1306_v1 = vmax.f32 %v1157_v59, 0.0 }
 0x22d   : > { %v1409_v2 = vpack.c.bf16 %v1305_v63, %v1301_v62 }
 0x22e   : > { %v1410_v3 = vpack.c.bf16 %v1306_v1, %v1302_v0  ;;  %v1160_v4 = vpop.f32.mrb[88].mxu1 }
 0x22f   : > { %v1161_v5 = vadd.f32 %v1160_v4, %v3729_v31  ;;  %v1162_v8 = vpop.f32.mrb[89].mxu1 }
 0x230   : > { %v1163_v13 = vadd.f32 %v1162_v8, %v3732_v35  ;;  %v1164_v52 = vpop.f32.mrb[90].mxu1  ;;  %2122 = vmatprep.mubr.bf16.mxu0 %v1410_v3 }
 0x231   : > { %v1165_v53 = vadd.f32 %v1164_v52, %v3729_v31  ;;  %v1166_v60 = vpop.f32.mrb[91].mxu1  ;;  %2123 = vmatmul.mubr.bf16.gmra.mrb[20].mxu0 %v1409_v2  ;;  %v1309_v9 = vmax.f32 %v1161_v5, 0.0 }
 0x232   : > { %v1167_v61 = vadd.f32 %v1166_v60, %v3732_v35  ;;  %v1310_v10 = vmax.f32 %v1163_v13, 0.0 }
 0x233   : > { %v1313_v6 = vmax.f32 %v1165_v53, 0.0 }
 0x234   : > { %v1314_v7 = vmax.f32 %v1167_v61, 0.0 }
 0x235   : > { %v1413_v15 = vpack.c.bf16 %v1313_v6, %v1309_v9 }
 0x236   : > { %v1414_v16 = vpack.c.bf16 %v1314_v7, %v1310_v10  ;;  %v1170_v17 = vpop.f32.mrb[92].mxu1 }
 0x237   : > { %v1171_v18 = vadd.f32 %v1170_v17, %v3729_v31  ;;  %v1172_v19 = vpop.f32.mrb[93].mxu1 }
 0x238   : > { %v1173_v20 = vadd.f32 %v1172_v19, %v3732_v35  ;;  %v1174_v21 = vpop.f32.mrb[94].mxu1  ;;  %2132 = vmatprep.mubr.bf16.mxu0 %v1414_v16 }
 0x239   : > { %v1175_v22 = vadd.f32 %v1174_v21, %v3729_v31  ;;  %v1176_v23 = vpop.f32.mrb[95].mxu1  ;;  %2133 = vmatmul.mubr.bf16.gmra.mrb[24].mxu0 %v1413_v15  ;;  %v1317_v25 = vmax.f32 %v1171_v18, 0.0 }
 0x23a   : > { %v1177_v24 = vadd.f32 %v1176_v23, %v3732_v35  ;;  %v1318_v27 = vmax.f32 %v1173_v20, 0.0 }
 0x23b   : > { %v1321_v26 = vmax.f32 %v1175_v22, 0.0 }
 0x23c   : > { %v1322_v28 = vmax.f32 %v1177_v24, 0.0 }
 0x23d   : > { %v1417_v11 = vpack.c.bf16 %v1321_v26, %v1317_v25 }
 0x23e   : > { %v1418_v29 = vpack.c.bf16 %v1322_v28, %v1318_v27  ;;  %v1180_v12 = vpop.f32.mrb[96].mxu1 }
 0x23f   : > { %v1181_v30 = vadd.f32 %v1180_v12, %v3729_v31  ;;  %v1182_v32 = vpop.f32.mrb[97].mxu1 }
 0x240   : > { %v1183_v33 = vadd.f32 %v1182_v32, %v3732_v35  ;;  %v1184_v37 = vpop.f32.mrb[98].mxu1  ;;  %2142 = vmatprep.mubr.bf16.mxu0 %v1418_v29 }
 0x241   : > { %v1185_v38 = vadd.f32 %v1184_v37, %v3729_v31  ;;  %v1186_v39 = vpop.f32.mrb[99].mxu1  ;;  %2143 = vmatmul.mubr.bf16.gmra.mrb[28].mxu0 %v1417_v11  ;;  %v1325_v46 = vmax.f32 %v1181_v30, 0.0 }
 0x242   : > { %v1187_v42 = vadd.f32 %v1186_v39, %v3732_v35  ;;  %v1326_v44 = vmax.f32 %v1183_v33, 0.0 }
 0x243   : > { %v1329_v43 = vmax.f32 %v1185_v38, 0.0 }
 0x244   : > { %v1330_v47 = vmax.f32 %v1187_v42, 0.0 }
 0x245   : > { %v1421_v45 = vpack.c.bf16 %v1329_v43, %v1325_v46 }
 0x246   : > { %v1422_v48 = vpack.c.bf16 %v1330_v47, %v1326_v44  ;;  %v1190_v49 = vpop.f32.mrb[100].mxu1 }
 0x247   : > { %v1191_v50 = vadd.f32 %v1190_v49, %v3729_v31  ;;  %v1192_v40 = vpop.f32.mrb[101].mxu1 }
 0x248   : > { %v1193_v14 = vadd.f32 %v1192_v40, %v3732_v35  ;;  %v1194_v51 = vpop.f32.mrb[102].mxu1  ;;  %2152 = vmatprep.mubr.bf16.mxu0 %v1422_v48 }
 0x249   : > { %v1195_v54 = vadd.f32 %v1194_v51, %v3729_v31  ;;  %v1196_v55 = vpop.f32.mrb[103].mxu1  ;;  %2153 = vmatmul.mubr.bf16.gmra.mrb[32].mxu0 %v1421_v45  ;;  %v1333_v57 = vmax.f32 %v1191_v50, 0.0 }
 0x24a   : > { %v1197_v56 = vadd.f32 %v1196_v55, %v3732_v35  ;;  %v1334_v59 = vmax.f32 %v1193_v14, 0.0 }
 0x24b   : > { %v1337_v58 = vmax.f32 %v1195_v54, 0.0 }
 0x24c   : > { %v1338_v62 = vmax.f32 %v1197_v56, 0.0 }
 0x24d   : > { %v1425_v63 = vpack.c.bf16 %v1337_v58, %v1333_v57 }
 0x24e   : > { %v1426_v0 = vpack.c.bf16 %v1338_v62, %v1334_v59  ;;  %v1200_v1 = vpop.f32.mrb[104].mxu1 }
 0x24f   : > { %v1201_v2 = vadd.f32 %v1200_v1, %v3729_v31  ;;  %v1202_v3 = vpop.f32.mrb[105].mxu1 }
 0x250   : > { %v1203_v4 = vadd.f32 %v1202_v3, %v3732_v35  ;;  %v1204_v5 = vpop.f32.mrb[106].mxu1  ;;  %2162 = vmatprep.mubr.bf16.mxu0 %v1426_v0 }
 0x251   : > { %v1205_v8 = vadd.f32 %v1204_v5, %v3729_v31  ;;  %v1206_v13 = vpop.f32.mrb[107].mxu1  ;;  %2163 = vmatmul.mubr.bf16.gmra.mrb[36].mxu0 %v1425_v63  ;;  %v1341_v53 = vmax.f32 %v1201_v2, 0.0 }
 0x252   : > { %v1207_v52 = vadd.f32 %v1206_v13, %v3732_v35  ;;  %v1342_v61 = vmax.f32 %v1203_v4, 0.0 }
 0x253   : > { %v1345_v60 = vmax.f32 %v1205_v8, 0.0 }
 0x254   : > { %v1346_v9 = vmax.f32 %v1207_v52, 0.0 }
 0x255   : > { %v1429_v6 = vpack.c.bf16 %v1345_v60, %v1341_v53 }
 0x256   : > { %v1430_v10 = vpack.c.bf16 %v1346_v9, %v1342_v61  ;;  %v1210_v7 = vpop.f32.mrb[108].mxu1 }
 0x257   : > { %v1211_v15 = vadd.f32 %v1210_v7, %v3729_v31  ;;  %v1212_v16 = vpop.f32.mrb[109].mxu1 }
 0x258   : > { %v1213_v17 = vadd.f32 %v1212_v16, %v3732_v35  ;;  %v1214_v18 = vpop.f32.mrb[110].mxu1  ;;  %2172 = vmatprep.mubr.bf16.mxu0 %v1430_v10 }
 0x259   : > { %v1215_v19 = vadd.f32 %v1214_v18, %v3729_v31  ;;  %v1216_v20 = vpop.f32.mrb[111].mxu1  ;;  %2173 = vmatmul.mubr.bf16.gmra.mrb[40].mxu0 %v1429_v6  ;;  %v1349_v22 = vmax.f32 %v1211_v15, 0.0 }
 0x25a   : > { %v1217_v21 = vadd.f32 %v1216_v20, %v3732_v35  ;;  %v1350_v24 = vmax.f32 %v1213_v17, 0.0 }
 0x25b   : > { %v1353_v23 = vmax.f32 %v1215_v19, 0.0 }
 0x25c   : > { %v1354_v25 = vmax.f32 %v1217_v21, 0.0 }
 0x25d   : > { %v1433_v26 = vpack.c.bf16 %v1353_v23, %v1349_v22 }
 0x25e   : > { %v1434_v27 = vpack.c.bf16 %v1354_v25, %v1350_v24  ;;  %v1220_v28 = vpop.f32.mrb[112].mxu1  ;;  %v1515_v25 = vld [vmem:[%s3995_s4] sm:$0x3] }
 0x25f   : > { %v1221_v11 = vadd.f32 %v1220_v28, %v3729_v31  ;;  %v1222_v29 = vpop.f32.mrb[113].mxu1 }
 0x260   : > { %v1223_v12 = vadd.f32 %v1222_v29, %v3732_v35  ;;  %v1224_v30 = vpop.f32.mrb[114].mxu1  ;;  %2182 = vmatprep.mubr.bf16.mxu0 %v1434_v27 }
 0x261   : > { %v1225_v32 = vadd.f32 %v1224_v30, %v3729_v31  ;;  %v1226_v33 = vpop.f32.mrb[115].mxu1  ;;  %2183 = vmatmul.mubr.bf16.gmra.mrb[44].mxu0 %v1433_v26  ;;  %v1357_v38 = vmax.f32 %v1221_v11, 0.0  ;;  %v3803_v26 = vrot.slane %v1515_v25, %v375_v36 }
 0x262   : > { %v1227_v37 = vadd.f32 %v1226_v33, %v3732_v35  ;;  %v1358_v42 = vmax.f32 %v1223_v12, 0.0 }
 0x263   : > { %v1361_v39 = vmax.f32 %v1225_v32, 0.0 }
 0x264   : > { %v1362_v46 = vmax.f32 %v1227_v37, 0.0 }
 0x265   : > { %v1437_v43 = vpack.c.bf16 %v1361_v39, %v1357_v38 }
 0x266   : > { %v1438_v44 = vpack.c.bf16 %v1362_v46, %v1358_v42  ;;  %v1230_v47 = vpop.f32.mrb[116].mxu1 }
 0x267   : > { %v1231_v45 = vadd.f32 %v1230_v47, %v3729_v31  ;;  %v1232_v48 = vpop.f32.mrb[117].mxu1 }
 0x268   : > { %v1233_v49 = vadd.f32 %v1232_v48, %v3732_v35  ;;  %v1234_v50 = vpop.f32.mrb[118].mxu1  ;;  %2192 = vmatprep.mubr.bf16.mxu0 %v1438_v44 }
 0x269   : > { %v1235_v40 = vadd.f32 %v1234_v50, %v3729_v31  ;;  %v1236_v14 = vpop.f32.mrb[119].mxu1  ;;  %2193 = vmatmul.mubr.bf16.gmra.mrb[48].mxu0 %v1437_v43  ;;  %v1365_v54 = vmax.f32 %v1231_v45, 0.0 }
 0x26a   : > { %v1237_v51 = vadd.f32 %v1236_v14, %v3732_v35  ;;  %v1366_v56 = vmax.f32 %v1233_v49, 0.0 }
 0x26b   : > { %v1369_v55 = vmax.f32 %v1235_v40, 0.0 }
 0x26c   : > { %v1370_v57 = vmax.f32 %v1237_v51, 0.0 }
 0x26d   : > { %v1441_v58 = vpack.c.bf16 %v1369_v55, %v1365_v54 }
 0x26e   : > { %v1442_v59 = vpack.c.bf16 %v1370_v57, %v1366_v56  ;;  %v1240_v62 = vpop.f32.mrb[120].mxu1 }
 0x26f   : > { %v1241_v63 = vadd.f32 %v1240_v62, %v3729_v31  ;;  %v1242_v0 = vpop.f32.mrb[121].mxu1 }
 0x270   : > { %v1243_v1 = vadd.f32 %v1242_v0, %v3732_v35  ;;  %v1244_v2 = vpop.f32.mrb[122].mxu1  ;;  %2202 = vmatprep.mubr.bf16.mxu0 %v1442_v59 }
 0x271   : > { %v1245_v3 = vadd.f32 %v1244_v2, %v3729_v31  ;;  %v1246_v4 = vpop.f32.mrb[123].mxu1  ;;  %2203 = vmatmul.mubr.bf16.gmra.mrb[52].mxu0 %v1441_v58  ;;  %v1373_v8 = vmax.f32 %v1241_v63, 0.0 }
 0x272   : > { %v1247_v5 = vadd.f32 %v1246_v4, %v3732_v35  ;;  %v1374_v52 = vmax.f32 %v1243_v1, 0.0 }
 0x273   : > { %v1377_v13 = vmax.f32 %v1245_v3, 0.0 }
 0x274   : > { %v1378_v53 = vmax.f32 %v1247_v5, 0.0 }
 0x275   : > { %v1445_v60 = vpack.c.bf16 %v1377_v13, %v1373_v8 }
 0x276   : > { %v1446_v61 = vpack.c.bf16 %v1378_v53, %v1374_v52  ;;  %v1250_v9 = vpop.f32.mrb[124].mxu1 }
 0x277   : > { %v1251_v6 = vadd.f32 %v1250_v9, %v3729_v31  ;;  %v1252_v10 = vpop.f32.mrb[125].mxu1 }
 0x278   : > { %v1253_v7 = vadd.f32 %v1252_v10, %v3732_v35  ;;  %v1254_v15 = vpop.f32.mrb[126].mxu1  ;;  %2212 = vmatprep.mubr.bf16.mxu0 %v1446_v61 }
 0x279   : > { %v1255_v16 = vadd.f32 %v1254_v15, %v3729_v31  ;;  %v1256_v17 = vpop.f32.mrb[127].mxu1  ;;  %2213 = vmatmul.mubr.bf16.gmra.mrb[56].mxu0 %v1445_v60  ;;  %v1381_v19 = vmax.f32 %v1251_v6, 0.0  ;;  %v3807_v31 = vrot.slane %v1515_v25, %v379_v41 }
 0x27a   : > { %v1257_v18 = vadd.f32 %v1256_v17, %v3732_v35  ;;  %v1382_v21 = vmax.f32 %v1253_v7, 0.0 }
 0x27b   : > { %v1385_v20 = vmax.f32 %v1255_v16, 0.0 }
 0x27c   : > { %v1386_v22 = vmax.f32 %v1257_v18, 0.0 }
 0x27d   : > { %v1449_v23 = vpack.c.bf16 %v1385_v20, %v1381_v19 }
 0x27e   : > { %v1450_v24 = vpack.c.bf16 %v1386_v22, %v1382_v21 }
 0x280   : > { %2222 = vmatprep.mubr.bf16.mxu0 %v1450_v24 }
 0x281   : > { %2223 = vmatmul.mubr.bf16.gmra.mrb[60].mxu0 %v1449_v23 }
 0x2dc   : > { %v2074_v35 = vpop.f32.mrb[0].mxu0 }
 0x2dd   : > { %v2652_v27 = vadd.f32 %v2074_v35, %v3803_v26  ;;  %v2076_v28 = vpop.f32.mrb[1].mxu0 }
 0x2de   : > { %v2653_v11 = vadd.f32 %v2076_v28, %v3807_v31  ;;  %v2078_v29 = vpop.f32.mrb[2].mxu0 }
 0x2df   : > { %v2233_v12 = vmax.f32 %v2652_v27, 0.0  ;;  %v2654_v30 = vadd.f32 %v2078_v29, %v3803_v26  ;;  %v2080_v32 = vpop.f32.mrb[3].mxu0 }
 0x2e0   : > { %v2234_v33 = vmax.f32 %v2653_v11, 0.0  ;;  %v2655_v36 = vadd.f32 %v2080_v32, %v3807_v31 }
 0x2e1   : > { %2297 = vst [vmem:[%s3814_s28] sm:$0xff] %v2233_v12  ;;  %v2235_v34 = vmax.f32 %v2654_v30, 0.0 }
 0x2e2   : > { %2298 = vst [vmem:[%s3814_s28 + $0x8] sm:$0xff] %v2234_v33  ;;  %v2236_v41 = vmax.f32 %v2655_v36, 0.0 }
 0x2e3   : > { %2299 = vst [vmem:[%s3814_s28 + $0x10] sm:$0xff] %v2235_v34 }
 0x2e4   : > { %2300 = vst [vmem:[%s3814_s28 + $0x18] sm:$0xff] %v2236_v41  ;;  %v2084_v37 = vpop.f32.mrb[4].mxu0 }
 0x2e5   : > { %v2656_v38 = vadd.f32 %v2084_v37, %v3803_v26  ;;  %v2086_v39 = vpop.f32.mrb[5].mxu0 }
 0x2e6   : > { %v2657_v42 = vadd.f32 %v2086_v39, %v3807_v31  ;;  %v2088_v46 = vpop.f32.mrb[6].mxu0 }
 0x2e7   : > { %v2237_v43 = vmax.f32 %v2656_v38, 0.0  ;;  %v2658_v44 = vadd.f32 %v2088_v46, %v3803_v26  ;;  %v2090_v47 = vpop.f32.mrb[7].mxu0 }
 0x2e8   : > { %v2238_v45 = vmax.f32 %v2657_v42, 0.0  ;;  %v2659_v48 = vadd.f32 %v2090_v47, %v3807_v31 }
 0x2e9   : > { %2301 = vst [vmem:[%s3814_s28 + $0x20] sm:$0xff] %v2237_v43  ;;  %v2239_v49 = vmax.f32 %v2658_v44, 0.0 }
 0x2ea   : > { %2302 = vst [vmem:[%s3814_s28 + $0x28] sm:$0xff] %v2238_v45  ;;  %v2240_v50 = vmax.f32 %v2659_v48, 0.0 }
 0x2eb   : > { %2303 = vst [vmem:[%s3814_s28 + $0x30] sm:$0xff] %v2239_v49 }
 0x2ec   : > { %2304 = vst [vmem:[%s3814_s28 + $0x38] sm:$0xff] %v2240_v50  ;;  %v2094_v40 = vpop.f32.mrb[8].mxu0 }
 0x2ed   : > { %v2660_v14 = vadd.f32 %v2094_v40, %v3803_v26  ;;  %v2096_v51 = vpop.f32.mrb[9].mxu0 }
 0x2ee   : > { %v2661_v54 = vadd.f32 %v2096_v51, %v3807_v31  ;;  %v2098_v55 = vpop.f32.mrb[10].mxu0 }
 0x2ef   : > { %v2241_v56 = vmax.f32 %v2660_v14, 0.0  ;;  %v2662_v57 = vadd.f32 %v2098_v55, %v3803_v26  ;;  %v2100_v58 = vpop.f32.mrb[11].mxu0 }
 0x2f0   : > { %v2242_v59 = vmax.f32 %v2661_v54, 0.0  ;;  %v2663_v62 = vadd.f32 %v2100_v58, %v3807_v31 }
 0x2f1   : > { %2305 = vst [vmem:[%s3814_s28 + $0x40] sm:$0xff] %v2241_v56  ;;  %v2243_v63 = vmax.f32 %v2662_v57, 0.0 }
 0x2f2   : > { %2306 = vst [vmem:[%s3814_s28 + $0x48] sm:$0xff] %v2242_v59  ;;  %v2244_v0 = vmax.f32 %v2663_v62, 0.0 }
 0x2f3   : > { %2307 = vst [vmem:[%s3814_s28 + $0x50] sm:$0xff] %v2243_v63 }
 0x2f4   : > { %2308 = vst [vmem:[%s3814_s28 + $0x58] sm:$0xff] %v2244_v0  ;;  %v2104_v1 = vpop.f32.mrb[12].mxu0 }
 0x2f5   : > { %v2664_v2 = vadd.f32 %v2104_v1, %v3803_v26  ;;  %v2106_v3 = vpop.f32.mrb[13].mxu0 }
 0x2f6   : > { %v2665_v4 = vadd.f32 %v2106_v3, %v3807_v31  ;;  %v2108_v5 = vpop.f32.mrb[14].mxu0 }
 0x2f7   : > { %v2245_v8 = vmax.f32 %v2664_v2, 0.0  ;;  %v2666_v13 = vadd.f32 %v2108_v5, %v3803_v26  ;;  %v2110_v52 = vpop.f32.mrb[15].mxu0 }
 0x2f8   : > { %v2246_v53 = vmax.f32 %v2665_v4, 0.0  ;;  %v2667_v60 = vadd.f32 %v2110_v52, %v3807_v31 }
 0x2f9   : > { %2309 = vst [vmem:[%s3814_s28 + $0x60] sm:$0xff] %v2245_v8  ;;  %v2247_v61 = vmax.f32 %v2666_v13, 0.0 }
 0x2fa   : > { %2310 = vst [vmem:[%s3814_s28 + $0x68] sm:$0xff] %v2246_v53  ;;  %v2248_v9 = vmax.f32 %v2667_v60, 0.0 }
 0x2fb   : > { %2311 = vst [vmem:[%s3814_s28 + $0x70] sm:$0xff] %v2247_v61 }
 0x2fc   : > { %2312 = vst [vmem:[%s3814_s28 + $0x78] sm:$0xff] %v2248_v9  ;;  %v2114_v6 = vpop.f32.mrb[16].mxu0 }
 0x2fd   : > { %v2668_v10 = vadd.f32 %v2114_v6, %v3803_v26  ;;  %v2116_v7 = vpop.f32.mrb[17].mxu0 }
 0x2fe   : > { %v2669_v15 = vadd.f32 %v2116_v7, %v3807_v31  ;;  %v2118_v16 = vpop.f32.mrb[18].mxu0 }
 0x2ff   : > { %v2249_v17 = vmax.f32 %v2668_v10, 0.0  ;;  %v2670_v18 = vadd.f32 %v2118_v16, %v3803_v26  ;;  %v2120_v19 = vpop.f32.mrb[19].mxu0 }
 0x300   : > { %v2250_v20 = vmax.f32 %v2669_v15, 0.0  ;;  %v2671_v21 = vadd.f32 %v2120_v19, %v3807_v31 }
 0x301   : > { %2313 = vst [vmem:[%s3814_s28 + $0x80] sm:$0xff] %v2249_v17  ;;  %v2251_v22 = vmax.f32 %v2670_v18, 0.0 }
 0x302   : > { %2314 = vst [vmem:[%s3814_s28 + $0x88] sm:$0xff] %v2250_v20  ;;  %v2252_v23 = vmax.f32 %v2671_v21, 0.0 }
 0x303   : > { %2315 = vst [vmem:[%s3814_s28 + $0x90] sm:$0xff] %v2251_v22 }
 0x304   : > { %2316 = vst [vmem:[%s3814_s28 + $0x98] sm:$0xff] %v2252_v23  ;;  %v2124_v24 = vpop.f32.mrb[20].mxu0 }
 0x305   : > { %v2672_v25 = vadd.f32 %v2124_v24, %v3803_v26  ;;  %v2126_v35 = vpop.f32.mrb[21].mxu0 }
 0x306   : > { %v2673_v27 = vadd.f32 %v2126_v35, %v3807_v31  ;;  %v2128_v28 = vpop.f32.mrb[22].mxu0 }
 0x307   : > { %v2253_v11 = vmax.f32 %v2672_v25, 0.0  ;;  %v2674_v29 = vadd.f32 %v2128_v28, %v3803_v26  ;;  %v2130_v12 = vpop.f32.mrb[23].mxu0 }
 0x308   : > { %v2254_v30 = vmax.f32 %v2673_v27, 0.0  ;;  %v2675_v32 = vadd.f32 %v2130_v12, %v3807_v31 }
 0x309   : > { %2317 = vst [vmem:[%s3814_s28 + $0xa0] sm:$0xff] %v2253_v11  ;;  %v2255_v33 = vmax.f32 %v2674_v29, 0.0 }
 0x30a   : > { %2318 = vst [vmem:[%s3814_s28 + $0xa8] sm:$0xff] %v2254_v30  ;;  %v2256_v36 = vmax.f32 %v2675_v32, 0.0 }
 0x30b   : > { %2319 = vst [vmem:[%s3814_s28 + $0xb0] sm:$0xff] %v2255_v33 }
 0x30c   : > { %2320 = vst [vmem:[%s3814_s28 + $0xb8] sm:$0xff] %v2256_v36  ;;  %v2134_v34 = vpop.f32.mrb[24].mxu0 }
 0x30d   : > { %v2676_v41 = vadd.f32 %v2134_v34, %v3803_v26  ;;  %v2136_v37 = vpop.f32.mrb[25].mxu0 }
 0x30e   : > { %v2677_v38 = vadd.f32 %v2136_v37, %v3807_v31  ;;  %v2138_v39 = vpop.f32.mrb[26].mxu0 }
 0x30f   : > { %v2257_v42 = vmax.f32 %v2676_v41, 0.0  ;;  %v2678_v46 = vadd.f32 %v2138_v39, %v3803_v26  ;;  %v2140_v43 = vpop.f32.mrb[27].mxu0 }
 0x310   : > { %v2258_v44 = vmax.f32 %v2677_v38, 0.0  ;;  %v2679_v47 = vadd.f32 %v2140_v43, %v3807_v31 }
 0x311   : > { %2321 = vst [vmem:[%s3814_s28 + $0xc0] sm:$0xff] %v2257_v42  ;;  %v2259_v45 = vmax.f32 %v2678_v46, 0.0 }
 0x312   : > { %2322 = vst [vmem:[%s3814_s28 + $0xc8] sm:$0xff] %v2258_v44  ;;  %v2260_v48 = vmax.f32 %v2679_v47, 0.0 }
 0x313   : > { %2323 = vst [vmem:[%s3814_s28 + $0xd0] sm:$0xff] %v2259_v45 }
 0x314   : > { %2324 = vst [vmem:[%s3814_s28 + $0xd8] sm:$0xff] %v2260_v48  ;;  %v2144_v49 = vpop.f32.mrb[28].mxu0 }
 0x315   : > { %v2680_v50 = vadd.f32 %v2144_v49, %v3803_v26  ;;  %v2146_v40 = vpop.f32.mrb[29].mxu0 }
 0x316   : > { %v2681_v14 = vadd.f32 %v2146_v40, %v3807_v31  ;;  %v2148_v51 = vpop.f32.mrb[30].mxu0 }
 0x317   : > { %v2261_v54 = vmax.f32 %v2680_v50, 0.0  ;;  %v2682_v55 = vadd.f32 %v2148_v51, %v3803_v26  ;;  %v2150_v56 = vpop.f32.mrb[31].mxu0 }
 0x318   : > { %v2262_v57 = vmax.f32 %v2681_v14, 0.0  ;;  %v2683_v58 = vadd.f32 %v2150_v56, %v3807_v31 }
 0x319   : > { %2325 = vst [vmem:[%s3814_s28 + $0xe0] sm:$0xff] %v2261_v54  ;;  %v2263_v59 = vmax.f32 %v2682_v55, 0.0 }
 0x31a   : > { %2326 = vst [vmem:[%s3814_s28 + $0xe8] sm:$0xff] %v2262_v57  ;;  %v2264_v62 = vmax.f32 %v2683_v58, 0.0 }
 0x31b   : > { %2327 = vst [vmem:[%s3814_s28 + $0xf0] sm:$0xff] %v2263_v59 }
 0x31c   : > { %2328 = vst [vmem:[%s3814_s28 + $0xf8] sm:$0xff] %v2264_v62  ;;  %v2154_v63 = vpop.f32.mrb[32].mxu0 }
 0x31d   : > { %v2684_v0 = vadd.f32 %v2154_v63, %v3803_v26  ;;  %v2156_v1 = vpop.f32.mrb[33].mxu0 }
 0x31e   : > { %v2685_v2 = vadd.f32 %v2156_v1, %v3807_v31  ;;  %v2158_v3 = vpop.f32.mrb[34].mxu0 }
 0x31f   : > { %v2265_v4 = vmax.f32 %v2684_v0, 0.0  ;;  %v2686_v5 = vadd.f32 %v2158_v3, %v3803_v26  ;;  %v2160_v8 = vpop.f32.mrb[35].mxu0 }
 0x320   : > { %v2266_v13 = vmax.f32 %v2685_v2, 0.0  ;;  %v2687_v52 = vadd.f32 %v2160_v8, %v3807_v31 }
 0x321   : > { %2329 = vst [vmem:[%s3814_s28 + $0x100] sm:$0xff] %v2265_v4  ;;  %v2267_v53 = vmax.f32 %v2686_v5, 0.0 }
 0x322   : > { %2330 = vst [vmem:[%s3814_s28 + $0x108] sm:$0xff] %v2266_v13  ;;  %v2268_v60 = vmax.f32 %v2687_v52, 0.0 }
 0x323   : > { %2331 = vst [vmem:[%s3814_s28 + $0x110] sm:$0xff] %v2267_v53 }
 0x324   : > { %2332 = vst [vmem:[%s3814_s28 + $0x118] sm:$0xff] %v2268_v60  ;;  %v2164_v61 = vpop.f32.mrb[36].mxu0 }
 0x325   : > { %v2688_v9 = vadd.f32 %v2164_v61, %v3803_v26  ;;  %v2166_v6 = vpop.f32.mrb[37].mxu0 }
 0x326   : > { %v2689_v10 = vadd.f32 %v2166_v6, %v3807_v31  ;;  %v2168_v7 = vpop.f32.mrb[38].mxu0 }
 0x327   : > { %v2269_v15 = vmax.f32 %v2688_v9, 0.0  ;;  %v2690_v16 = vadd.f32 %v2168_v7, %v3803_v26  ;;  %v2170_v17 = vpop.f32.mrb[39].mxu0 }
 0x328   : > { %v2270_v18 = vmax.f32 %v2689_v10, 0.0  ;;  %v2691_v19 = vadd.f32 %v2170_v17, %v3807_v31 }
 0x329   : > { %2333 = vst [vmem:[%s3814_s28 + $0x120] sm:$0xff] %v2269_v15  ;;  %v2271_v20 = vmax.f32 %v2690_v16, 0.0 }
 0x32a   : > { %2334 = vst [vmem:[%s3814_s28 + $0x128] sm:$0xff] %v2270_v18  ;;  %v2272_v21 = vmax.f32 %v2691_v19, 0.0 }
 0x32b   : > { %2335 = vst [vmem:[%s3814_s28 + $0x130] sm:$0xff] %v2271_v20 }
 0x32c   : > { %2336 = vst [vmem:[%s3814_s28 + $0x138] sm:$0xff] %v2272_v21  ;;  %v2174_v22 = vpop.f32.mrb[40].mxu0 }
 0x32d   : > { %v2692_v23 = vadd.f32 %v2174_v22, %v3803_v26  ;;  %v2176_v24 = vpop.f32.mrb[41].mxu0 }
 0x32e   : > { %v2693_v25 = vadd.f32 %v2176_v24, %v3807_v31  ;;  %v2178_v35 = vpop.f32.mrb[42].mxu0 }
 0x32f   : > { %v2273_v27 = vmax.f32 %v2692_v23, 0.0  ;;  %v2694_v28 = vadd.f32 %v2178_v35, %v3803_v26  ;;  %v2180_v11 = vpop.f32.mrb[43].mxu0 }
 0x330   : > { %v2274_v29 = vmax.f32 %v2693_v25, 0.0  ;;  %v2695_v12 = vadd.f32 %v2180_v11, %v3807_v31 }
 0x331   : > { %2337 = vst [vmem:[%s3814_s28 + $0x140] sm:$0xff] %v2273_v27  ;;  %v2275_v30 = vmax.f32 %v2694_v28, 0.0 }
 0x332   : > { %2338 = vst [vmem:[%s3814_s28 + $0x148] sm:$0xff] %v2274_v29  ;;  %v2276_v32 = vmax.f32 %v2695_v12, 0.0 }
 0x333   : > { %2339 = vst [vmem:[%s3814_s28 + $0x150] sm:$0xff] %v2275_v30 }
 0x334   : > { %2340 = vst [vmem:[%s3814_s28 + $0x158] sm:$0xff] %v2276_v32  ;;  %v2184_v33 = vpop.f32.mrb[44].mxu0 }
 0x335   : > { %v2696_v36 = vadd.f32 %v2184_v33, %v3803_v26  ;;  %v2186_v34 = vpop.f32.mrb[45].mxu0 }
 0x336   : > { %v2697_v41 = vadd.f32 %v2186_v34, %v3807_v31  ;;  %v2188_v37 = vpop.f32.mrb[46].mxu0 }
 0x337   : > { %v2277_v38 = vmax.f32 %v2696_v36, 0.0  ;;  %v2698_v39 = vadd.f32 %v2188_v37, %v3803_v26  ;;  %v2190_v42 = vpop.f32.mrb[47].mxu0 }
 0x338   : > { %v2278_v46 = vmax.f32 %v2697_v41, 0.0  ;;  %v2699_v43 = vadd.f32 %v2190_v42, %v3807_v31 }
 0x339   : > { %2341 = vst [vmem:[%s3814_s28 + $0x160] sm:$0xff] %v2277_v38  ;;  %v2279_v44 = vmax.f32 %v2698_v39, 0.0 }
 0x33a   : > { %2342 = vst [vmem:[%s3814_s28 + $0x168] sm:$0xff] %v2278_v46  ;;  %v2280_v47 = vmax.f32 %v2699_v43, 0.0 }
 0x33b   : > { %2343 = vst [vmem:[%s3814_s28 + $0x170] sm:$0xff] %v2279_v44 }
 0x33c   : > { %2344 = vst [vmem:[%s3814_s28 + $0x178] sm:$0xff] %v2280_v47  ;;  %v2194_v45 = vpop.f32.mrb[48].mxu0 }
 0x33d   : > { %v2700_v48 = vadd.f32 %v2194_v45, %v3803_v26  ;;  %v2196_v49 = vpop.f32.mrb[49].mxu0 }
 0x33e   : > { %v2701_v50 = vadd.f32 %v2196_v49, %v3807_v31  ;;  %v2198_v40 = vpop.f32.mrb[50].mxu0 }
 0x33f   : > { %v2281_v14 = vmax.f32 %v2700_v48, 0.0  ;;  %v2702_v51 = vadd.f32 %v2198_v40, %v3803_v26  ;;  %v2200_v54 = vpop.f32.mrb[51].mxu0 }
 0x340   : > { %v2282_v55 = vmax.f32 %v2701_v50, 0.0  ;;  %v2703_v56 = vadd.f32 %v2200_v54, %v3807_v31 }
 0x341   : > { %2345 = vst [vmem:[%s3814_s28 + $0x180] sm:$0xff] %v2281_v14  ;;  %v2283_v57 = vmax.f32 %v2702_v51, 0.0 }
 0x342   : > { %2346 = vst [vmem:[%s3814_s28 + $0x188] sm:$0xff] %v2282_v55  ;;  %v2284_v58 = vmax.f32 %v2703_v56, 0.0 }
 0x343   : > { %2347 = vst [vmem:[%s3814_s28 + $0x190] sm:$0xff] %v2283_v57 }
 0x344   : > { %2348 = vst [vmem:[%s3814_s28 + $0x198] sm:$0xff] %v2284_v58  ;;  %v2204_v59 = vpop.f32.mrb[52].mxu0 }
 0x345   : > { %v2704_v62 = vadd.f32 %v2204_v59, %v3803_v26  ;;  %v2206_v63 = vpop.f32.mrb[53].mxu0 }
 0x346   : > { %v2705_v0 = vadd.f32 %v2206_v63, %v3807_v31  ;;  %v2208_v1 = vpop.f32.mrb[54].mxu0 }
 0x347   : > { %v2285_v2 = vmax.f32 %v2704_v62, 0.0  ;;  %v2706_v3 = vadd.f32 %v2208_v1, %v3803_v26  ;;  %v2210_v4 = vpop.f32.mrb[55].mxu0 }
 0x348   : > { %v2286_v5 = vmax.f32 %v2705_v0, 0.0  ;;  %v2707_v8 = vadd.f32 %v2210_v4, %v3807_v31 }
 0x349   : > { %2349 = vst [vmem:[%s3814_s28 + $0x1a0] sm:$0xff] %v2285_v2  ;;  %v2287_v13 = vmax.f32 %v2706_v3, 0.0 }
 0x34a   : > { %2350 = vst [vmem:[%s3814_s28 + $0x1a8] sm:$0xff] %v2286_v5  ;;  %v2288_v52 = vmax.f32 %v2707_v8, 0.0 }
 0x34b   : > { %2351 = vst [vmem:[%s3814_s28 + $0x1b0] sm:$0xff] %v2287_v13 }
 0x34c   : > { %2352 = vst [vmem:[%s3814_s28 + $0x1b8] sm:$0xff] %v2288_v52  ;;  %v2214_v53 = vpop.f32.mrb[56].mxu0 }
 0x34d   : > { %v2708_v60 = vadd.f32 %v2214_v53, %v3803_v26  ;;  %v2216_v61 = vpop.f32.mrb[57].mxu0 }
 0x34e   : > { %v2709_v9 = vadd.f32 %v2216_v61, %v3807_v31  ;;  %v2218_v6 = vpop.f32.mrb[58].mxu0 }
 0x34f   : > { %v2289_v10 = vmax.f32 %v2708_v60, 0.0  ;;  %v2710_v7 = vadd.f32 %v2218_v6, %v3803_v26  ;;  %v2220_v15 = vpop.f32.mrb[59].mxu0 }
 0x350   : > { %v2290_v16 = vmax.f32 %v2709_v9, 0.0  ;;  %v2711_v17 = vadd.f32 %v2220_v15, %v3807_v31 }
 0x351   : > { %2353 = vst [vmem:[%s3814_s28 + $0x1c0] sm:$0xff] %v2289_v10  ;;  %v2291_v18 = vmax.f32 %v2710_v7, 0.0 }
 0x352   : > { %2354 = vst [vmem:[%s3814_s28 + $0x1c8] sm:$0xff] %v2290_v16  ;;  %v2292_v19 = vmax.f32 %v2711_v17, 0.0 }
 0x353   : > { %2355 = vst [vmem:[%s3814_s28 + $0x1d0] sm:$0xff] %v2291_v18 }
 0x354   : > { %2356 = vst [vmem:[%s3814_s28 + $0x1d8] sm:$0xff] %v2292_v19  ;;  %v2224_v20 = vpop.f32.mrb[60].mxu0 }
 0x355   : > { %v2712_v21 = vadd.f32 %v2224_v20, %v3803_v26  ;;  %v2226_v22 = vpop.f32.mrb[61].mxu0 }
 0x356   : > { %v2713_v23 = vadd.f32 %v2226_v22, %v3807_v31  ;;  %v2228_v24 = vpop.f32.mrb[62].mxu0 }
 0x357   : > { %v2293_v25 = vmax.f32 %v2712_v21, 0.0  ;;  %v2714_v35 = vadd.f32 %v2228_v24, %v3803_v26  ;;  %v2230_v27 = vpop.f32.mrb[63].mxu0 }
 0x358   : > { %v2294_v28 = vmax.f32 %v2713_v23, 0.0  ;;  %v2715_v11 = vadd.f32 %v2230_v27, %v3807_v31 }
 0x359   : > { %2357 = vst [vmem:[%s3814_s28 + $0x1e0] sm:$0xff] %v2293_v25  ;;  %v2295_v29 = vmax.f32 %v2714_v35, 0.0 }
 0x35a   : > { %2358 = vst [vmem:[%s3814_s28 + $0x1e8] sm:$0xff] %v2294_v28  ;;  %v2296_v12 = vmax.f32 %v2715_v11, 0.0 }
 0x35b   : > { %2359 = vst [vmem:[%s3814_s28 + $0x1f0] sm:$0xff] %v2295_v29 }
 0x35c   : > { %2360 = vst [vmem:[%s3814_s28 + $0x1f8] sm:$0xff] %v2296_v12 }
 0x35d   : > { %3192 = shalt.err (!%p3189_p2)
}
 0x35e   : > { %s3193_s24 = scalar_lea.hbm %s3942_s23, 8192  ;;  %s3197_s13 = scalar_lea.hbm %s3996_s5, 16384 }
 0x35f   : > { %p3194_p13 = scmp.ne.s32.totalorder %s3942_s23, %s3193_s24  ;;  %p3198_p4 = scmp.lt.u32.totalorder %s3942_s23, %s3996_s5 }
 0x360   : > { %p3199_p7 = scmp.lt.u32.totalorder %s3197_s13, %s3193_s24  ;;  %p3201_p11 = scmp.lt.u32.totalorder %s3193_s24, %s3942_s23 }
 0x361   : > { %p3195_p6 = pnand %p3194_p13, %p4010_p0 }
 0x362   : > { %p3200_p8 = por %p3199_p7, %p3198_p4 }
 0x363   : > { %p3196_p10 = pneg %p3195_p6 }
 0x364   : > { %p3202_p1 = por %p3201_p11, %p3200_p8 }
 0x366   : > { %p3203_p3 = pnand %p3202_p1, %p3196_p10 }
 0x368   : > { %3206 = shalt.err (!%p3203_p3)
}
 0x369   : > { %s3259_s14 = smov 256   ;;  %s3260_s30 = smov 16  }
 0x36a   : > { %2790 = dma.vmem_to_hbm [thread:$0]  (%p4010_p0), %s3944_s15, 8192, %s3942_s23, %s2362_s22, %s3259_s14, %s3259_s14, %s3260_s30  }
 0x36b PF: > { %s2391_s11 = sand.u32 1, %s3237_s18   ;;  %p4011_p5 = scmp.ne.s32.totalorder %s4001_s25, 0 }
 0x36c   : > { %p4012_p9 = scmp.ge.s32.totalorder %s3249_s21, 2  ;;  %s2392_s7 = scalar_lea.sflag [#allocation4], %s2391_s11 }
 0x36e   : > { %p2804_p12 = pnand %p4012_p9, %p4011_p5 }
 0x370   : > { %3232 = dma.done.wait (!%p2804_p12), %s2392_s7, 8192  }
 0x371   : > { %3234 = vsyncadd (!%p2804_p12), %s2392_s7, 4294959104  ;;  %p19_p2 = scmp.ge.s32.totalorder %s3404_s16, 4   ;;  %s4013_s18 = smov %s3241_s19 }
 0x372   : > { %s4014_s19 = smov %s3245_s20  ;;  %s4015_s20 = smov %s3413_s27 }
 0x373   : > { %s4016_s21 = smov %s3404_s16  ;;  %21 = sbr.rel (!%p19_p2) target bundleno = 6 (0x6), region = 93 }
 0x37a   :  { %2397 = vsyncpa [#allocation3], 1 }
 0x37b   :  { %2399 = vsyncpa [#allocation3 + $0x1], 1 }
 0x37c   :  { %2400 = vsyncpa [#allocation6], 1 }
 0x37d   :  { %2401 = vsyncpa [#allocation4], 1 }
 0x37e   :  { %2403 = vsyncpa [#allocation4 + $0x1], 1 }

</bundles_post_ra>
